<compile_context>
chip_gen: v7x
topology: tpu7x:2x2x1
jax: 0.10.0
libtpu: 0.0.40
codegen_flags: <defaults>
</compile_context>

<pallas_src>
import jax
import jax.numpy as jnp
from jax.experimental import pallas as pl
from jax.experimental.pallas import tpu as pltpu


# ----------------------------------------------------------------------------
# Fused forward kernel
# ----------------------------------------------------------------------------
def _dqn_fused_kernel(x_ref, w1_ref, s1_ref, b1_ref,
                      w2_ref, s2_ref, b2_ref,
                      fw1_ref, fb1_ref, fw2_ref, fb2_ref,
                      o_ref,
                      p1_ref, h1p_ref, p2_ref, h2_ref, flat_ref):
    # x_ref:   (B, G+2, G+2, cin)   spatially pre-padded NHWC input
    # w1_ref:  (9*cin, co1)         conv1 weight slab, row order (ky, kx, cin)
    # w2_ref:  (9*co1, co2)         conv2 weight slab
    # s*/b*:   (1, co*)             folded BN scale / bias
    # fw1_ref: (G*G*co2, 128) bf16  FC1 weight, rows permuted to NHWC order
    # fw2_ref: (128, n_actions)
    # o_ref:   (B, n_actions)
    B = x_ref.shape[0]
    G = x_ref.shape[1] - 2
    cin = x_ref.shape[3]
    co1 = w1_ref.shape[1]
    co2 = w2_ref.shape[1]
    M = B * G * G                       # batch folded into matmul rows

    taps = [(dy, dx) for dy in range(3) for dx in range(3)]

    # ---- conv1: im2col into VMEM scratch, one MXU matmul (K = 9*cin) --------
    for t, (dy, dx) in enumerate(taps):
        p1_ref[:, t * cin:(t + 1) * cin] = (
            x_ref[:, dy:dy + G, dx:dx + G, :].reshape(M, cin))
    h1 = jnp.dot(p1_ref[...], w1_ref[...], preferred_element_type=jnp.float32)
    h1 = jnp.maximum(h1 * s1_ref[...] + b1_ref[...], 0.0)     # f32 elementwise

    # ---- zero-pad conv1 activation spatially, kept in VMEM ------------------
    h1p_ref[...] = jnp.zeros_like(h1p_ref)
    h1p_ref[:, 1:G + 1, 1:G + 1, :] = h1.reshape(B, G, G, co1)

    # ---- conv2: same im2col trick (K = 9*co1) -------------------------------
    for t, (dy, dx) in enumerate(taps):
        p2_ref[:, t * co1:(t + 1) * co1] = (
            h1p_ref[:, dy:dy + G, dx:dx + G, :].reshape(M, co1))
    h2 = jnp.dot(p2_ref[...], w2_ref[...], preferred_element_type=jnp.float32)
    h2 = jnp.maximum(h2 * s2_ref[...] + b2_ref[...], 0.0)

    # ---- flatten to a lane-dense (B, G*G*co2) slab in VMEM ------------------
    # fw1 rows were permuted at packing time so this NHWC flatten order is
    # consumed directly: no NHWC->NCHW transpose anywhere in the forward pass.
    h2_ref[...] = h2.reshape(B, G * G, co2)
    for p in range(G * G):
        flat_ref[:, p * co2:(p + 1) * co2] = h2_ref[:, p, :]

    # ---- FC head: Linear + ReLU + Linear (fw1 bf16, f32 accumulation) -------
    flat = flat_ref[...]
    z = jnp.dot(flat.astype(fw1_ref.dtype), fw1_ref[...],
                preferred_element_type=jnp.float32) + fb1_ref[...]
    z = jnp.maximum(z, 0.0)
    o_ref[...] = (jnp.dot(z, fw2_ref[...],
                          preferred_element_type=jnp.float32) + fb2_ref[...])


def dqn_forward(x_nchw, params):
    """x_nchw: (B, 5, G, G) float32 -> (B, n_actions) float32."""
    B, cin, G, _ = x_nchw.shape
    co1 = params["s1"].shape[1]
    co2 = params["s2"].shape[1]
    n_actions = params["fw2"].shape[1]
    M = B * G * G

    # Tiny (~KB) layout glue on the *input only*: NCHW -> NHWC + 3x3 halo pad.
    # (Moving the channel axis to lanes is not safely expressible inside the
    # kernel; everything downstream, including the flatten order, stays fused.)
    x = jnp.transpose(x_nchw, (0, 2, 3, 1))
    x = jnp.pad(x, ((0, 0), (1, 1), (1, 1), (0, 0)))

    return pl.pallas_call(
        _dqn_fused_kernel,
        out_shape=jax.ShapeDtypeStruct((B, n_actions), jnp.float32),
        scratch_shapes=[
            pltpu.VMEM((M, 9 * cin), jnp.float32),            # conv1 im2col
            pltpu.VMEM((B, G + 2, G + 2, co1), jnp.float32),  # padded conv1 act
            pltpu.VMEM((M, 9 * co1), jnp.float32),            # conv2 im2col
            pltpu.VMEM((B, G * G, co2), jnp.float32),         # conv2 act (NHWC)
            pltpu.VMEM((B, G * G * co2), jnp.float32),        # lane-dense flatten
        ],
    )(x, params["w1"], params["s1"], params["c1"],
      params["w2"], params["s2"], params["c2"],
      params["fw1"], params["fb1"], params["fw2"], params["fb2"])


# ----------------------------------------------------------------------------
# Parameter handling (PyTorch-layout params -> kernel-layout params)
# ----------------------------------------------------------------------------
_BN_EPS = 1e-5


def init_raw_params(key, grid_size, n_actions):
    """Random parameters in PyTorch layout (Conv: OIHW, Linear: (out, in))."""
    ks = jax.random.split(key, 16)
    d_in = 32 * grid_size * grid_size

    def n(k, shape, s):
        return s * jax.random.normal(k, shape, jnp.float32)

    return dict(
        c1w=n(ks[0], (16, 5, 3, 3), 0.1), c1b=n(ks[1], (16,), 0.1),
        bn1g=1.0 + n(ks[2], (16,), 0.1), bn1b=n(ks[3], (16,), 0.1),
        bn1m=n(ks[4], (16,), 0.1),
        bn1v=1.0 + 0.1 * jax.random.uniform(ks[5], (16,), jnp.float32),
        c2w=n(ks[6], (32, 16, 3, 3), 0.1), c2b=n(ks[7], (32,), 0.1),
        bn2g=1.0 + n(ks[8], (32,), 0.1), bn2b=n(ks[9], (32,), 0.1),
        bn2m=n(ks[10], (32,), 0.1),
        bn2v=1.0 + 0.1 * jax.random.uniform(ks[11], (32,), jnp.float32),
        fc1w=n(ks[12], (128, d_in), 0.02), fc1b=n(ks[13], (128,), 0.02),
        fc2w=n(ks[14], (n_actions, 128), 0.1), fc2b=n(ks[15], (n_actions,), 0.02),
    )


def pack_params(raw, grid_size):
    """Fold BN (eval mode), build conv im2col slabs, permute + bf16-cast fw1."""
    def fold(conv_b, g, beta, rm, rv):
        s = g / jnp.sqrt(rv + _BN_EPS)
        return s.reshape(1, -1), (beta + (conv_b - rm) * s).reshape(1, -1)

    def conv_slab(w_oihw):
        # PyTorch OIHW -> HWIO -> (9*cin, cout), row order (ky, kx, cin)
        cout, cin = w_oihw.shape[0], w_oihw.shape[1]
        return jnp.transpose(w_oihw, (2, 3, 1, 0)).reshape(9 * cin, cout)

    s1, c1 = fold(raw["c1b"], raw["bn1g"], raw["bn1b"], raw["bn1m"], raw["bn1v"])
    s2, c2 = fold(raw["c2b"], raw["bn2g"], raw["bn2b"], raw["bn2m"], raw["bn2v"])

    G = grid_size
    co2 = raw["c2w"].shape[0]
    # PyTorch Linear weight is (out, in): transpose, then permute rows from the
    # NCHW flatten order (c*G*G + h*G + w) to the kernel's NHWC flatten order
    # ((h*G + w)*C + c). One-time cost; removes all runtime transposes.
    fw1 = raw["fc1w"].T                                          # (d_in, 128)
    fw1 = fw1.reshape(co2, G, G, -1).transpose(1, 2, 0, 3).reshape(G * G * co2, -1)
    fw1 = fw1.astype(jnp.bfloat16)           # bf16 storage; f32 accum on MXU

    return dict(
        w1=conv_slab(raw["c1w"]), s1=s1, c1=c1,
        w2=conv_slab(raw["c2w"]), s2=s2, c2=c2,
        fw1=fw1, fb1=raw["fc1b"].reshape(1, -1),
        fw2=raw["fc2w"].T, fb2=raw["fc2b"].reshape(1, -1),
    )


# ----------------------------------------------------------------------------
# Pure-JAX reference (PyTorch semantics) used as a correctness smoke test.
# ----------------------------------------------------------------------------
def dqn_reference(x_nchw, raw):
    def conv_bn_relu(x, w, b, g, beta, rm, rv):
        y = jax.lax.conv_general_dilated(
            x, w, window_strides=(1, 1), padding=((1, 1), (1, 1)),
            dimension_numbers=("NCHW", "OIHW", "NCHW"),
            precision=jax.lax.Precision.HIGHEST)
        y = y + b[None, :, None, None]
        y = (g[None, :, None, None] * (y - rm[None, :, None, None])
             / jnp.sqrt(rv + _BN_EPS)[None, :, None, None]
             + beta[None, :, None, None])
        return jnp.maximum(y, 0.0)

    x = conv_bn_relu(x_nchw, raw["c1w"], raw["c1b"],
                     raw["bn1g"], raw["bn1b"], raw["bn1m"], raw["bn1v"])
    x = conv_bn_relu(x, raw["c2w"], raw["c2b"],
                     raw["bn2g"], raw["bn2b"], raw["bn2m"], raw["bn2v"])
    flat = x.reshape(x.shape[0], -1)                       # NCHW flatten
    # Mirror the kernel's bf16 storage of the FC1 operands.
    fq = flat.astype(jnp.bfloat16).astype(jnp.float32)
    w1q = raw["fc1w"].astype(jnp.bfloat16).astype(jnp.float32)
    h = jnp.dot(fq, w1q.T, precision=jax.lax.Precision.HIGHEST) + raw["fc1b"]
    h = jnp.maximum(h, 0.0)
    return (jnp.dot(h, raw["fc2w"].T, precision=jax.lax.Precision.HIGHEST)
            + raw["fc2b"])


if __name__ == "__main__":
    grid_size = 8
    n_actions = 4
    batch = 2

    key = jax.random.PRNGKey(0)
    k_params, k_x = jax.random.split(key)
    raw = init_raw_params(k_params, grid_size, n_actions)
    params = pack_params(raw, grid_size)

    # PyTorch-style NCHW input: (B, 5, G, G)
    x = jax.random.normal(k_x, (batch, 5, grid_size, grid_size), jnp.float32)

    out = jax.jit(dqn_forward)(x, params)
    out = jax.block_until_ready(out)
    assert out.shape == (batch, n_actions)
    assert bool(jnp.all(jnp.isfinite(out)))

    ref = dqn_reference(x, raw)
    max_err = float(jnp.max(jnp.abs(out - ref)))
    assert bool(jnp.allclose(out, ref, rtol=1e-1, atol=1e-2)), (
        f"kernel/reference mismatch, max abs err = {max_err}")
    print("KERNEL_OK")
</pallas_src>

<mosaic_0001>
module attributes {stable_mosaic.version = 11 : i64} {
  func.func @_dqn_fused_kernel(%arg0: memref<2x10x10x5xf32, #tpu.memory_space<vmem>>, %arg1: memref<45x16xf32, #tpu.memory_space<vmem>>, %arg2: memref<1x16xf32, #tpu.memory_space<vmem>>, %arg3: memref<1x16xf32, #tpu.memory_space<vmem>>, %arg4: memref<144x32xf32, #tpu.memory_space<vmem>>, %arg5: memref<1x32xf32, #tpu.memory_space<vmem>>, %arg6: memref<1x32xf32, #tpu.memory_space<vmem>>, %arg7: memref<2048x128xbf16, #tpu.memory_space<vmem>>, %arg8: memref<1x128xf32, #tpu.memory_space<vmem>>, %arg9: memref<128x4xf32, #tpu.memory_space<vmem>>, %arg10: memref<1x4xf32, #tpu.memory_space<vmem>>, %arg11: memref<2x4xf32, #tpu.memory_space<vmem>>, %arg12: memref<128x45xf32, #tpu.memory_space<vmem>>, %arg13: memref<2x10x10x16xf32, #tpu.memory_space<vmem>>, %arg14: memref<128x144xf32, #tpu.memory_space<vmem>>, %arg15: memref<2x64x32xf32, #tpu.memory_space<vmem>>, %arg16: memref<2x2048xf32, #tpu.memory_space<vmem>>) attributes {dimension_semantics = [], scalar_prefetch = 0 : i64, scratch_operands = 5 : i64, tpu.core_type = #tpu.core_type<tc>} {
    %c0 = arith.constant 0 : index
    %c0_0 = arith.constant 0 : index
    %c0_1 = arith.constant 0 : index
    %c0_2 = arith.constant 0 : index
    %0 = vector.load %arg0[%c0, %c0_0, %c0_1, %c0_2] : memref<2x10x10x5xf32, #tpu.memory_space<vmem>>, vector<2x8x8x5xf32>
    %1 = vector.shape_cast %0 : vector<2x8x8x5xf32> to vector<128x5xf32>
    %c0_3 = arith.constant 0 : index
    %c0_4 = arith.constant 0 : index
    %2 = vector.load %arg12[%c0_3, %c0_4] : memref<128x45xf32, #tpu.memory_space<vmem>>, vector<128x5xf32>
    tpu.vector_store %arg12[%c0_3, %c0_4], %1 {strides = array<i32>} : memref<128x45xf32, #tpu.memory_space<vmem>>, vector<128x5xf32>,
    %c0_5 = arith.constant 0 : index
    %c0_6 = arith.constant 0 : index
    %c1 = arith.constant 1 : index
    %c0_7 = arith.constant 0 : index
    %3 = vector.load %arg0[%c0_5, %c0_6, %c1, %c0_7] : memref<2x10x10x5xf32, #tpu.memory_space<vmem>>, vector<2x8x8x5xf32>
    %4 = vector.shape_cast %3 : vector<2x8x8x5xf32> to vector<128x5xf32>
    %c0_8 = arith.constant 0 : index
    %c5 = arith.constant 5 : index
    %5 = vector.load %arg12[%c0_8, %c5] : memref<128x45xf32, #tpu.memory_space<vmem>>, vector<128x5xf32>
    tpu.vector_store %arg12[%c0_8, %c5], %4 {strides = array<i32>} : memref<128x45xf32, #tpu.memory_space<vmem>>, vector<128x5xf32>,
    %c0_9 = arith.constant 0 : index
    %c0_10 = arith.constant 0 : index
    %c2 = arith.constant 2 : index
    %c0_11 = arith.constant 0 : index
    %6 = vector.load %arg0[%c0_9, %c0_10, %c2, %c0_11] : memref<2x10x10x5xf32, #tpu.memory_space<vmem>>, vector<2x8x8x5xf32>
    %7 = vector.shape_cast %6 : vector<2x8x8x5xf32> to vector<128x5xf32>
    %c0_12 = arith.constant 0 : index
    %c10 = arith.constant 10 : index
    %8 = vector.load %arg12[%c0_12, %c10] : memref<128x45xf32, #tpu.memory_space<vmem>>, vector<128x5xf32>
    tpu.vector_store %arg12[%c0_12, %c10], %7 {strides = array<i32>} : memref<128x45xf32, #tpu.memory_space<vmem>>, vector<128x5xf32>,
    %c0_13 = arith.constant 0 : index
    %c1_14 = arith.constant 1 : index
    %c0_15 = arith.constant 0 : index
    %c0_16 = arith.constant 0 : index
    %9 = vector.load %arg0[%c0_13, %c1_14, %c0_15, %c0_16] : memref<2x10x10x5xf32, #tpu.memory_space<vmem>>, vector<2x8x8x5xf32>
    %10 = vector.shape_cast %9 : vector<2x8x8x5xf32> to vector<128x5xf32>
    %c0_17 = arith.constant 0 : index
    %c15 = arith.constant 15 : index
    %11 = vector.load %arg12[%c0_17, %c15] : memref<128x45xf32, #tpu.memory_space<vmem>>, vector<128x5xf32>
    tpu.vector_store %arg12[%c0_17, %c15], %10 {strides = array<i32>} : memref<128x45xf32, #tpu.memory_space<vmem>>, vector<128x5xf32>,
    %c0_18 = arith.constant 0 : index
    %c1_19 = arith.constant 1 : index
    %c1_20 = arith.constant 1 : index
    %c0_21 = arith.constant 0 : index
    %12 = vector.load %arg0[%c0_18, %c1_19, %c1_20, %c0_21] : memref<2x10x10x5xf32, #tpu.memory_space<vmem>>, vector<2x8x8x5xf32>
    %13 = vector.shape_cast %12 : vector<2x8x8x5xf32> to vector<128x5xf32>
    %c0_22 = arith.constant 0 : index
    %c20 = arith.constant 20 : index
    %14 = vector.load %arg12[%c0_22, %c20] : memref<128x45xf32, #tpu.memory_space<vmem>>, vector<128x5xf32>
    tpu.vector_store %arg12[%c0_22, %c20], %13 {strides = array<i32>} : memref<128x45xf32, #tpu.memory_space<vmem>>, vector<128x5xf32>,
    %c0_23 = arith.constant 0 : index
    %c1_24 = arith.constant 1 : index
    %c2_25 = arith.constant 2 : index
    %c0_26 = arith.constant 0 : index
    %15 = vector.load %arg0[%c0_23, %c1_24, %c2_25, %c0_26] : memref<2x10x10x5xf32, #tpu.memory_space<vmem>>, vector<2x8x8x5xf32>
    %16 = vector.shape_cast %15 : vector<2x8x8x5xf32> to vector<128x5xf32>
    %c0_27 = arith.constant 0 : index
    %c25 = arith.constant 25 : index
    %17 = vector.load %arg12[%c0_27, %c25] : memref<128x45xf32, #tpu.memory_space<vmem>>, vector<128x5xf32>
    tpu.vector_store %arg12[%c0_27, %c25], %16 {strides = array<i32>} : memref<128x45xf32, #tpu.memory_space<vmem>>, vector<128x5xf32>,
    %c0_28 = arith.constant 0 : index
    %c2_29 = arith.constant 2 : index
    %c0_30 = arith.constant 0 : index
    %c0_31 = arith.constant 0 : index
    %18 = vector.load %arg0[%c0_28, %c2_29, %c0_30, %c0_31] : memref<2x10x10x5xf32, #tpu.memory_space<vmem>>, vector<2x8x8x5xf32>
    %19 = vector.shape_cast %18 : vector<2x8x8x5xf32> to vector<128x5xf32>
    %c0_32 = arith.constant 0 : index
    %c30 = arith.constant 30 : index
    %20 = vector.load %arg12[%c0_32, %c30] : memref<128x45xf32, #tpu.memory_space<vmem>>, vector<128x5xf32>
    tpu.vector_store %arg12[%c0_32, %c30], %19 {strides = array<i32>} : memref<128x45xf32, #tpu.memory_space<vmem>>, vector<128x5xf32>,
    %c0_33 = arith.constant 0 : index
    %c2_34 = arith.constant 2 : index
    %c1_35 = arith.constant 1 : index
    %c0_36 = arith.constant 0 : index
    %21 = vector.load %arg0[%c0_33, %c2_34, %c1_35, %c0_36] : memref<2x10x10x5xf32, #tpu.memory_space<vmem>>, vector<2x8x8x5xf32>
    %22 = vector.shape_cast %21 : vector<2x8x8x5xf32> to vector<128x5xf32>
    %c0_37 = arith.constant 0 : index
    %c35 = arith.constant 35 : index
    %23 = vector.load %arg12[%c0_37, %c35] : memref<128x45xf32, #tpu.memory_space<vmem>>, vector<128x5xf32>
    tpu.vector_store %arg12[%c0_37, %c35], %22 {strides = array<i32>} : memref<128x45xf32, #tpu.memory_space<vmem>>, vector<128x5xf32>,
    %c0_38 = arith.constant 0 : index
    %c2_39 = arith.constant 2 : index
    %c2_40 = arith.constant 2 : index
    %c0_41 = arith.constant 0 : index
    %24 = vector.load %arg0[%c0_38, %c2_39, %c2_40, %c0_41] : memref<2x10x10x5xf32, #tpu.memory_space<vmem>>, vector<2x8x8x5xf32>
    %25 = vector.shape_cast %24 : vector<2x8x8x5xf32> to vector<128x5xf32>
    %c0_42 = arith.constant 0 : index
    %c40 = arith.constant 40 : index
    %26 = vector.load %arg12[%c0_42, %c40] : memref<128x45xf32, #tpu.memory_space<vmem>>, vector<128x5xf32>
    tpu.vector_store %arg12[%c0_42, %c40], %25 {strides = array<i32>} : memref<128x45xf32, #tpu.memory_space<vmem>>, vector<128x5xf32>,
    %c0_43 = arith.constant 0 : index
    %c0_44 = arith.constant 0 : index
    %27 = vector.load %arg12[%c0_43, %c0_44] : memref<128x45xf32, #tpu.memory_space<vmem>>, vector<128x45xf32>
    %c0_45 = arith.constant 0 : index
    %c0_46 = arith.constant 0 : index
    %28 = vector.load %arg1[%c0_45, %c0_46] : memref<45x16xf32, #tpu.memory_space<vmem>>, vector<45x16xf32>
    %cst = arith.constant dense<0.000000e+00> : vector<128x16xf32>
    %29 = tpu.matmul %27, %28, %cst {dimension_numbers = #tpu.dot_dimension_numbers<[1], [0], [0], [1], [0, 0, 1, 1], [], []>} : vector<128x45xf32>, vector<45x16xf32>, vector<128x16xf32> -> vector<128x16xf32>
    %c0_47 = arith.constant 0 : index
    %c0_48 = arith.constant 0 : index
    %30 = vector.load %arg2[%c0_47, %c0_48] : memref<1x16xf32, #tpu.memory_space<vmem>>, vector<1x16xf32>
    %31 = vector.broadcast %30 : vector<1x16xf32> to vector<128x16xf32>
    %32 = arith.mulf %29, %31 : vector<128x16xf32>
    %c0_49 = arith.constant 0 : index
    %c0_50 = arith.constant 0 : index
    %33 = vector.load %arg3[%c0_49, %c0_50] : memref<1x16xf32, #tpu.memory_space<vmem>>, vector<1x16xf32>
    %34 = vector.broadcast %33 : vector<1x16xf32> to vector<128x16xf32>
    %35 = arith.addf %32, %34 : vector<128x16xf32>
    %cst_51 = arith.constant 0.000000e+00 : f32
    %36 = vector.broadcast %cst_51 : f32 to vector<128x16xf32>
    %37 = arith.maximumf %35, %36 : vector<128x16xf32>
    %cst_52 = arith.constant 0.000000e+00 : f32
    %38 = vector.broadcast %cst_52 : f32 to vector<2x10x10x16xf32>
    %c0_53 = arith.constant 0 : index
    %c0_54 = arith.constant 0 : index
    %c0_55 = arith.constant 0 : index
    %c0_56 = arith.constant 0 : index
    %39 = vector.load %arg13[%c0_53, %c0_54, %c0_55, %c0_56] : memref<2x10x10x16xf32, #tpu.memory_space<vmem>>, vector<2x10x10x16xf32>
    tpu.vector_store %arg13[%c0_53, %c0_54, %c0_55, %c0_56], %38 {strides = array<i32>} : memref<2x10x10x16xf32, #tpu.memory_space<vmem>>, vector<2x10x10x16xf32>,
    %40 = vector.shape_cast %37 : vector<128x16xf32> to vector<2x8x8x16xf32>
    %c0_57 = arith.constant 0 : index
    %c1_58 = arith.constant 1 : index
    %c1_59 = arith.constant 1 : index
    %c0_60 = arith.constant 0 : index
    %41 = vector.load %arg13[%c0_57, %c1_58, %c1_59, %c0_60] : memref<2x10x10x16xf32, #tpu.memory_space<vmem>>, vector<2x8x8x16xf32>
    tpu.vector_store %arg13[%c0_57, %c1_58, %c1_59, %c0_60], %40 {strides = array<i32>} : memref<2x10x10x16xf32, #tpu.memory_space<vmem>>, vector<2x8x8x16xf32>,
    %c0_61 = arith.constant 0 : index
    %c0_62 = arith.constant 0 : index
    %c0_63 = arith.constant 0 : index
    %c0_64 = arith.constant 0 : index
    %42 = vector.load %arg13[%c0_61, %c0_62, %c0_63, %c0_64] : memref<2x10x10x16xf32, #tpu.memory_space<vmem>>, vector<2x8x8x16xf32>
    %43 = vector.shape_cast %42 : vector<2x8x8x16xf32> to vector<128x16xf32>
    %c0_65 = arith.constant 0 : index
    %c0_66 = arith.constant 0 : index
    %44 = vector.load %arg14[%c0_65, %c0_66] : memref<128x144xf32, #tpu.memory_space<vmem>>, vector<128x16xf32>
    tpu.vector_store %arg14[%c0_65, %c0_66], %43 {strides = array<i32>} : memref<128x144xf32, #tpu.memory_space<vmem>>, vector<128x16xf32>,
    %c0_67 = arith.constant 0 : index
    %c0_68 = arith.constant 0 : index
    %c1_69 = arith.constant 1 : index
    %c0_70 = arith.constant 0 : index
    %45 = vector.load %arg13[%c0_67, %c0_68, %c1_69, %c0_70] : memref<2x10x10x16xf32, #tpu.memory_space<vmem>>, vector<2x8x8x16xf32>
    %46 = vector.shape_cast %45 : vector<2x8x8x16xf32> to vector<128x16xf32>
    %c0_71 = arith.constant 0 : index
    %c16 = arith.constant 16 : index
    %47 = vector.load %arg14[%c0_71, %c16] : memref<128x144xf32, #tpu.memory_space<vmem>>, vector<128x16xf32>
    tpu.vector_store %arg14[%c0_71, %c16], %46 {strides = array<i32>} : memref<128x144xf32, #tpu.memory_space<vmem>>, vector<128x16xf32>,
    %c0_72 = arith.constant 0 : index
    %c0_73 = arith.constant 0 : index
    %c2_74 = arith.constant 2 : index
    %c0_75 = arith.constant 0 : index
    %48 = vector.load %arg13[%c0_72, %c0_73, %c2_74, %c0_75] : memref<2x10x10x16xf32, #tpu.memory_space<vmem>>, vector<2x8x8x16xf32>
    %49 = vector.shape_cast %48 : vector<2x8x8x16xf32> to vector<128x16xf32>
    %c0_76 = arith.constant 0 : index
    %c32 = arith.constant 32 : index
    %50 = vector.load %arg14[%c0_76, %c32] : memref<128x144xf32, #tpu.memory_space<vmem>>, vector<128x16xf32>
    tpu.vector_store %arg14[%c0_76, %c32], %49 {strides = array<i32>} : memref<128x144xf32, #tpu.memory_space<vmem>>, vector<128x16xf32>,
    %c0_77 = arith.constant 0 : index
    %c1_78 = arith.constant 1 : index
    %c0_79 = arith.constant 0 : index
    %c0_80 = arith.constant 0 : index
    %51 = vector.load %arg13[%c0_77, %c1_78, %c0_79, %c0_80] : memref<2x10x10x16xf32, #tpu.memory_space<vmem>>, vector<2x8x8x16xf32>
    %52 = vector.shape_cast %51 : vector<2x8x8x16xf32> to vector<128x16xf32>
    %c0_81 = arith.constant 0 : index
    %c48 = arith.constant 48 : index
    %53 = vector.load %arg14[%c0_81, %c48] : memref<128x144xf32, #tpu.memory_space<vmem>>, vector<128x16xf32>
    tpu.vector_store %arg14[%c0_81, %c48], %52 {strides = array<i32>} : memref<128x144xf32, #tpu.memory_space<vmem>>, vector<128x16xf32>,
    %c0_82 = arith.constant 0 : index
    %c1_83 = arith.constant 1 : index
    %c1_84 = arith.constant 1 : index
    %c0_85 = arith.constant 0 : index
    %54 = vector.load %arg13[%c0_82, %c1_83, %c1_84, %c0_85] : memref<2x10x10x16xf32, #tpu.memory_space<vmem>>, vector<2x8x8x16xf32>
    %55 = vector.shape_cast %54 : vector<2x8x8x16xf32> to vector<128x16xf32>
    %c0_86 = arith.constant 0 : index
    %c64 = arith.constant 64 : index
    %56 = vector.load %arg14[%c0_86, %c64] : memref<128x144xf32, #tpu.memory_space<vmem>>, vector<128x16xf32>
    tpu.vector_store %arg14[%c0_86, %c64], %55 {strides = array<i32>} : memref<128x144xf32, #tpu.memory_space<vmem>>, vector<128x16xf32>,
    %c0_87 = arith.constant 0 : index
    %c1_88 = arith.constant 1 : index
    %c2_89 = arith.constant 2 : index
    %c0_90 = arith.constant 0 : index
    %57 = vector.load %arg13[%c0_87, %c1_88, %c2_89, %c0_90] : memref<2x10x10x16xf32, #tpu.memory_space<vmem>>, vector<2x8x8x16xf32>
    %58 = vector.shape_cast %57 : vector<2x8x8x16xf32> to vector<128x16xf32>
    %c0_91 = arith.constant 0 : index
    %c80 = arith.constant 80 : index
    %59 = vector.load %arg14[%c0_91, %c80] : memref<128x144xf32, #tpu.memory_space<vmem>>, vector<128x16xf32>
    tpu.vector_store %arg14[%c0_91, %c80], %58 {strides = array<i32>} : memref<128x144xf32, #tpu.memory_space<vmem>>, vector<128x16xf32>,
    %c0_92 = arith.constant 0 : index
    %c2_93 = arith.constant 2 : index
    %c0_94 = arith.constant 0 : index
    %c0_95 = arith.constant 0 : index
    %60 = vector.load %arg13[%c0_92, %c2_93, %c0_94, %c0_95] : memref<2x10x10x16xf32, #tpu.memory_space<vmem>>, vector<2x8x8x16xf32>
    %61 = vector.shape_cast %60 : vector<2x8x8x16xf32> to vector<128x16xf32>
    %c0_96 = arith.constant 0 : index
    %c96 = arith.constant 96 : index
    %62 = vector.load %arg14[%c0_96, %c96] : memref<128x144xf32, #tpu.memory_space<vmem>>, vector<128x16xf32>
    tpu.vector_store %arg14[%c0_96, %c96], %61 {strides = array<i32>} : memref<128x144xf32, #tpu.memory_space<vmem>>, vector<128x16xf32>,
    %c0_97 = arith.constant 0 : index
    %c2_98 = arith.constant 2 : index
    %c1_99 = arith.constant 1 : index
    %c0_100 = arith.constant 0 : index
    %63 = vector.load %arg13[%c0_97, %c2_98, %c1_99, %c0_100] : memref<2x10x10x16xf32, #tpu.memory_space<vmem>>, vector<2x8x8x16xf32>
    %64 = vector.shape_cast %63 : vector<2x8x8x16xf32> to vector<128x16xf32>
    %c0_101 = arith.constant 0 : index
    %c112 = arith.constant 112 : index
    %65 = vector.load %arg14[%c0_101, %c112] : memref<128x144xf32, #tpu.memory_space<vmem>>, vector<128x16xf32>
    tpu.vector_store %arg14[%c0_101, %c112], %64 {strides = array<i32>} : memref<128x144xf32, #tpu.memory_space<vmem>>, vector<128x16xf32>,
    %c0_102 = arith.constant 0 : index
    %c2_103 = arith.constant 2 : index
    %c2_104 = arith.constant 2 : index
    %c0_105 = arith.constant 0 : index
    %66 = vector.load %arg13[%c0_102, %c2_103, %c2_104, %c0_105] : memref<2x10x10x16xf32, #tpu.memory_space<vmem>>, vector<2x8x8x16xf32>
    %67 = vector.shape_cast %66 : vector<2x8x8x16xf32> to vector<128x16xf32>
    %c0_106 = arith.constant 0 : index
    %c128 = arith.constant 128 : index
    %68 = vector.load %arg14[%c0_106, %c128] : memref<128x144xf32, #tpu.memory_space<vmem>>, vector<128x16xf32>
    tpu.vector_store %arg14[%c0_106, %c128], %67 {strides = array<i32>} : memref<128x144xf32, #tpu.memory_space<vmem>>, vector<128x16xf32>,
    %c0_107 = arith.constant 0 : index
    %c0_108 = arith.constant 0 : index
    %69 = vector.load %arg14[%c0_107, %c0_108] : memref<128x144xf32, #tpu.memory_space<vmem>>, vector<128x144xf32>
    %c0_109 = arith.constant 0 : index
    %c0_110 = arith.constant 0 : index
    %70 = vector.load %arg4[%c0_109, %c0_110] : memref<144x32xf32, #tpu.memory_space<vmem>>, vector<144x32xf32>
    %cst_111 = arith.constant dense<0.000000e+00> : vector<128x32xf32>
    %71 = tpu.matmul %69, %70, %cst_111 {dimension_numbers = #tpu.dot_dimension_numbers<[1], [0], [0], [1], [0, 0, 1, 1], [], []>} : vector<128x144xf32>, vector<144x32xf32>, vector<128x32xf32> -> vector<128x32xf32>
    %c0_112 = arith.constant 0 : index
    %c0_113 = arith.constant 0 : index
    %72 = vector.load %arg5[%c0_112, %c0_113] : memref<1x32xf32, #tpu.memory_space<vmem>>, vector<1x32xf32>
    %73 = vector.broadcast %72 : vector<1x32xf32> to vector<128x32xf32>
    %74 = arith.mulf %71, %73 : vector<128x32xf32>
    %c0_114 = arith.constant 0 : index
    %c0_115 = arith.constant 0 : index
    %75 = vector.load %arg6[%c0_114, %c0_115] : memref<1x32xf32, #tpu.memory_space<vmem>>, vector<1x32xf32>
    %76 = vector.broadcast %75 : vector<1x32xf32> to vector<128x32xf32>
    %77 = arith.addf %74, %76 : vector<128x32xf32>
    %cst_116 = arith.constant 0.000000e+00 : f32
    %78 = vector.broadcast %cst_116 : f32 to vector<128x32xf32>
    %79 = arith.maximumf %77, %78 : vector<128x32xf32>
    %80 = vector.shape_cast %79 : vector<128x32xf32> to vector<2x64x32xf32>
    %c0_117 = arith.constant 0 : index
    %c0_118 = arith.constant 0 : index
    %c0_119 = arith.constant 0 : index
    %81 = vector.load %arg15[%c0_117, %c0_118, %c0_119] : memref<2x64x32xf32, #tpu.memory_space<vmem>>, vector<2x64x32xf32>
    tpu.vector_store %arg15[%c0_117, %c0_118, %c0_119], %80 {strides = array<i32>} : memref<2x64x32xf32, #tpu.memory_space<vmem>>, vector<2x64x32xf32>,
    %c0_120 = arith.constant 0 : index
    %c0_121 = arith.constant 0 : index
    %c0_122 = arith.constant 0 : index
    %82 = vector.load %arg15[%c0_120, %c0_121, %c0_122] : memref<2x64x32xf32, #tpu.memory_space<vmem>>, vector<2x1x32xf32>
    %83 = vector.shape_cast %82 : vector<2x1x32xf32> to vector<2x32xf32>
    %c0_123 = arith.constant 0 : index
    %c0_124 = arith.constant 0 : index
    %84 = vector.load %arg16[%c0_123, %c0_124] : memref<2x2048xf32, #tpu.memory_space<vmem>>, vector<2x32xf32>
    tpu.vector_store %arg16[%c0_123, %c0_124], %83 {strides = array<i32>} : memref<2x2048xf32, #tpu.memory_space<vmem>>, vector<2x32xf32>,
    %c0_125 = arith.constant 0 : index
    %c1_126 = arith.constant 1 : index
    %c0_127 = arith.constant 0 : index
    %85 = vector.load %arg15[%c0_125, %c1_126, %c0_127] : memref<2x64x32xf32, #tpu.memory_space<vmem>>, vector<2x1x32xf32>
    %86 = vector.shape_cast %85 : vector<2x1x32xf32> to vector<2x32xf32>
    %c0_128 = arith.constant 0 : index
    %c32_129 = arith.constant 32 : index
    %87 = vector.load %arg16[%c0_128, %c32_129] : memref<2x2048xf32, #tpu.memory_space<vmem>>, vector<2x32xf32>
    tpu.vector_store %arg16[%c0_128, %c32_129], %86 {strides = array<i32>} : memref<2x2048xf32, #tpu.memory_space<vmem>>, vector<2x32xf32>,
    %c0_130 = arith.constant 0 : index
    %c2_131 = arith.constant 2 : index
    %c0_132 = arith.constant 0 : index
    %88 = vector.load %arg15[%c0_130, %c2_131, %c0_132] : memref<2x64x32xf32, #tpu.memory_space<vmem>>, vector<2x1x32xf32>
    %89 = vector.shape_cast %88 : vector<2x1x32xf32> to vector<2x32xf32>
    %c0_133 = arith.constant 0 : index
    %c64_134 = arith.constant 64 : index
    %90 = vector.load %arg16[%c0_133, %c64_134] : memref<2x2048xf32, #tpu.memory_space<vmem>>, vector<2x32xf32>
    tpu.vector_store %arg16[%c0_133, %c64_134], %89 {strides = array<i32>} : memref<2x2048xf32, #tpu.memory_space<vmem>>, vector<2x32xf32>,
    %c0_135 = arith.constant 0 : index
    %c3 = arith.constant 3 : index
    %c0_136 = arith.constant 0 : index
    %91 = vector.load %arg15[%c0_135, %c3, %c0_136] : memref<2x64x32xf32, #tpu.memory_space<vmem>>, vector<2x1x32xf32>
    %92 = vector.shape_cast %91 : vector<2x1x32xf32> to vector<2x32xf32>
    %c0_137 = arith.constant 0 : index
    %c96_138 = arith.constant 96 : index
    %93 = vector.load %arg16[%c0_137, %c96_138] : memref<2x2048xf32, #tpu.memory_space<vmem>>, vector<2x32xf32>
    tpu.vector_store %arg16[%c0_137, %c96_138], %92 {strides = array<i32>} : memref<2x2048xf32, #tpu.memory_space<vmem>>, vector<2x32xf32>,
    %c0_139 = arith.constant 0 : index
    %c4 = arith.constant 4 : index
    %c0_140 = arith.constant 0 : index
    %94 = vector.load %arg15[%c0_139, %c4, %c0_140] : memref<2x64x32xf32, #tpu.memory_space<vmem>>, vector<2x1x32xf32>
    %95 = vector.shape_cast %94 : vector<2x1x32xf32> to vector<2x32xf32>
    %c0_141 = arith.constant 0 : index
    %c128_142 = arith.constant 128 : index
    %96 = vector.load %arg16[%c0_141, %c128_142] : memref<2x2048xf32, #tpu.memory_space<vmem>>, vector<2x32xf32>
    tpu.vector_store %arg16[%c0_141, %c128_142], %95 {strides = array<i32>} : memref<2x2048xf32, #tpu.memory_space<vmem>>, vector<2x32xf32>,
    %c0_143 = arith.constant 0 : index
    %c5_144 = arith.constant 5 : index
    %c0_145 = arith.constant 0 : index
    %97 = vector.load %arg15[%c0_143, %c5_144, %c0_145] : memref<2x64x32xf32, #tpu.memory_space<vmem>>, vector<2x1x32xf32>
    %98 = vector.shape_cast %97 : vector<2x1x32xf32> to vector<2x32xf32>
    %c0_146 = arith.constant 0 : index
    %c160 = arith.constant 160 : index
    %99 = vector.load %arg16[%c0_146, %c160] : memref<2x2048xf32, #tpu.memory_space<vmem>>, vector<2x32xf32>
    tpu.vector_store %arg16[%c0_146, %c160], %98 {strides = array<i32>} : memref<2x2048xf32, #tpu.memory_space<vmem>>, vector<2x32xf32>,
    %c0_147 = arith.constant 0 : index
    %c6 = arith.constant 6 : index
    %c0_148 = arith.constant 0 : index
    %100 = vector.load %arg15[%c0_147, %c6, %c0_148] : memref<2x64x32xf32, #tpu.memory_space<vmem>>, vector<2x1x32xf32>
    %101 = vector.shape_cast %100 : vector<2x1x32xf32> to vector<2x32xf32>
    %c0_149 = arith.constant 0 : index
    %c192 = arith.constant 192 : index
    %102 = vector.load %arg16[%c0_149, %c192] : memref<2x2048xf32, #tpu.memory_space<vmem>>, vector<2x32xf32>
    tpu.vector_store %arg16[%c0_149, %c192], %101 {strides = array<i32>} : memref<2x2048xf32, #tpu.memory_space<vmem>>, vector<2x32xf32>,
    %c0_150 = arith.constant 0 : index
    %c7 = arith.constant 7 : index
    %c0_151 = arith.constant 0 : index
    %103 = vector.load %arg15[%c0_150, %c7, %c0_151] : memref<2x64x32xf32, #tpu.memory_space<vmem>>, vector<2x1x32xf32>
    %104 = vector.shape_cast %103 : vector<2x1x32xf32> to vector<2x32xf32>
    %c0_152 = arith.constant 0 : index
    %c224 = arith.constant 224 : index
    %105 = vector.load %arg16[%c0_152, %c224] : memref<2x2048xf32, #tpu.memory_space<vmem>>, vector<2x32xf32>
    tpu.vector_store %arg16[%c0_152, %c224], %104 {strides = array<i32>} : memref<2x2048xf32, #tpu.memory_space<vmem>>, vector<2x32xf32>,
    %c0_153 = arith.constant 0 : index
    %c8 = arith.constant 8 : index
    %c0_154 = arith.constant 0 : index
    %106 = vector.load %arg15[%c0_153, %c8, %c0_154] : memref<2x64x32xf32, #tpu.memory_space<vmem>>, vector<2x1x32xf32>
    %107 = vector.shape_cast %106 : vector<2x1x32xf32> to vector<2x32xf32>
    %c0_155 = arith.constant 0 : index
    %c256 = arith.constant 256 : index
    %108 = vector.load %arg16[%c0_155, %c256] : memref<2x2048xf32, #tpu.memory_space<vmem>>, vector<2x32xf32>
    tpu.vector_store %arg16[%c0_155, %c256], %107 {strides = array<i32>} : memref<2x2048xf32, #tpu.memory_space<vmem>>, vector<2x32xf32>,
    %c0_156 = arith.constant 0 : index
    %c9 = arith.constant 9 : index
    %c0_157 = arith.constant 0 : index
    %109 = vector.load %arg15[%c0_156, %c9, %c0_157] : memref<2x64x32xf32, #tpu.memory_space<vmem>>, vector<2x1x32xf32>
    %110 = vector.shape_cast %109 : vector<2x1x32xf32> to vector<2x32xf32>
    %c0_158 = arith.constant 0 : index
    %c288 = arith.constant 288 : index
    %111 = vector.load %arg16[%c0_158, %c288] : memref<2x2048xf32, #tpu.memory_space<vmem>>, vector<2x32xf32>
    tpu.vector_store %arg16[%c0_158, %c288], %110 {strides = array<i32>} : memref<2x2048xf32, #tpu.memory_space<vmem>>, vector<2x32xf32>,
    %c0_159 = arith.constant 0 : index
    %c10_160 = arith.constant 10 : index
    %c0_161 = arith.constant 0 : index
    %112 = vector.load %arg15[%c0_159, %c10_160, %c0_161] : memref<2x64x32xf32, #tpu.memory_space<vmem>>, vector<2x1x32xf32>
    %113 = vector.shape_cast %112 : vector<2x1x32xf32> to vector<2x32xf32>
    %c0_162 = arith.constant 0 : index
    %c320 = arith.constant 320 : index
    %114 = vector.load %arg16[%c0_162, %c320] : memref<2x2048xf32, #tpu.memory_space<vmem>>, vector<2x32xf32>
    tpu.vector_store %arg16[%c0_162, %c320], %113 {strides = array<i32>} : memref<2x2048xf32, #tpu.memory_space<vmem>>, vector<2x32xf32>,
    %c0_163 = arith.constant 0 : index
    %c11 = arith.constant 11 : index
    %c0_164 = arith.constant 0 : index
    %115 = vector.load %arg15[%c0_163, %c11, %c0_164] : memref<2x64x32xf32, #tpu.memory_space<vmem>>, vector<2x1x32xf32>
    %116 = vector.shape_cast %115 : vector<2x1x32xf32> to vector<2x32xf32>
    %c0_165 = arith.constant 0 : index
    %c352 = arith.constant 352 : index
    %117 = vector.load %arg16[%c0_165, %c352] : memref<2x2048xf32, #tpu.memory_space<vmem>>, vector<2x32xf32>
    tpu.vector_store %arg16[%c0_165, %c352], %116 {strides = array<i32>} : memref<2x2048xf32, #tpu.memory_space<vmem>>, vector<2x32xf32>,
    %c0_166 = arith.constant 0 : index
    %c12 = arith.constant 12 : index
    %c0_167 = arith.constant 0 : index
    %118 = vector.load %arg15[%c0_166, %c12, %c0_167] : memref<2x64x32xf32, #tpu.memory_space<vmem>>, vector<2x1x32xf32>
    %119 = vector.shape_cast %118 : vector<2x1x32xf32> to vector<2x32xf32>
    %c0_168 = arith.constant 0 : index
    %c384 = arith.constant 384 : index
    %120 = vector.load %arg16[%c0_168, %c384] : memref<2x2048xf32, #tpu.memory_space<vmem>>, vector<2x32xf32>
    tpu.vector_store %arg16[%c0_168, %c384], %119 {strides = array<i32>} : memref<2x2048xf32, #tpu.memory_space<vmem>>, vector<2x32xf32>,
    %c0_169 = arith.constant 0 : index
    %c13 = arith.constant 13 : index
    %c0_170 = arith.constant 0 : index
    %121 = vector.load %arg15[%c0_169, %c13, %c0_170] : memref<2x64x32xf32, #tpu.memory_space<vmem>>, vector<2x1x32xf32>
    %122 = vector.shape_cast %121 : vector<2x1x32xf32> to vector<2x32xf32>
    %c0_171 = arith.constant 0 : index
    %c416 = arith.constant 416 : index
    %123 = vector.load %arg16[%c0_171, %c416] : memref<2x2048xf32, #tpu.memory_space<vmem>>, vector<2x32xf32>
    tpu.vector_store %arg16[%c0_171, %c416], %122 {strides = array<i32>} : memref<2x2048xf32, #tpu.memory_space<vmem>>, vector<2x32xf32>,
    %c0_172 = arith.constant 0 : index
    %c14 = arith.constant 14 : index
    %c0_173 = arith.constant 0 : index
    %124 = vector.load %arg15[%c0_172, %c14, %c0_173] : memref<2x64x32xf32, #tpu.memory_space<vmem>>, vector<2x1x32xf32>
    %125 = vector.shape_cast %124 : vector<2x1x32xf32> to vector<2x32xf32>
    %c0_174 = arith.constant 0 : index
    %c448 = arith.constant 448 : index
    %126 = vector.load %arg16[%c0_174, %c448] : memref<2x2048xf32, #tpu.memory_space<vmem>>, vector<2x32xf32>
    tpu.vector_store %arg16[%c0_174, %c448], %125 {strides = array<i32>} : memref<2x2048xf32, #tpu.memory_space<vmem>>, vector<2x32xf32>,
    %c0_175 = arith.constant 0 : index
    %c15_176 = arith.constant 15 : index
    %c0_177 = arith.constant 0 : index
    %127 = vector.load %arg15[%c0_175, %c15_176, %c0_177] : memref<2x64x32xf32, #tpu.memory_space<vmem>>, vector<2x1x32xf32>
    %128 = vector.shape_cast %127 : vector<2x1x32xf32> to vector<2x32xf32>
    %c0_178 = arith.constant 0 : index
    %c480 = arith.constant 480 : index
    %129 = vector.load %arg16[%c0_178, %c480] : memref<2x2048xf32, #tpu.memory_space<vmem>>, vector<2x32xf32>
    tpu.vector_store %arg16[%c0_178, %c480], %128 {strides = array<i32>} : memref<2x2048xf32, #tpu.memory_space<vmem>>, vector<2x32xf32>,
    %c0_179 = arith.constant 0 : index
    %c16_180 = arith.constant 16 : index
    %c0_181 = arith.constant 0 : index
    %130 = vector.load %arg15[%c0_179, %c16_180, %c0_181] : memref<2x64x32xf32, #tpu.memory_space<vmem>>, vector<2x1x32xf32>
    %131 = vector.shape_cast %130 : vector<2x1x32xf32> to vector<2x32xf32>
    %c0_182 = arith.constant 0 : index
    %c512 = arith.constant 512 : index
    %132 = vector.load %arg16[%c0_182, %c512] : memref<2x2048xf32, #tpu.memory_space<vmem>>, vector<2x32xf32>
    tpu.vector_store %arg16[%c0_182, %c512], %131 {strides = array<i32>} : memref<2x2048xf32, #tpu.memory_space<vmem>>, vector<2x32xf32>,
    %c0_183 = arith.constant 0 : index
    %c17 = arith.constant 17 : index
    %c0_184 = arith.constant 0 : index
    %133 = vector.load %arg15[%c0_183, %c17, %c0_184] : memref<2x64x32xf32, #tpu.memory_space<vmem>>, vector<2x1x32xf32>
    %134 = vector.shape_cast %133 : vector<2x1x32xf32> to vector<2x32xf32>
    %c0_185 = arith.constant 0 : index
    %c544 = arith.constant 544 : index
    %135 = vector.load %arg16[%c0_185, %c544] : memref<2x2048xf32, #tpu.memory_space<vmem>>, vector<2x32xf32>
    tpu.vector_store %arg16[%c0_185, %c544], %134 {strides = array<i32>} : memref<2x2048xf32, #tpu.memory_space<vmem>>, vector<2x32xf32>,
    %c0_186 = arith.constant 0 : index
    %c18 = arith.constant 18 : index
    %c0_187 = arith.constant 0 : index
    %136 = vector.load %arg15[%c0_186, %c18, %c0_187] : memref<2x64x32xf32, #tpu.memory_space<vmem>>, vector<2x1x32xf32>
    %137 = vector.shape_cast %136 : vector<2x1x32xf32> to vector<2x32xf32>
    %c0_188 = arith.constant 0 : index
    %c576 = arith.constant 576 : index
    %138 = vector.load %arg16[%c0_188, %c576] : memref<2x2048xf32, #tpu.memory_space<vmem>>, vector<2x32xf32>
    tpu.vector_store %arg16[%c0_188, %c576], %137 {strides = array<i32>} : memref<2x2048xf32, #tpu.memory_space<vmem>>, vector<2x32xf32>,
    %c0_189 = arith.constant 0 : index
    %c19 = arith.constant 19 : index
    %c0_190 = arith.constant 0 : index
    %139 = vector.load %arg15[%c0_189, %c19, %c0_190] : memref<2x64x32xf32, #tpu.memory_space<vmem>>, vector<2x1x32xf32>
    %140 = vector.shape_cast %139 : vector<2x1x32xf32> to vector<2x32xf32>
    %c0_191 = arith.constant 0 : index
    %c608 = arith.constant 608 : index
    %141 = vector.load %arg16[%c0_191, %c608] : memref<2x2048xf32, #tpu.memory_space<vmem>>, vector<2x32xf32>
    tpu.vector_store %arg16[%c0_191, %c608], %140 {strides = array<i32>} : memref<2x2048xf32, #tpu.memory_space<vmem>>, vector<2x32xf32>,
    %c0_192 = arith.constant 0 : index
    %c20_193 = arith.constant 20 : index
    %c0_194 = arith.constant 0 : index
    %142 = vector.load %arg15[%c0_192, %c20_193, %c0_194] : memref<2x64x32xf32, #tpu.memory_space<vmem>>, vector<2x1x32xf32>
    %143 = vector.shape_cast %142 : vector<2x1x32xf32> to vector<2x32xf32>
    %c0_195 = arith.constant 0 : index
    %c640 = arith.constant 640 : index
    %144 = vector.load %arg16[%c0_195, %c640] : memref<2x2048xf32, #tpu.memory_space<vmem>>, vector<2x32xf32>
    tpu.vector_store %arg16[%c0_195, %c640], %143 {strides = array<i32>} : memref<2x2048xf32, #tpu.memory_space<vmem>>, vector<2x32xf32>,
    %c0_196 = arith.constant 0 : index
    %c21 = arith.constant 21 : index
    %c0_197 = arith.constant 0 : index
    %145 = vector.load %arg15[%c0_196, %c21, %c0_197] : memref<2x64x32xf32, #tpu.memory_space<vmem>>, vector<2x1x32xf32>
    %146 = vector.shape_cast %145 : vector<2x1x32xf32> to vector<2x32xf32>
    %c0_198 = arith.constant 0 : index
    %c672 = arith.constant 672 : index
    %147 = vector.load %arg16[%c0_198, %c672] : memref<2x2048xf32, #tpu.memory_space<vmem>>, vector<2x32xf32>
    tpu.vector_store %arg16[%c0_198, %c672], %146 {strides = array<i32>} : memref<2x2048xf32, #tpu.memory_space<vmem>>, vector<2x32xf32>,
    %c0_199 = arith.constant 0 : index
    %c22 = arith.constant 22 : index
    %c0_200 = arith.constant 0 : index
    %148 = vector.load %arg15[%c0_199, %c22, %c0_200] : memref<2x64x32xf32, #tpu.memory_space<vmem>>, vector<2x1x32xf32>
    %149 = vector.shape_cast %148 : vector<2x1x32xf32> to vector<2x32xf32>
    %c0_201 = arith.constant 0 : index
    %c704 = arith.constant 704 : index
    %150 = vector.load %arg16[%c0_201, %c704] : memref<2x2048xf32, #tpu.memory_space<vmem>>, vector<2x32xf32>
    tpu.vector_store %arg16[%c0_201, %c704], %149 {strides = array<i32>} : memref<2x2048xf32, #tpu.memory_space<vmem>>, vector<2x32xf32>,
    %c0_202 = arith.constant 0 : index
    %c23 = arith.constant 23 : index
    %c0_203 = arith.constant 0 : index
    %151 = vector.load %arg15[%c0_202, %c23, %c0_203] : memref<2x64x32xf32, #tpu.memory_space<vmem>>, vector<2x1x32xf32>
    %152 = vector.shape_cast %151 : vector<2x1x32xf32> to vector<2x32xf32>
    %c0_204 = arith.constant 0 : index
    %c736 = arith.constant 736 : index
    %153 = vector.load %arg16[%c0_204, %c736] : memref<2x2048xf32, #tpu.memory_space<vmem>>, vector<2x32xf32>
    tpu.vector_store %arg16[%c0_204, %c736], %152 {strides = array<i32>} : memref<2x2048xf32, #tpu.memory_space<vmem>>, vector<2x32xf32>,
    %c0_205 = arith.constant 0 : index
    %c24 = arith.constant 24 : index
    %c0_206 = arith.constant 0 : index
    %154 = vector.load %arg15[%c0_205, %c24, %c0_206] : memref<2x64x32xf32, #tpu.memory_space<vmem>>, vector<2x1x32xf32>
    %155 = vector.shape_cast %154 : vector<2x1x32xf32> to vector<2x32xf32>
    %c0_207 = arith.constant 0 : index
    %c768 = arith.constant 768 : index
    %156 = vector.load %arg16[%c0_207, %c768] : memref<2x2048xf32, #tpu.memory_space<vmem>>, vector<2x32xf32>
    tpu.vector_store %arg16[%c0_207, %c768], %155 {strides = array<i32>} : memref<2x2048xf32, #tpu.memory_space<vmem>>, vector<2x32xf32>,
    %c0_208 = arith.constant 0 : index
    %c25_209 = arith.constant 25 : index
    %c0_210 = arith.constant 0 : index
    %157 = vector.load %arg15[%c0_208, %c25_209, %c0_210] : memref<2x64x32xf32, #tpu.memory_space<vmem>>, vector<2x1x32xf32>
    %158 = vector.shape_cast %157 : vector<2x1x32xf32> to vector<2x32xf32>
    %c0_211 = arith.constant 0 : index
    %c800 = arith.constant 800 : index
    %159 = vector.load %arg16[%c0_211, %c800] : memref<2x2048xf32, #tpu.memory_space<vmem>>, vector<2x32xf32>
    tpu.vector_store %arg16[%c0_211, %c800], %158 {strides = array<i32>} : memref<2x2048xf32, #tpu.memory_space<vmem>>, vector<2x32xf32>,
    %c0_212 = arith.constant 0 : index
    %c26 = arith.constant 26 : index
    %c0_213 = arith.constant 0 : index
    %160 = vector.load %arg15[%c0_212, %c26, %c0_213] : memref<2x64x32xf32, #tpu.memory_space<vmem>>, vector<2x1x32xf32>
    %161 = vector.shape_cast %160 : vector<2x1x32xf32> to vector<2x32xf32>
    %c0_214 = arith.constant 0 : index
    %c832 = arith.constant 832 : index
    %162 = vector.load %arg16[%c0_214, %c832] : memref<2x2048xf32, #tpu.memory_space<vmem>>, vector<2x32xf32>
    tpu.vector_store %arg16[%c0_214, %c832], %161 {strides = array<i32>} : memref<2x2048xf32, #tpu.memory_space<vmem>>, vector<2x32xf32>,
    %c0_215 = arith.constant 0 : index
    %c27 = arith.constant 27 : index
    %c0_216 = arith.constant 0 : index
    %163 = vector.load %arg15[%c0_215, %c27, %c0_216] : memref<2x64x32xf32, #tpu.memory_space<vmem>>, vector<2x1x32xf32>
    %164 = vector.shape_cast %163 : vector<2x1x32xf32> to vector<2x32xf32>
    %c0_217 = arith.constant 0 : index
    %c864 = arith.constant 864 : index
    %165 = vector.load %arg16[%c0_217, %c864] : memref<2x2048xf32, #tpu.memory_space<vmem>>, vector<2x32xf32>
    tpu.vector_store %arg16[%c0_217, %c864], %164 {strides = array<i32>} : memref<2x2048xf32, #tpu.memory_space<vmem>>, vector<2x32xf32>,
    %c0_218 = arith.constant 0 : index
    %c28 = arith.constant 28 : index
    %c0_219 = arith.constant 0 : index
    %166 = vector.load %arg15[%c0_218, %c28, %c0_219] : memref<2x64x32xf32, #tpu.memory_space<vmem>>, vector<2x1x32xf32>
    %167 = vector.shape_cast %166 : vector<2x1x32xf32> to vector<2x32xf32>
    %c0_220 = arith.constant 0 : index
    %c896 = arith.constant 896 : index
    %168 = vector.load %arg16[%c0_220, %c896] : memref<2x2048xf32, #tpu.memory_space<vmem>>, vector<2x32xf32>
    tpu.vector_store %arg16[%c0_220, %c896], %167 {strides = array<i32>} : memref<2x2048xf32, #tpu.memory_space<vmem>>, vector<2x32xf32>,
    %c0_221 = arith.constant 0 : index
    %c29 = arith.constant 29 : index
    %c0_222 = arith.constant 0 : index
    %169 = vector.load %arg15[%c0_221, %c29, %c0_222] : memref<2x64x32xf32, #tpu.memory_space<vmem>>, vector<2x1x32xf32>
    %170 = vector.shape_cast %169 : vector<2x1x32xf32> to vector<2x32xf32>
    %c0_223 = arith.constant 0 : index
    %c928 = arith.constant 928 : index
    %171 = vector.load %arg16[%c0_223, %c928] : memref<2x2048xf32, #tpu.memory_space<vmem>>, vector<2x32xf32>
    tpu.vector_store %arg16[%c0_223, %c928], %170 {strides = array<i32>} : memref<2x2048xf32, #tpu.memory_space<vmem>>, vector<2x32xf32>,
    %c0_224 = arith.constant 0 : index
    %c30_225 = arith.constant 30 : index
    %c0_226 = arith.constant 0 : index
    %172 = vector.load %arg15[%c0_224, %c30_225, %c0_226] : memref<2x64x32xf32, #tpu.memory_space<vmem>>, vector<2x1x32xf32>
    %173 = vector.shape_cast %172 : vector<2x1x32xf32> to vector<2x32xf32>
    %c0_227 = arith.constant 0 : index
    %c960 = arith.constant 960 : index
    %174 = vector.load %arg16[%c0_227, %c960] : memref<2x2048xf32, #tpu.memory_space<vmem>>, vector<2x32xf32>
    tpu.vector_store %arg16[%c0_227, %c960], %173 {strides = array<i32>} : memref<2x2048xf32, #tpu.memory_space<vmem>>, vector<2x32xf32>,
    %c0_228 = arith.constant 0 : index
    %c31 = arith.constant 31 : index
    %c0_229 = arith.constant 0 : index
    %175 = vector.load %arg15[%c0_228, %c31, %c0_229] : memref<2x64x32xf32, #tpu.memory_space<vmem>>, vector<2x1x32xf32>
    %176 = vector.shape_cast %175 : vector<2x1x32xf32> to vector<2x32xf32>
    %c0_230 = arith.constant 0 : index
    %c992 = arith.constant 992 : index
    %177 = vector.load %arg16[%c0_230, %c992] : memref<2x2048xf32, #tpu.memory_space<vmem>>, vector<2x32xf32>
    tpu.vector_store %arg16[%c0_230, %c992], %176 {strides = array<i32>} : memref<2x2048xf32, #tpu.memory_space<vmem>>, vector<2x32xf32>,
    %c0_231 = arith.constant 0 : index
    %c32_232 = arith.constant 32 : index
    %c0_233 = arith.constant 0 : index
    %178 = vector.load %arg15[%c0_231, %c32_232, %c0_233] : memref<2x64x32xf32, #tpu.memory_space<vmem>>, vector<2x1x32xf32>
    %179 = vector.shape_cast %178 : vector<2x1x32xf32> to vector<2x32xf32>
    %c0_234 = arith.constant 0 : index
    %c1024 = arith.constant 1024 : index
    %180 = vector.load %arg16[%c0_234, %c1024] : memref<2x2048xf32, #tpu.memory_space<vmem>>, vector<2x32xf32>
    tpu.vector_store %arg16[%c0_234, %c1024], %179 {strides = array<i32>} : memref<2x2048xf32, #tpu.memory_space<vmem>>, vector<2x32xf32>,
    %c0_235 = arith.constant 0 : index
    %c33 = arith.constant 33 : index
    %c0_236 = arith.constant 0 : index
    %181 = vector.load %arg15[%c0_235, %c33, %c0_236] : memref<2x64x32xf32, #tpu.memory_space<vmem>>, vector<2x1x32xf32>
    %182 = vector.shape_cast %181 : vector<2x1x32xf32> to vector<2x32xf32>
    %c0_237 = arith.constant 0 : index
    %c1056 = arith.constant 1056 : index
    %183 = vector.load %arg16[%c0_237, %c1056] : memref<2x2048xf32, #tpu.memory_space<vmem>>, vector<2x32xf32>
    tpu.vector_store %arg16[%c0_237, %c1056], %182 {strides = array<i32>} : memref<2x2048xf32, #tpu.memory_space<vmem>>, vector<2x32xf32>,
    %c0_238 = arith.constant 0 : index
    %c34 = arith.constant 34 : index
    %c0_239 = arith.constant 0 : index
    %184 = vector.load %arg15[%c0_238, %c34, %c0_239] : memref<2x64x32xf32, #tpu.memory_space<vmem>>, vector<2x1x32xf32>
    %185 = vector.shape_cast %184 : vector<2x1x32xf32> to vector<2x32xf32>
    %c0_240 = arith.constant 0 : index
    %c1088 = arith.constant 1088 : index
    %186 = vector.load %arg16[%c0_240, %c1088] : memref<2x2048xf32, #tpu.memory_space<vmem>>, vector<2x32xf32>
    tpu.vector_store %arg16[%c0_240, %c1088], %185 {strides = array<i32>} : memref<2x2048xf32, #tpu.memory_space<vmem>>, vector<2x32xf32>,
    %c0_241 = arith.constant 0 : index
    %c35_242 = arith.constant 35 : index
    %c0_243 = arith.constant 0 : index
    %187 = vector.load %arg15[%c0_241, %c35_242, %c0_243] : memref<2x64x32xf32, #tpu.memory_space<vmem>>, vector<2x1x32xf32>
    %188 = vector.shape_cast %187 : vector<2x1x32xf32> to vector<2x32xf32>
    %c0_244 = arith.constant 0 : index
    %c1120 = arith.constant 1120 : index
    %189 = vector.load %arg16[%c0_244, %c1120] : memref<2x2048xf32, #tpu.memory_space<vmem>>, vector<2x32xf32>
    tpu.vector_store %arg16[%c0_244, %c1120], %188 {strides = array<i32>} : memref<2x2048xf32, #tpu.memory_space<vmem>>, vector<2x32xf32>,
    %c0_245 = arith.constant 0 : index
    %c36 = arith.constant 36 : index
    %c0_246 = arith.constant 0 : index
    %190 = vector.load %arg15[%c0_245, %c36, %c0_246] : memref<2x64x32xf32, #tpu.memory_space<vmem>>, vector<2x1x32xf32>
    %191 = vector.shape_cast %190 : vector<2x1x32xf32> to vector<2x32xf32>
    %c0_247 = arith.constant 0 : index
    %c1152 = arith.constant 1152 : index
    %192 = vector.load %arg16[%c0_247, %c1152] : memref<2x2048xf32, #tpu.memory_space<vmem>>, vector<2x32xf32>
    tpu.vector_store %arg16[%c0_247, %c1152], %191 {strides = array<i32>} : memref<2x2048xf32, #tpu.memory_space<vmem>>, vector<2x32xf32>,
    %c0_248 = arith.constant 0 : index
    %c37 = arith.constant 37 : index
    %c0_249 = arith.constant 0 : index
    %193 = vector.load %arg15[%c0_248, %c37, %c0_249] : memref<2x64x32xf32, #tpu.memory_space<vmem>>, vector<2x1x32xf32>
    %194 = vector.shape_cast %193 : vector<2x1x32xf32> to vector<2x32xf32>
    %c0_250 = arith.constant 0 : index
    %c1184 = arith.constant 1184 : index
    %195 = vector.load %arg16[%c0_250, %c1184] : memref<2x2048xf32, #tpu.memory_space<vmem>>, vector<2x32xf32>
    tpu.vector_store %arg16[%c0_250, %c1184], %194 {strides = array<i32>} : memref<2x2048xf32, #tpu.memory_space<vmem>>, vector<2x32xf32>,
    %c0_251 = arith.constant 0 : index
    %c38 = arith.constant 38 : index
    %c0_252 = arith.constant 0 : index
    %196 = vector.load %arg15[%c0_251, %c38, %c0_252] : memref<2x64x32xf32, #tpu.memory_space<vmem>>, vector<2x1x32xf32>
    %197 = vector.shape_cast %196 : vector<2x1x32xf32> to vector<2x32xf32>
    %c0_253 = arith.constant 0 : index
    %c1216 = arith.constant 1216 : index
    %198 = vector.load %arg16[%c0_253, %c1216] : memref<2x2048xf32, #tpu.memory_space<vmem>>, vector<2x32xf32>
    tpu.vector_store %arg16[%c0_253, %c1216], %197 {strides = array<i32>} : memref<2x2048xf32, #tpu.memory_space<vmem>>, vector<2x32xf32>,
    %c0_254 = arith.constant 0 : index
    %c39 = arith.constant 39 : index
    %c0_255 = arith.constant 0 : index
    %199 = vector.load %arg15[%c0_254, %c39, %c0_255] : memref<2x64x32xf32, #tpu.memory_space<vmem>>, vector<2x1x32xf32>
    %200 = vector.shape_cast %199 : vector<2x1x32xf32> to vector<2x32xf32>
    %c0_256 = arith.constant 0 : index
    %c1248 = arith.constant 1248 : index
    %201 = vector.load %arg16[%c0_256, %c1248] : memref<2x2048xf32, #tpu.memory_space<vmem>>, vector<2x32xf32>
    tpu.vector_store %arg16[%c0_256, %c1248], %200 {strides = array<i32>} : memref<2x2048xf32, #tpu.memory_space<vmem>>, vector<2x32xf32>,
    %c0_257 = arith.constant 0 : index
    %c40_258 = arith.constant 40 : index
    %c0_259 = arith.constant 0 : index
    %202 = vector.load %arg15[%c0_257, %c40_258, %c0_259] : memref<2x64x32xf32, #tpu.memory_space<vmem>>, vector<2x1x32xf32>
    %203 = vector.shape_cast %202 : vector<2x1x32xf32> to vector<2x32xf32>
    %c0_260 = arith.constant 0 : index
    %c1280 = arith.constant 1280 : index
    %204 = vector.load %arg16[%c0_260, %c1280] : memref<2x2048xf32, #tpu.memory_space<vmem>>, vector<2x32xf32>
    tpu.vector_store %arg16[%c0_260, %c1280], %203 {strides = array<i32>} : memref<2x2048xf32, #tpu.memory_space<vmem>>, vector<2x32xf32>,
    %c0_261 = arith.constant 0 : index
    %c41 = arith.constant 41 : index
    %c0_262 = arith.constant 0 : index
    %205 = vector.load %arg15[%c0_261, %c41, %c0_262] : memref<2x64x32xf32, #tpu.memory_space<vmem>>, vector<2x1x32xf32>
    %206 = vector.shape_cast %205 : vector<2x1x32xf32> to vector<2x32xf32>
    %c0_263 = arith.constant 0 : index
    %c1312 = arith.constant 1312 : index
    %207 = vector.load %arg16[%c0_263, %c1312] : memref<2x2048xf32, #tpu.memory_space<vmem>>, vector<2x32xf32>
    tpu.vector_store %arg16[%c0_263, %c1312], %206 {strides = array<i32>} : memref<2x2048xf32, #tpu.memory_space<vmem>>, vector<2x32xf32>,
    %c0_264 = arith.constant 0 : index
    %c42 = arith.constant 42 : index
    %c0_265 = arith.constant 0 : index
    %208 = vector.load %arg15[%c0_264, %c42, %c0_265] : memref<2x64x32xf32, #tpu.memory_space<vmem>>, vector<2x1x32xf32>
    %209 = vector.shape_cast %208 : vector<2x1x32xf32> to vector<2x32xf32>
    %c0_266 = arith.constant 0 : index
    %c1344 = arith.constant 1344 : index
    %210 = vector.load %arg16[%c0_266, %c1344] : memref<2x2048xf32, #tpu.memory_space<vmem>>, vector<2x32xf32>
    tpu.vector_store %arg16[%c0_266, %c1344], %209 {strides = array<i32>} : memref<2x2048xf32, #tpu.memory_space<vmem>>, vector<2x32xf32>,
    %c0_267 = arith.constant 0 : index
    %c43 = arith.constant 43 : index
    %c0_268 = arith.constant 0 : index
    %211 = vector.load %arg15[%c0_267, %c43, %c0_268] : memref<2x64x32xf32, #tpu.memory_space<vmem>>, vector<2x1x32xf32>
    %212 = vector.shape_cast %211 : vector<2x1x32xf32> to vector<2x32xf32>
    %c0_269 = arith.constant 0 : index
    %c1376 = arith.constant 1376 : index
    %213 = vector.load %arg16[%c0_269, %c1376] : memref<2x2048xf32, #tpu.memory_space<vmem>>, vector<2x32xf32>
    tpu.vector_store %arg16[%c0_269, %c1376], %212 {strides = array<i32>} : memref<2x2048xf32, #tpu.memory_space<vmem>>, vector<2x32xf32>,
    %c0_270 = arith.constant 0 : index
    %c44 = arith.constant 44 : index
    %c0_271 = arith.constant 0 : index
    %214 = vector.load %arg15[%c0_270, %c44, %c0_271] : memref<2x64x32xf32, #tpu.memory_space<vmem>>, vector<2x1x32xf32>
    %215 = vector.shape_cast %214 : vector<2x1x32xf32> to vector<2x32xf32>
    %c0_272 = arith.constant 0 : index
    %c1408 = arith.constant 1408 : index
    %216 = vector.load %arg16[%c0_272, %c1408] : memref<2x2048xf32, #tpu.memory_space<vmem>>, vector<2x32xf32>
    tpu.vector_store %arg16[%c0_272, %c1408], %215 {strides = array<i32>} : memref<2x2048xf32, #tpu.memory_space<vmem>>, vector<2x32xf32>,
    %c0_273 = arith.constant 0 : index
    %c45 = arith.constant 45 : index
    %c0_274 = arith.constant 0 : index
    %217 = vector.load %arg15[%c0_273, %c45, %c0_274] : memref<2x64x32xf32, #tpu.memory_space<vmem>>, vector<2x1x32xf32>
    %218 = vector.shape_cast %217 : vector<2x1x32xf32> to vector<2x32xf32>
    %c0_275 = arith.constant 0 : index
    %c1440 = arith.constant 1440 : index
    %219 = vector.load %arg16[%c0_275, %c1440] : memref<2x2048xf32, #tpu.memory_space<vmem>>, vector<2x32xf32>
    tpu.vector_store %arg16[%c0_275, %c1440], %218 {strides = array<i32>} : memref<2x2048xf32, #tpu.memory_space<vmem>>, vector<2x32xf32>,
    %c0_276 = arith.constant 0 : index
    %c46 = arith.constant 46 : index
    %c0_277 = arith.constant 0 : index
    %220 = vector.load %arg15[%c0_276, %c46, %c0_277] : memref<2x64x32xf32, #tpu.memory_space<vmem>>, vector<2x1x32xf32>
    %221 = vector.shape_cast %220 : vector<2x1x32xf32> to vector<2x32xf32>
    %c0_278 = arith.constant 0 : index
    %c1472 = arith.constant 1472 : index
    %222 = vector.load %arg16[%c0_278, %c1472] : memref<2x2048xf32, #tpu.memory_space<vmem>>, vector<2x32xf32>
    tpu.vector_store %arg16[%c0_278, %c1472], %221 {strides = array<i32>} : memref<2x2048xf32, #tpu.memory_space<vmem>>, vector<2x32xf32>,
    %c0_279 = arith.constant 0 : index
    %c47 = arith.constant 47 : index
    %c0_280 = arith.constant 0 : index
    %223 = vector.load %arg15[%c0_279, %c47, %c0_280] : memref<2x64x32xf32, #tpu.memory_space<vmem>>, vector<2x1x32xf32>
    %224 = vector.shape_cast %223 : vector<2x1x32xf32> to vector<2x32xf32>
    %c0_281 = arith.constant 0 : index
    %c1504 = arith.constant 1504 : index
    %225 = vector.load %arg16[%c0_281, %c1504] : memref<2x2048xf32, #tpu.memory_space<vmem>>, vector<2x32xf32>
    tpu.vector_store %arg16[%c0_281, %c1504], %224 {strides = array<i32>} : memref<2x2048xf32, #tpu.memory_space<vmem>>, vector<2x32xf32>,
    %c0_282 = arith.constant 0 : index
    %c48_283 = arith.constant 48 : index
    %c0_284 = arith.constant 0 : index
    %226 = vector.load %arg15[%c0_282, %c48_283, %c0_284] : memref<2x64x32xf32, #tpu.memory_space<vmem>>, vector<2x1x32xf32>
    %227 = vector.shape_cast %226 : vector<2x1x32xf32> to vector<2x32xf32>
    %c0_285 = arith.constant 0 : index
    %c1536 = arith.constant 1536 : index
    %228 = vector.load %arg16[%c0_285, %c1536] : memref<2x2048xf32, #tpu.memory_space<vmem>>, vector<2x32xf32>
    tpu.vector_store %arg16[%c0_285, %c1536], %227 {strides = array<i32>} : memref<2x2048xf32, #tpu.memory_space<vmem>>, vector<2x32xf32>,
    %c0_286 = arith.constant 0 : index
    %c49 = arith.constant 49 : index
    %c0_287 = arith.constant 0 : index
    %229 = vector.load %arg15[%c0_286, %c49, %c0_287] : memref<2x64x32xf32, #tpu.memory_space<vmem>>, vector<2x1x32xf32>
    %230 = vector.shape_cast %229 : vector<2x1x32xf32> to vector<2x32xf32>
    %c0_288 = arith.constant 0 : index
    %c1568 = arith.constant 1568 : index
    %231 = vector.load %arg16[%c0_288, %c1568] : memref<2x2048xf32, #tpu.memory_space<vmem>>, vector<2x32xf32>
    tpu.vector_store %arg16[%c0_288, %c1568], %230 {strides = array<i32>} : memref<2x2048xf32, #tpu.memory_space<vmem>>, vector<2x32xf32>,
    %c0_289 = arith.constant 0 : index
    %c50 = arith.constant 50 : index
    %c0_290 = arith.constant 0 : index
    %232 = vector.load %arg15[%c0_289, %c50, %c0_290] : memref<2x64x32xf32, #tpu.memory_space<vmem>>, vector<2x1x32xf32>
    %233 = vector.shape_cast %232 : vector<2x1x32xf32> to vector<2x32xf32>
    %c0_291 = arith.constant 0 : index
    %c1600 = arith.constant 1600 : index
    %234 = vector.load %arg16[%c0_291, %c1600] : memref<2x2048xf32, #tpu.memory_space<vmem>>, vector<2x32xf32>
    tpu.vector_store %arg16[%c0_291, %c1600], %233 {strides = array<i32>} : memref<2x2048xf32, #tpu.memory_space<vmem>>, vector<2x32xf32>,
    %c0_292 = arith.constant 0 : index
    %c51 = arith.constant 51 : index
    %c0_293 = arith.constant 0 : index
    %235 = vector.load %arg15[%c0_292, %c51, %c0_293] : memref<2x64x32xf32, #tpu.memory_space<vmem>>, vector<2x1x32xf32>
    %236 = vector.shape_cast %235 : vector<2x1x32xf32> to vector<2x32xf32>
    %c0_294 = arith.constant 0 : index
    %c1632 = arith.constant 1632 : index
    %237 = vector.load %arg16[%c0_294, %c1632] : memref<2x2048xf32, #tpu.memory_space<vmem>>, vector<2x32xf32>
    tpu.vector_store %arg16[%c0_294, %c1632], %236 {strides = array<i32>} : memref<2x2048xf32, #tpu.memory_space<vmem>>, vector<2x32xf32>,
    %c0_295 = arith.constant 0 : index
    %c52 = arith.constant 52 : index
    %c0_296 = arith.constant 0 : index
    %238 = vector.load %arg15[%c0_295, %c52, %c0_296] : memref<2x64x32xf32, #tpu.memory_space<vmem>>, vector<2x1x32xf32>
    %239 = vector.shape_cast %238 : vector<2x1x32xf32> to vector<2x32xf32>
    %c0_297 = arith.constant 0 : index
    %c1664 = arith.constant 1664 : index
    %240 = vector.load %arg16[%c0_297, %c1664] : memref<2x2048xf32, #tpu.memory_space<vmem>>, vector<2x32xf32>
    tpu.vector_store %arg16[%c0_297, %c1664], %239 {strides = array<i32>} : memref<2x2048xf32, #tpu.memory_space<vmem>>, vector<2x32xf32>,
    %c0_298 = arith.constant 0 : index
    %c53 = arith.constant 53 : index
    %c0_299 = arith.constant 0 : index
    %241 = vector.load %arg15[%c0_298, %c53, %c0_299] : memref<2x64x32xf32, #tpu.memory_space<vmem>>, vector<2x1x32xf32>
    %242 = vector.shape_cast %241 : vector<2x1x32xf32> to vector<2x32xf32>
    %c0_300 = arith.constant 0 : index
    %c1696 = arith.constant 1696 : index
    %243 = vector.load %arg16[%c0_300, %c1696] : memref<2x2048xf32, #tpu.memory_space<vmem>>, vector<2x32xf32>
    tpu.vector_store %arg16[%c0_300, %c1696], %242 {strides = array<i32>} : memref<2x2048xf32, #tpu.memory_space<vmem>>, vector<2x32xf32>,
    %c0_301 = arith.constant 0 : index
    %c54 = arith.constant 54 : index
    %c0_302 = arith.constant 0 : index
    %244 = vector.load %arg15[%c0_301, %c54, %c0_302] : memref<2x64x32xf32, #tpu.memory_space<vmem>>, vector<2x1x32xf32>
    %245 = vector.shape_cast %244 : vector<2x1x32xf32> to vector<2x32xf32>
    %c0_303 = arith.constant 0 : index
    %c1728 = arith.constant 1728 : index
    %246 = vector.load %arg16[%c0_303, %c1728] : memref<2x2048xf32, #tpu.memory_space<vmem>>, vector<2x32xf32>
    tpu.vector_store %arg16[%c0_303, %c1728], %245 {strides = array<i32>} : memref<2x2048xf32, #tpu.memory_space<vmem>>, vector<2x32xf32>,
    %c0_304 = arith.constant 0 : index
    %c55 = arith.constant 55 : index
    %c0_305 = arith.constant 0 : index
    %247 = vector.load %arg15[%c0_304, %c55, %c0_305] : memref<2x64x32xf32, #tpu.memory_space<vmem>>, vector<2x1x32xf32>
    %248 = vector.shape_cast %247 : vector<2x1x32xf32> to vector<2x32xf32>
    %c0_306 = arith.constant 0 : index
    %c1760 = arith.constant 1760 : index
    %249 = vector.load %arg16[%c0_306, %c1760] : memref<2x2048xf32, #tpu.memory_space<vmem>>, vector<2x32xf32>
    tpu.vector_store %arg16[%c0_306, %c1760], %248 {strides = array<i32>} : memref<2x2048xf32, #tpu.memory_space<vmem>>, vector<2x32xf32>,
    %c0_307 = arith.constant 0 : index
    %c56 = arith.constant 56 : index
    %c0_308 = arith.constant 0 : index
    %250 = vector.load %arg15[%c0_307, %c56, %c0_308] : memref<2x64x32xf32, #tpu.memory_space<vmem>>, vector<2x1x32xf32>
    %251 = vector.shape_cast %250 : vector<2x1x32xf32> to vector<2x32xf32>
    %c0_309 = arith.constant 0 : index
    %c1792 = arith.constant 1792 : index
    %252 = vector.load %arg16[%c0_309, %c1792] : memref<2x2048xf32, #tpu.memory_space<vmem>>, vector<2x32xf32>
    tpu.vector_store %arg16[%c0_309, %c1792], %251 {strides = array<i32>} : memref<2x2048xf32, #tpu.memory_space<vmem>>, vector<2x32xf32>,
    %c0_310 = arith.constant 0 : index
    %c57 = arith.constant 57 : index
    %c0_311 = arith.constant 0 : index
    %253 = vector.load %arg15[%c0_310, %c57, %c0_311] : memref<2x64x32xf32, #tpu.memory_space<vmem>>, vector<2x1x32xf32>
    %254 = vector.shape_cast %253 : vector<2x1x32xf32> to vector<2x32xf32>
    %c0_312 = arith.constant 0 : index
    %c1824 = arith.constant 1824 : index
    %255 = vector.load %arg16[%c0_312, %c1824] : memref<2x2048xf32, #tpu.memory_space<vmem>>, vector<2x32xf32>
    tpu.vector_store %arg16[%c0_312, %c1824], %254 {strides = array<i32>} : memref<2x2048xf32, #tpu.memory_space<vmem>>, vector<2x32xf32>,
    %c0_313 = arith.constant 0 : index
    %c58 = arith.constant 58 : index
    %c0_314 = arith.constant 0 : index
    %256 = vector.load %arg15[%c0_313, %c58, %c0_314] : memref<2x64x32xf32, #tpu.memory_space<vmem>>, vector<2x1x32xf32>
    %257 = vector.shape_cast %256 : vector<2x1x32xf32> to vector<2x32xf32>
    %c0_315 = arith.constant 0 : index
    %c1856 = arith.constant 1856 : index
    %258 = vector.load %arg16[%c0_315, %c1856] : memref<2x2048xf32, #tpu.memory_space<vmem>>, vector<2x32xf32>
    tpu.vector_store %arg16[%c0_315, %c1856], %257 {strides = array<i32>} : memref<2x2048xf32, #tpu.memory_space<vmem>>, vector<2x32xf32>,
    %c0_316 = arith.constant 0 : index
    %c59 = arith.constant 59 : index
    %c0_317 = arith.constant 0 : index
    %259 = vector.load %arg15[%c0_316, %c59, %c0_317] : memref<2x64x32xf32, #tpu.memory_space<vmem>>, vector<2x1x32xf32>
    %260 = vector.shape_cast %259 : vector<2x1x32xf32> to vector<2x32xf32>
    %c0_318 = arith.constant 0 : index
    %c1888 = arith.constant 1888 : index
    %261 = vector.load %arg16[%c0_318, %c1888] : memref<2x2048xf32, #tpu.memory_space<vmem>>, vector<2x32xf32>
    tpu.vector_store %arg16[%c0_318, %c1888], %260 {strides = array<i32>} : memref<2x2048xf32, #tpu.memory_space<vmem>>, vector<2x32xf32>,
    %c0_319 = arith.constant 0 : index
    %c60 = arith.constant 60 : index
    %c0_320 = arith.constant 0 : index
    %262 = vector.load %arg15[%c0_319, %c60, %c0_320] : memref<2x64x32xf32, #tpu.memory_space<vmem>>, vector<2x1x32xf32>
    %263 = vector.shape_cast %262 : vector<2x1x32xf32> to vector<2x32xf32>
    %c0_321 = arith.constant 0 : index
    %c1920 = arith.constant 1920 : index
    %264 = vector.load %arg16[%c0_321, %c1920] : memref<2x2048xf32, #tpu.memory_space<vmem>>, vector<2x32xf32>
    tpu.vector_store %arg16[%c0_321, %c1920], %263 {strides = array<i32>} : memref<2x2048xf32, #tpu.memory_space<vmem>>, vector<2x32xf32>,
    %c0_322 = arith.constant 0 : index
    %c61 = arith.constant 61 : index
    %c0_323 = arith.constant 0 : index
    %265 = vector.load %arg15[%c0_322, %c61, %c0_323] : memref<2x64x32xf32, #tpu.memory_space<vmem>>, vector<2x1x32xf32>
    %266 = vector.shape_cast %265 : vector<2x1x32xf32> to vector<2x32xf32>
    %c0_324 = arith.constant 0 : index
    %c1952 = arith.constant 1952 : index
    %267 = vector.load %arg16[%c0_324, %c1952] : memref<2x2048xf32, #tpu.memory_space<vmem>>, vector<2x32xf32>
    tpu.vector_store %arg16[%c0_324, %c1952], %266 {strides = array<i32>} : memref<2x2048xf32, #tpu.memory_space<vmem>>, vector<2x32xf32>,
    %c0_325 = arith.constant 0 : index
    %c62 = arith.constant 62 : index
    %c0_326 = arith.constant 0 : index
    %268 = vector.load %arg15[%c0_325, %c62, %c0_326] : memref<2x64x32xf32, #tpu.memory_space<vmem>>, vector<2x1x32xf32>
    %269 = vector.shape_cast %268 : vector<2x1x32xf32> to vector<2x32xf32>
    %c0_327 = arith.constant 0 : index
    %c1984 = arith.constant 1984 : index
    %270 = vector.load %arg16[%c0_327, %c1984] : memref<2x2048xf32, #tpu.memory_space<vmem>>, vector<2x32xf32>
    tpu.vector_store %arg16[%c0_327, %c1984], %269 {strides = array<i32>} : memref<2x2048xf32, #tpu.memory_space<vmem>>, vector<2x32xf32>,
    %c0_328 = arith.constant 0 : index
    %c63 = arith.constant 63 : index
    %c0_329 = arith.constant 0 : index
    %271 = vector.load %arg15[%c0_328, %c63, %c0_329] : memref<2x64x32xf32, #tpu.memory_space<vmem>>, vector<2x1x32xf32>
    %272 = vector.shape_cast %271 : vector<2x1x32xf32> to vector<2x32xf32>
    %c0_330 = arith.constant 0 : index
    %c2016 = arith.constant 2016 : index
    %273 = vector.load %arg16[%c0_330, %c2016] : memref<2x2048xf32, #tpu.memory_space<vmem>>, vector<2x32xf32>
    tpu.vector_store %arg16[%c0_330, %c2016], %272 {strides = array<i32>} : memref<2x2048xf32, #tpu.memory_space<vmem>>, vector<2x32xf32>,
    %c0_331 = arith.constant 0 : index
    %c0_332 = arith.constant 0 : index
    %274 = vector.load %arg16[%c0_331, %c0_332] : memref<2x2048xf32, #tpu.memory_space<vmem>>, vector<2x2048xf32>
    %275 = arith.truncf %274 : vector<2x2048xf32> to vector<2x2048xbf16>
    %c0_333 = arith.constant 0 : index
    %c0_334 = arith.constant 0 : index
    %276 = vector.load %arg7[%c0_333, %c0_334] : memref<2048x128xbf16, #tpu.memory_space<vmem>>, vector<2048x128xbf16>
    %cst_335 = arith.constant dense<0.000000e+00> : vector<2x128xf32>
    %277 = tpu.matmul %275, %276, %cst_335 {dimension_numbers = #tpu.dot_dimension_numbers<[1], [0], [0], [1], [0, 0, 1, 1], [], []>} : vector<2x2048xbf16>, vector<2048x128xbf16>, vector<2x128xf32> -> vector<2x128xf32>
    %c0_336 = arith.constant 0 : index
    %c0_337 = arith.constant 0 : index
    %278 = vector.load %arg8[%c0_336, %c0_337] : memref<1x128xf32, #tpu.memory_space<vmem>>, vector<1x128xf32>
    %279 = vector.broadcast %278 : vector<1x128xf32> to vector<2x128xf32>
    %280 = arith.addf %277, %279 : vector<2x128xf32>
    %cst_338 = arith.constant 0.000000e+00 : f32
    %281 = vector.broadcast %cst_338 : f32 to vector<2x128xf32>
    %282 = arith.maximumf %280, %281 : vector<2x128xf32>
    %c0_339 = arith.constant 0 : index
    %c0_340 = arith.constant 0 : index
    %283 = vector.load %arg9[%c0_339, %c0_340] : memref<128x4xf32, #tpu.memory_space<vmem>>, vector<128x4xf32>
    %cst_341 = arith.constant dense<0.000000e+00> : vector<2x4xf32>
    %284 = tpu.matmul %282, %283, %cst_341 {dimension_numbers = #tpu.dot_dimension_numbers<[1], [0], [0], [1], [0, 0, 1, 1], [], []>} : vector<2x128xf32>, vector<128x4xf32>, vector<2x4xf32> -> vector<2x4xf32>
    %c0_342 = arith.constant 0 : index
    %c0_343 = arith.constant 0 : index
    %285 = vector.load %arg10[%c0_342, %c0_343] : memref<1x4xf32, #tpu.memory_space<vmem>>, vector<1x4xf32>
    %286 = vector.broadcast %285 : vector<1x4xf32> to vector<2x4xf32>
    %287 = arith.addf %284, %286 : vector<2x4xf32>
    %c0_344 = arith.constant 0 : index
    %c0_345 = arith.constant 0 : index
    %288 = vector.load %arg11[%c0_344, %c0_345] : memref<2x4xf32, #tpu.memory_space<vmem>>, vector<2x4xf32>
    tpu.vector_store %arg11[%c0_344, %c0_345], %287 {strides = array<i32>} : memref<2x4xf32, #tpu.memory_space<vmem>>, vector<2x4xf32>,
    return
  }
}

</mosaic_0001>

<bundles_post_ra>
// kernel: dqn_forward.1
= control target key start
LH: loop header
LB: loop body
LE: loop exit
PB: predicated region body
PF: predicated region fallthrough
CT: control target
= control target key end

     0   :  { %16 = vsyncpa [#allocation8], 0  ;;  %s8771_s0 = inlined_call_operand.vmem [shape: f32[2,10,10,5], index: 0, kind: input, shape index: {}]   ;;  %s8772_s1 = inlined_call_operand.vmem [shape: f32[45,16], index: 1, kind: input, shape index: {}]   ;;  %s8773_s2 = inlined_call_operand.vmem [shape: f32[1,16], index: 2, kind: input, shape index: {}]   ;;  %s8774_s3 = inlined_call_operand.vmem [shape: f32[1,16], index: 3, kind: input, shape index: {}]   ;;  %s8775_s4 = inlined_call_operand.vmem [shape: f32[144,32], index: 4, kind: input, shape index: {}]   ;;  %s8776_s5 = inlined_call_operand.vmem [shape: f32[1,32], index: 5, kind: input, shape index: {}]   ;;  %s8777_s6 = inlined_call_operand.hbm [shape: f32[1,32], index: 6, kind: input, shape index: {}]   ;;  %s8778_s7 = inlined_call_operand.vmem [shape: bf16[2048,128], index: 7, kind: input, shape index: {}]   ;;  %s8779_s8 = inlined_call_operand.hbm [shape: f32[1,128], index: 8, kind: input, shape index: {}]   ;;  %s8780_s9 = inlined_call_operand.vmem [shape: f32[128,4], index: 9, kind: input, shape index: {}]   ;;  %s8781_s10 = inlined_call_operand.hbm [shape: f32[1,4], index: 10, kind: input, shape index: {}]   ;;  %s8782_s11 = inlined_call_operand.hbm [shape: f32[2,4], index: 11, kind: output, shape index: {}]  }
   0x1   :  { %17 = vsyncpa [#allocation11], 0 }
   0x2   :  { %18 = vsyncpa [#allocation9], 0  ;;  %s6692_s17 = smov [#allocation10]   ;;  %s6693_s19 = smov [#allocation7]  }
   0x3   :  { %s49_s18 = sshll.u32 %s6692_s17, 4  ;;  %s37_s20 = sshll.u32 %s6693_s19, 4  ;;  %s50_s18 = int_to_ptr.vmem [resolvable:$true] %s49_s18  ;;  %s38_s20 = int_to_ptr.vmem [resolvable:$true] %s37_s20 }
   0x4   :  { %s6598_s23 = scalar_lea.hbm %s8779_s8, 16 }
   0x5   :  { %p6599_p0 = scmp.ne.s32.totalorder %s8779_s8, %s6598_s23  ;;  %p6602_p1 = scmp.lt.u32.totalorder %s6598_s23, %s8779_s8 }
   0x7   :  { %p6604_p2 = pnand %p6602_p1, %p6599_p0 }
   0x9   :  { %6607 = shalt.err (!%p6604_p2)
}
   0xa   :  { %s6608_s28 = scalar_lea.vmem %s50_s18, 16  ;;  %s6612_s29 = scalar_lea.vmem %s50_s18, 32 }
   0xb   :  { %p6609_p3 = scmp.ne.s32.totalorder %s50_s18, %s6608_s28  ;;  %p6613_p4 = scmp.lt.s32.totalorder %s50_s18, %s50_s18 }
   0xc   :  { %p6614_p5 = scmp.lt.s32.totalorder %s6612_s29, %s6608_s28 }
   0xe   :  { %p6615_p6 = por %p6614_p5, %p6613_p4 }
  0x10   :  { %p6616_p7 = pnand %p6615_p6, %p6609_p3 }
  0x12   :  { %6619 = shalt.err (!%p6616_p7)
}
  0x13   :  { %52 = dma.hbm_to_vmem [thread:$0]  %s8779_s8, 16, %s50_s18, [#allocation11]  }
  0x14   :  { %s6620_s15 = scalar_lea.hbm %s8777_s6, 16 }
  0x15   :  { %p6621_p8 = scmp.ne.s32.totalorder %s8777_s6, %s6620_s15  ;;  %p6624_p9 = scmp.lt.u32.totalorder %s6620_s15, %s8777_s6 }
  0x17   :  { %p6626_p10 = pnand %p6624_p9, %p6621_p8 }
  0x19   :  { %6629 = shalt.err (!%p6626_p10)
}
  0x1a   :  { %s6630_s22 = scalar_lea.vmem %s38_s20, 16  ;;  %s6634_s23 = scalar_lea.vmem %s38_s20, 32 }
  0x1b   :  { %p6631_p11 = scmp.ne.s32.totalorder %s38_s20, %s6630_s22  ;;  %p6635_p12 = scmp.lt.s32.totalorder %s38_s20, %s38_s20 }
  0x1c   :  { %p6636_p13 = scmp.lt.s32.totalorder %s6634_s23, %s6630_s22 }
  0x1e   :  { %p6637_p0 = por %p6636_p13, %p6635_p12 }
  0x20   :  { %p6638_p1 = pnand %p6637_p0, %p6631_p11 }
  0x22   :  { %6641 = shalt.err (!%p6638_p1)
}
  0x23   :  { %40 = dma.hbm_to_vmem [thread:$0]  %s8777_s6, 16, %s38_s20, [#allocation8]  }
  0x24   :  { %s6694_s24 = smov [#allocation12]   ;;  %s6642_s28 = scalar_lea.hbm %s8781_s10, 16 }
  0x25   :  { %s61_s25 = sshll.u32 %s6694_s24, 4  ;;  %p6643_p2 = scmp.ne.s32.totalorder %s8781_s10, %s6642_s28  ;;  %s62_s25 = int_to_ptr.vmem [resolvable:$true] %s61_s25 }
  0x26   :  { %p6646_p3 = scmp.lt.u32.totalorder %s6642_s28, %s8781_s10 }
  0x28   :  { %p6648_p4 = pnand %p6646_p3, %p6643_p2 }
  0x2a   :  { %6651 = shalt.err (!%p6648_p4)
}
  0x2b   :  { %s6652_s14 = scalar_lea.vmem %s62_s25, 16  ;;  %s6656_s6 = scalar_lea.vmem %s62_s25, 32 }
  0x2c   :  { %p6653_p5 = scmp.ne.s32.totalorder %s62_s25, %s6652_s14  ;;  %p6657_p6 = scmp.lt.s32.totalorder %s62_s25, %s62_s25 }
  0x2d   :  { %p6658_p7 = scmp.lt.s32.totalorder %s6656_s6, %s6652_s14 }
  0x2f   :  { %p6659_p8 = por %p6658_p7, %p6657_p6 }
  0x31   :  { %p6660_p9 = pnand %p6659_p8, %p6653_p5 }
  0x33   :  { %6663 = shalt.err (!%p6660_p9)
}
  0x34   :  { %64 = dma.hbm_to_vmem [thread:$0]  %s8781_s10, 16, %s62_s25, [#allocation11]  }
  0x35   :  { %6686 = dma.done.wait [#allocation8], 16  }
  0x36   :  { %6687 = vsyncadd [#allocation8], 4294967280 }
  0x37   :  { %6688 = dma.done.wait [#allocation11], 32  }
  0x38   :  { %6689 = vsyncadd [#allocation11], 4294967264  ;;  %v108_v0 = vld [vmem:[%s8771_s0 + $0x1] sm:$0xff]  ;;  %s6695_s22 = smov 5   ;;  %s6696_s23 = smov 10   ;;  %v5698_v2 = vld [vmem:[%s8771_s0 + $0x10] sm:$0xff] }
  0x39   :  { %v205_v1 = vld [vmem:[%s8771_s0 + $0x2] sm:$0xff]  ;;  %140 = vrot.lane.b32.xlu0 %v108_v0, %s6695_s22  ;;  %vm91_vm0 = vcmask 39936   ;;  %v109_v3 = vld [vmem:[%s8771_s0 + $0x11] sm:$0xff]  ;;  %s6697_s19 = smov 15   ;;  %s6698_s28 = smov 20   ;;  %vm957_vm1 = vcmask 1044480  }
  0x3a   :  { %237 = vrot.lane.b32.xlu1 %v205_v1, %s6696_s23  ;;  %v206_v4 = vld [vmem:[%s8771_s0 + $0x12] sm:$0xff]  ;;  %v5699_v5 = vld [vmem:[%s8771_s0 + $0x20] sm:$0xff]  ;;  %93 = vst.msk [vmem:[#allocation2 + $0x8] sm:$0xff] %vm91_vm0, %v5698_v2  ;;  %s6699_s12 = smov 25   ;;  %v903_v17 = vld [vmem:[%s8772_s1 + $0x8] sm:$0xff]  ;;  %s6700_s15 = smov 30  }
  0x3b   :  { %v6836_v6 = vld [vmem:[%s8771_s0 + $0x30] sm:$0xff]  ;;  %94 = vst.msk [vmem:[#allocation2 + $0x10] sm:$0xff] %vm91_vm0, %v5699_v5  ;;  %v6842_v7 = vld [vmem:[%s8771_s0 + $0x40] sm:$0xff]  ;;  %v905_v21 = vld [vmem:[%s8772_s1 + $0x18] sm:$0xff]  ;;  %s6701_s26 = smov 35   ;;  %vm6702_vm2 = vmmov 1  }
  0x3c   :  { %95 = vst.msk [vmem:[#allocation2 + $0x18] sm:$0xff] %vm91_vm0, %v6836_v6  ;;  %v6851_v8 = vld [vmem:[%s8771_s0 + $0x50] sm:$0xff]  ;;  %96 = vst.msk [vmem:[#allocation2 + $0x20] sm:$0xff] %vm91_vm0, %v6842_v7  ;;  %v6858_v9 = vld [vmem:[%s8771_s0 + $0x60] sm:$0xff]  ;;  %s6703_s14 = smov 40   ;;  %vm188_vm4 = vcmask 80936  }
  0x3d   :  { %142 = vrot.lane.b32.xlu0 %v109_v3, %s6695_s22  ;;  %97 = vst.msk [vmem:[#allocation2 + $0x28] sm:$0xff] %vm91_vm0, %v6851_v8  ;;  %v6865_v10 = vld [vmem:[%s8771_s0 + $0x70] sm:$0xff]  ;;  %98 = vst.msk [vmem:[#allocation2 + $0x30] sm:$0xff] %vm91_vm0, %v6858_v9  ;;  %v75_v11 = vld [vmem:[%s8771_s0] sm:$0xff]  ;;  %vm285_vm5 = vcmask 121936   ;;  %vm383_vm6 = vcmask 162936  }
  0x3e   :  { %239 = vrot.lane.b32.xlu1 %v206_v4, %s6696_s23  ;;  %99 = vst.msk [vmem:[#allocation2 + $0x38] sm:$0xff] %vm91_vm0, %v6865_v10  ;;  %v5715_v12 = vld [vmem:[%s8771_s0 + $0x21] sm:$0xff]  ;;  %92 = vst.msk [vmem:[#allocation2] sm:$0xff] %vm91_vm0, %v75_v11  ;;  %v6883_v13 = vld [vmem:[%s8771_s0 + $0xb0] sm:$0xff]  ;;  %vm480_vm7 = vcmask 203936   ;;  %vm577_vm8 = vcmask 244936  }
  0x3f   :  { %v6888_v14 = vld [vmem:[%s8771_s0 + $0xc0] sm:$0xff]  ;;  %101 = vst.msk [vmem:[#allocation2 + $0x48] sm:$0xff] %vm91_vm0, %v6883_v13  ;;  %v6913_v19 = vld [vmem:[%s8771_s0 + $0xd0] sm:$0xff]  ;;  %v907_v25 = vld [vmem:[%s8772_s1 + $0x28] sm:$0x1f]  ;;  %vm675_vm9 = vcmask 285936  }
  0x40   :  { %v5731_v15 = vld [vmem:[%s8771_s0 + $0x22] sm:$0xff]  ;;  %102 = vst.msk [vmem:[#allocation2 + $0x50] sm:$0xff] %vm91_vm0, %v6888_v14  ;;  %v904_v20 = vld [vmem:[%s8772_s1 + $0x10] sm:$0xff]  ;;  %103 = vst.msk [vmem:[#allocation2 + $0x58] sm:$0xff] %vm91_vm0, %v6913_v19  ;;  %vm772_vm10 = vcmask 326936   ;;  %vm869_vm11 = vcmask 367936  }
  0x41   :  { %335 = vrot.lane.b32.xlu0 %v5698_v2, %s6697_s19  ;;  %v902_v16 = vld [vmem:[%s8772_s1] sm:$0xff]  ;;  %v6379_v22 = vpack.c.bf16 %v905_v21, %v904_v20  ;;  %v5763_v23 = vld [vmem:[%s8771_s0 + $0x31] sm:$0xff]  ;;  %vm6384_vm3 = vmpackc.low %vm957_vm1, %vm6702_vm2  ;;  %vm908_vm12 = vcmask 367616   ;;  %vm1168_vm13 = vcmask 130048   ;;  %vm1170_vm14 = vcmask 123904   ;;  %s6708_s16 = smov 112  }
  0x42   :  { %337 = vrot.lane.b32.xlu1 %v5699_v5, %s6697_s19  ;;  %v6375_v18 = vpack.c.bf16 %v903_v17, %v902_v16  ;;  %v906_v24 = vld [vmem:[%s8772_s1 + $0x20] sm:$0xff]  ;;  %v5779_v27 = vld [vmem:[%s8771_s0 + $0x32] sm:$0xff]  ;;  %vm1436_vm15 = vcmask 392448   ;;  %s6710_s8 = smov 48   ;;  %s6711_s27 = smov 64   ;;  %vm1533_vm1 = vcmask 523648  }
  0x43   :  { %v6383_v26 = vpack.c.bf16 %v907_v25, %v906_v24  ;;  %v5717_v28 = vld [vmem:[%s8771_s0 + $0x41] sm:$0xff]  ;;  %v5765_v31 = vld [vmem:[%s8771_s0 + $0x51] sm:$0xff]  ;;  %vm1630_vm2 = vcmask 654848  }
  0x44   :  { %6376 = vmatprep.subr.bf16.mxu0 %v6375_v18  ;;  %v6953_v29 = vld [vmem:[%s8771_s0 + $0xe0] sm:$0xff]  ;;  %v6974_v32 = vld [vmem:[%s8771_s0 + $0xf0] sm:$0xff] }
  0x45   :  { %432 = vrot.lane.b32.xlu0 %v109_v3, %s6698_s28  ;;  %6378 = vmatpush3.bf16.msra.mxu0 %v6375_v18  ;;  %104 = vst.msk [vmem:[#allocation2 + $0x60] sm:$0xff] %vm91_vm0, %v6953_v29  ;;  %v5733_v30 = vld [vmem:[%s8771_s0 + $0x42] sm:$0xff]  ;;  %105 = vst.msk [vmem:[#allocation2 + $0x68] sm:$0xff] %vm91_vm0, %v6974_v32  ;;  %v5781_v33 = vld [vmem:[%s8771_s0 + $0x52] sm:$0xff] }
  0x46   :  { %434 = vrot.lane.b32.xlu1 %v5715_v12, %s6698_s28  ;;  %6380 = vmatprep.subr.bf16.mxu0 %v6379_v22  ;;  %v5719_v34 = vld [vmem:[%s8771_s0 + $0x61] sm:$0xff]  ;;  %v5767_v37 = vld [vmem:[%s8771_s0 + $0x71] sm:$0xff] }
  0x47   :  { %v6999_v35 = vld [vmem:[%s8771_s0 + $0x100] sm:$0xff]  ;;  %v7020_v38 = vld [vmem:[%s8771_s0 + $0x110] sm:$0xff] }
  0x48   :  { %106 = vst.msk [vmem:[#allocation2 + $0x70] sm:$0xff] %vm91_vm0, %v6999_v35  ;;  %v5735_v36 = vld [vmem:[%s8771_s0 + $0x62] sm:$0xff]  ;;  %107 = vst.msk [vmem:[#allocation2 + $0x78] sm:$0xff] %vm91_vm0, %v7020_v38  ;;  %v5783_v39 = vld [vmem:[%s8771_s0 + $0x72] sm:$0xff] }
  0x49   :  { %529 = vrot.lane.b32.xlu0 %v206_v4, %s6699_s12  ;;  %6382 = vmatpush3.bf16.msra.mxu0 %v6379_v22  ;;  %v5705_v40 = vld [vmem:[%s8771_s0 + $0x80] sm:$0xff]  ;;  %v5753_v43 = vld [vmem:[%s8771_s0 + $0x90] sm:$0xff] }
  0x4a   :  { %531 = vrot.lane.b32.xlu1 %v5731_v15, %s6699_s12  ;;  %6385 = vmatprep.subr.msk.bf16.mxu0 %vm6384_vm3, %v6383_v26  ;;  %v5721_v41 = vld [vmem:[%s8771_s0 + $0x81] sm:$0xff]  ;;  %v5769_v47 = vld [vmem:[%s8771_s0 + $0x91] sm:$0xff] }
  0x4b   :  { %v5737_v42 = vld [vmem:[%s8771_s0 + $0x82] sm:$0xff]  ;;  %v5785_v50 = vld [vmem:[%s8771_s0 + $0x92] sm:$0xff] }
  0x4c   :  { %v83_v44 = vld [vmem:[%s8771_s0 + $0xa0] sm:$0xff]  ;;  %v117_v54 = vld [vmem:[%s8771_s0 + $0xb1] sm:$0xff] }
  0x4d   :  { %627 = vrot.lane.b32.xlu0 %v5699_v5, %s6700_s15  ;;  %6388 = vmatpush3.bf16.msk.msra.mxu0 %vm6384_vm3, %v6383_v26  ;;  %100 = vst.msk [vmem:[#allocation2 + $0x40] sm:$0xff] %vm91_vm0, %v83_v44  ;;  %v116_v53 = vld [vmem:[%s8771_s0 + $0xa1] sm:$0xff]  ;;  %v214_v58 = vld [vmem:[%s8771_s0 + $0xb2] sm:$0xff]  ;;  %vm1339_vm0 = vcmask 261248   ;;  %vm1727_vm3 = vcmask 786048  }
  0x4e   :  { %629 = vrot.lane.b32.xlu1 %v6836_v6, %s6700_s15  ;;  %v213_v57 = vld [vmem:[%s8771_s0 + $0xa2] sm:$0xff]  ;;  %v5787_v16 = vld [vmem:[%s8771_s0 + $0xd2] sm:$0xff] }
  0x4f   :  { %v5723_v63 = vld [vmem:[%s8771_s0 + $0xc1] sm:$0xff] }
  0x50   :  { %v5739_v2 = vld [vmem:[%s8771_s0 + $0xc2] sm:$0xff] }
  0x51   :  { %724 = vrot.lane.b32.xlu0 %v5715_v12, %s6701_s26  ;;  %v5725_v22 = vld [vmem:[%s8771_s0 + $0xe1] sm:$0xff] }
  0x52   :  { %144 = vrot.lane.b32.xlu1 %v5715_v12, %s6695_s22 }
  0x55   :  { %726 = vrot.lane.b32.xlu0 %v5763_v23, %s6701_s26 }
  0x56   :  { %821 = vrot.lane.b32.xlu1 %v5731_v15, %s6703_s14 }
  0x59   :  { %146 = vrot.lane.b32.xlu0 %v5763_v23, %s6695_s22 }
  0x5a   :  { %241 = vrot.lane.b32.xlu1 %v5731_v15, %s6696_s23 }
  0x5d   :  { %823 = vrot.lane.b32.xlu0 %v5779_v27, %s6703_s14 }
  0x5e   :  { %243 = vrot.lane.b32.xlu1 %v5779_v27, %s6696_s23 }
  0x61   :  { %339 = vrot.lane.b32.xlu0 %v6836_v6, %s6697_s19 }
  0x62   :  { %341 = vrot.lane.b32.xlu1 %v6842_v7, %s6697_s19 }
  0x65   :  { %436 = vrot.lane.b32.xlu0 %v5763_v23, %s6698_s28 }
  0x66   :  { %438 = vrot.lane.b32.xlu1 %v5717_v28, %s6698_s28 }
  0x69   :  { %533 = vrot.lane.b32.xlu0 %v5779_v27, %s6699_s12 }
  0x6a   :  { %535 = vrot.lane.b32.xlu1 %v5733_v30, %s6699_s12 }
  0x6d   :  { %631 = vrot.lane.b32.xlu0 %v6842_v7, %s6700_s15 }
  0x6e   :  { %633 = vrot.lane.b32.xlu1 %v6851_v8, %s6700_s15 }
  0x71   :  { %728 = vrot.lane.b32.xlu0 %v5717_v28, %s6701_s26 }
  0x72   :  { %730 = vrot.lane.b32.xlu1 %v5765_v31, %s6701_s26 }
  0x75   :  { %825 = vrot.lane.b32.xlu0 %v5733_v30, %s6703_s14 }
  0x76   :  { %148 = vrot.lane.b32.xlu1 %v5717_v28, %s6695_s22 }
  0x79   :  { %827 = vrot.lane.b32.xlu0 %v5781_v33, %s6703_s14 }
  0x7a   :  { %150 = vrot.lane.b32.xlu1 %v5765_v31, %s6695_s22 }
  0x7d   :  { %245 = vrot.lane.b32.xlu0 %v5733_v30, %s6696_s23  ;;  %v5773_v30 = vld [vmem:[%s8771_s0 + $0xf1] sm:$0xff] }
  0x7e   :  { %247 = vrot.lane.b32.xlu1 %v5781_v33, %s6696_s23 }
  0x81   :  { %343 = vrot.lane.b32.xlu0 %v6851_v8, %s6697_s19 }
  0x82   :  { %345 = vrot.lane.b32.xlu1 %v6858_v9, %s6697_s19 }
  0x85   :  { %440 = vrot.lane.b32.xlu0 %v5765_v31, %s6698_s28 }
  0x86   :  { %442 = vrot.lane.b32.xlu1 %v5719_v34, %s6698_s28 }
  0x89   :  { %537 = vrot.lane.b32.xlu0 %v5781_v33, %s6699_s12 }
  0x8a   :  { %539 = vrot.lane.b32.xlu1 %v5735_v36, %s6699_s12 }
  0x8d   :  { %635 = vrot.lane.b32.xlu0 %v6858_v9, %s6700_s15 }
  0x8e   :  { %637 = vrot.lane.b32.xlu1 %v6865_v10, %s6700_s15 }
  0x91   :  { %732 = vrot.lane.b32.xlu0 %v5719_v34, %s6701_s26 }
  0x92   :  { %734 = vrot.lane.b32.xlu1 %v5767_v37, %s6701_s26 }
  0x95   :  { %829 = vrot.lane.b32.xlu0 %v5735_v36, %s6703_s14 }
  0x96   :  { %152 = vrot.lane.b32.xlu1 %v5719_v34, %s6695_s22 }
  0x99   :  { %831 = vrot.lane.b32.xlu0 %v5783_v39, %s6703_s14 }
  0x9a   :  { %154 = vrot.lane.b32.xlu1 %v5767_v37, %s6695_s22 }
  0x9d   :  { %249 = vrot.lane.b32.xlu0 %v5735_v36, %s6696_s23 }
  0x9e   :  { %251 = vrot.lane.b32.xlu1 %v5783_v39, %s6696_s23 }
  0xa1   :  { %347 = vrot.lane.b32.xlu0 %v6865_v10, %s6697_s19  ;;  %v5771_v10 = vld [vmem:[%s8771_s0 + $0xd1] sm:$0xff] }
  0xa2   :  { %349 = vrot.lane.b32.xlu1 %v5705_v40, %s6697_s19 }
  0xa5   :  { %444 = vrot.lane.b32.xlu0 %v5767_v37, %s6698_s28 }
  0xa6   :  { %446 = vrot.lane.b32.xlu1 %v5721_v41, %s6698_s28 }
  0xa9   :  { %541 = vrot.lane.b32.xlu0 %v5783_v39, %s6699_s12 }
  0xaa   :  { %543 = vrot.lane.b32.xlu1 %v5737_v42, %s6699_s12 }
  0xab   :  { %v141_v45 = vpop.permute.xlu0 %140 }
  0xac   :  { %v238_v46 = vpop.permute.xlu1 %237  ;;  %189 = vst.msk [vmem:[#allocation2] sm:$0xff] %vm188_vm4, %v141_v45 }
  0xad   :  { %286 = vst.msk [vmem:[#allocation2] sm:$0xff] %vm285_vm5, %v238_v46  ;;  %639 = vrot.lane.b32.xlu0 %v5705_v40, %s6700_s15  ;;  %v5727_v46 = vld [vmem:[%s8771_s0 + $0x101] sm:$0xff] }
  0xae   :  { %641 = vrot.lane.b32.xlu1 %v5753_v43, %s6700_s15 }
  0xaf   :  { %v143_v48 = vpop.permute.xlu0 %142 }
  0xb0   :  { %v240_v49 = vpop.permute.xlu1 %239  ;;  %190 = vst.msk [vmem:[#allocation2 + $0x8] sm:$0xff] %vm188_vm4, %v143_v48 }
  0xb1   :  { %287 = vst.msk [vmem:[#allocation2 + $0x8] sm:$0xff] %vm285_vm5, %v240_v49  ;;  %736 = vrot.lane.b32.xlu0 %v5721_v41, %s6701_s26 }
  0xb2   :  { %738 = vrot.lane.b32.xlu1 %v5769_v47, %s6701_s26 }
  0xb3   :  { %v336_v51 = vpop.permute.xlu0 %335 }
  0xb4   :  { %v338_v52 = vpop.permute.xlu1 %337  ;;  %384 = vst.msk [vmem:[#allocation2] sm:$0xff] %vm383_vm6, %v336_v51 }
  0xb5   :  { %385 = vst.msk [vmem:[#allocation2 + $0x8] sm:$0xff] %vm383_vm6, %v338_v52  ;;  %833 = vrot.lane.b32.xlu0 %v5737_v42, %s6703_s14 }
  0xb6   :  { %835 = vrot.lane.b32.xlu1 %v5785_v50, %s6703_s14 }
  0xb7   :  { %v433_v55 = vpop.permute.xlu0 %432 }
  0xb8   :  { %v435_v56 = vpop.permute.xlu1 %434  ;;  %481 = vst.msk [vmem:[#allocation2] sm:$0xff] %vm480_vm7, %v433_v55 }
  0xb9   :  { %482 = vst.msk [vmem:[#allocation2 + $0x8] sm:$0xff] %vm480_vm7, %v435_v56  ;;  %156 = vrot.lane.b32.xlu0 %v116_v53, %s6695_s22  ;;  %v5775_v53 = vld [vmem:[%s8771_s0 + $0x111] sm:$0xff] }
  0xba   :  { %158 = vrot.lane.b32.xlu1 %v117_v54, %s6695_s22 }
  0xbb   :  { %v530_v59 = vpop.permute.xlu0 %529 }
  0xbc   :  { %v532_v60 = vpop.permute.xlu1 %531  ;;  %578 = vst.msk [vmem:[#allocation2] sm:$0xff] %vm577_vm8, %v530_v59 }
  0xbd   :  { %579 = vst.msk [vmem:[#allocation2 + $0x8] sm:$0xff] %vm577_vm8, %v532_v60  ;;  %253 = vrot.lane.b32.xlu0 %v213_v57, %s6696_s23 }
  0xbe   :  { %255 = vrot.lane.b32.xlu1 %v214_v58, %s6696_s23 }
  0xbf   :  { %v628_v61 = vpop.permute.xlu0 %627 }
  0xc0   :  { %v630_v62 = vpop.permute.xlu1 %629  ;;  %676 = vst.msk [vmem:[#allocation2] sm:$0xff] %vm675_vm9, %v628_v61 }
  0xc1   :  { %677 = vst.msk [vmem:[#allocation2 + $0x8] sm:$0xff] %vm675_vm9, %v630_v62  ;;  %351 = vrot.lane.b32.xlu0 %v6883_v13, %s6697_s19 }
  0xc2   :  { %353 = vrot.lane.b32.xlu1 %v6888_v14, %s6697_s19 }
  0xc3   :  { %v725_v0 = vpop.permute.xlu0 %724 }
  0xc4   :  { %v145_v1 = vpop.permute.xlu1 %144  ;;  %773 = vst.msk [vmem:[#allocation2] sm:$0xff] %vm772_vm10, %v725_v0  ;;  %v7253_v0 = vld [vmem:[%s8771_s0 + $0x120] sm:$0xff] }
  0xc5   :  { %191 = vst.msk [vmem:[#allocation2 + $0x10] sm:$0xff] %vm188_vm4, %v145_v1  ;;  %448 = vrot.lane.b32.xlu0 %v117_v54, %s6698_s28 }
  0xc6   :  { %450 = vrot.lane.b32.xlu1 %v5723_v63, %s6698_s28 }
  0xc7   :  { %v727_v3 = vpop.permute.xlu0 %726 }
  0xc8   :  { %v822_v4 = vpop.permute.xlu1 %821  ;;  %774 = vst.msk [vmem:[#allocation2 + $0x8] sm:$0xff] %vm772_vm10, %v727_v3  ;;  %v7264_v3 = vld [vmem:[%s8771_s0 + $0x121] sm:$0xff] }
  0xc9   :  { %870 = vst.msk [vmem:[#allocation2] sm:$0xff] %vm869_vm11, %v822_v4  ;;  %545 = vrot.lane.b32.xlu0 %v214_v58, %s6699_s12 }
  0xca   :  { %547 = vrot.lane.b32.xlu1 %v5739_v2, %s6699_s12 }
  0xcb   :  { %v147_v5 = vpop.permute.xlu0 %146 }
  0xcc   :  { %v242_v6 = vpop.permute.xlu1 %241  ;;  %192 = vst.msk [vmem:[#allocation2 + $0x18] sm:$0xff] %vm188_vm4, %v147_v5 }
  0xcd   :  { %288 = vst.msk [vmem:[#allocation2 + $0x10] sm:$0xff] %vm285_vm5, %v242_v6  ;;  %643 = vrot.lane.b32.xlu0 %v6888_v14, %s6700_s15  ;;  %v6704_v6 = vmov 0.0  }
  0xce   :  { %645 = vrot.lane.b32.xlu1 %v6913_v19, %s6700_s15  ;;  %1174 = vst.msk [vmem:[#allocation3 + $0x20] sm:$0xff] %vm1168_vm13, %v6704_v6  ;;  %1169 = vst.msk [vmem:[#allocation3] sm:$0xff] %vm1168_vm13, %v6704_v6 }
  0xcf   :  { %v824_v7 = vpop.permute.xlu0 %823  ;;  %1175 = vst.msk [vmem:[#allocation3 + $0x28] sm:$0x3] %vm1170_vm14, %v6704_v6  ;;  %1171 = vst.msk [vmem:[#allocation3 + $0x8] sm:$0x3] %vm1170_vm14, %v6704_v6 }
  0xd0   :  { %v244_v8 = vpop.permute.xlu1 %243  ;;  %v886_v9 = vld [vmem:[#allocation2] sm:$0xff]  ;;  %871 = vst.msk [vmem:[#allocation2 + $0x8] sm:$0xff] %vm869_vm11, %v824_v7 }
  0xd1   :  { %289 = vst.msk [vmem:[#allocation2 + $0x18] sm:$0xff] %vm285_vm5, %v244_v8  ;;  %6316 = vmatprep.mubr.msk.f32.mxu0 %vm908_vm12, %v886_v9  ;;  %740 = vrot.lane.b32.xlu0 %v5723_v63, %s6701_s26  ;;  %v5761_v9 = vld [vmem:[%s8771_s0 + $0x130] sm:$0xff] }
  0xd2   :  { %160 = vrot.lane.b32.xlu1 %v5723_v63, %s6695_s22  ;;  %1172 = vst.msk [vmem:[#allocation3 + $0x10] sm:$0xff] %vm1168_vm13, %v6704_v6  ;;  %1176 = vst.msk [vmem:[#allocation3 + $0x30] sm:$0xff] %vm1168_vm13, %v6704_v6 }
  0xd3   :  { %v340_v11 = vpop.permute.xlu0 %339  ;;  %1173 = vst.msk [vmem:[#allocation3 + $0x18] sm:$0x3] %vm1170_vm14, %v6704_v6  ;;  %1177 = vst.msk [vmem:[#allocation3 + $0x38] sm:$0x3] %vm1170_vm14, %v6704_v6 }
  0xd4   :  { %v342_v12 = vpop.permute.xlu1 %341  ;;  %386 = vst.msk [vmem:[#allocation2 + $0x10] sm:$0xff] %vm383_vm6, %v340_v11 }
  0xd5   :  { %387 = vst.msk [vmem:[#allocation2 + $0x18] sm:$0xff] %vm383_vm6, %v342_v12  ;;  %742 = vrot.lane.b32.xlu0 %v5771_v10, %s6701_s26 }
  0xd6   :  { %837 = vrot.lane.b32.xlu1 %v5739_v2, %s6703_s14  ;;  %1178 = vst.msk [vmem:[#allocation3 + $0x40] sm:$0xff] %vm1168_vm13, %v6704_v6  ;;  %1180 = vst.msk [vmem:[#allocation3 + $0x50] sm:$0xff] %vm1168_vm13, %v6704_v6 }
  0xd7   :  { %v437_v13 = vpop.permute.xlu0 %436  ;;  %v887_v15 = vld [vmem:[#allocation2 + $0x8] sm:$0xff]  ;;  %1179 = vst.msk [vmem:[#allocation3 + $0x48] sm:$0x3] %vm1170_vm14, %v6704_v6  ;;  %1181 = vst.msk [vmem:[#allocation3 + $0x58] sm:$0x3] %vm1170_vm14, %v6704_v6 }
  0xd8   :  { %v439_v14 = vpop.permute.xlu1 %438  ;;  %483 = vst.msk [vmem:[#allocation2 + $0x10] sm:$0xff] %vm480_vm7, %v437_v13  ;;  %6317 = vmatmul.mubr.msk.f32.vlgmr.msra.gmra.mrb[0].mxu0 %vm908_vm12, %v887_v15 }
  0xd9   :  { %484 = vst.msk [vmem:[#allocation2 + $0x18] sm:$0xff] %vm480_vm7, %v439_v14  ;;  %162 = vrot.lane.b32.xlu0 %v5771_v10, %s6695_s22 }
  0xda   :  { %257 = vrot.lane.b32.xlu1 %v5739_v2, %s6696_s23  ;;  %1182 = vst.msk [vmem:[#allocation3 + $0x60] sm:$0xff] %vm1168_vm13, %v6704_v6  ;;  %1184 = vst.msk [vmem:[#allocation3 + $0x70] sm:$0xff] %vm1168_vm13, %v6704_v6 }
  0xdb   :  { %v534_v17 = vpop.permute.xlu0 %533  ;;  %1183 = vst.msk [vmem:[#allocation3 + $0x68] sm:$0x3] %vm1170_vm14, %v6704_v6  ;;  %1185 = vst.msk [vmem:[#allocation3 + $0x78] sm:$0x3] %vm1170_vm14, %v6704_v6 }
  0xdc   :  { %v536_v18 = vpop.permute.xlu1 %535  ;;  %580 = vst.msk [vmem:[#allocation2 + $0x10] sm:$0xff] %vm577_vm8, %v534_v17 }
  0xdd   :  { %581 = vst.msk [vmem:[#allocation2 + $0x18] sm:$0xff] %vm577_vm8, %v536_v18  ;;  %839 = vrot.lane.b32.xlu0 %v5787_v16, %s6703_s14 }
  0xde   :  { %259 = vrot.lane.b32.xlu1 %v5787_v16, %s6696_s23  ;;  %1186 = vst.msk [vmem:[#allocation3 + $0x80] sm:$0xff] %vm1168_vm13, %v6704_v6  ;;  %1188 = vst.msk [vmem:[#allocation3 + $0x90] sm:$0xff] %vm1168_vm13, %v6704_v6 }
  0xdf   :  { %v632_v20 = vpop.permute.xlu0 %631  ;;  %1187 = vst.msk [vmem:[#allocation3 + $0x88] sm:$0x3] %vm1170_vm14, %v6704_v6  ;;  %1189 = vst.msk [vmem:[#allocation3 + $0x98] sm:$0x3] %vm1170_vm14, %v6704_v6 }
  0xe0   :  { %v634_v21 = vpop.permute.xlu1 %633  ;;  %678 = vst.msk [vmem:[#allocation2 + $0x10] sm:$0xff] %vm675_vm9, %v632_v20  ;;  %v5793_v20 = vld [vmem:[%s8771_s0 + $0x132] sm:$0xff] }
  0xe1   :  { %679 = vst.msk [vmem:[#allocation2 + $0x18] sm:$0xff] %vm675_vm9, %v634_v21  ;;  %355 = vrot.lane.b32.xlu0 %v6913_v19, %s6697_s19  ;;  %v5741_v19 = vld [vmem:[%s8771_s0 + $0xe2] sm:$0xff] }
  0xe2   :  { %357 = vrot.lane.b32.xlu1 %v6953_v29, %s6697_s19  ;;  %1190 = vst.msk [vmem:[#allocation3 + $0xa0] sm:$0xff] %vm1168_vm13, %v6704_v6  ;;  %1192 = vst.msk [vmem:[#allocation3 + $0xb0] sm:$0xff] %vm1168_vm13, %v6704_v6  ;;  %v1259_v21 = vld [vmem:[#allocation3 + $0x1] sm:$0xff] }
  0xe3   :  { %v729_v23 = vpop.permute.xlu0 %728  ;;  %1191 = vst.msk [vmem:[#allocation3 + $0xa8] sm:$0x3] %vm1170_vm14, %v6704_v6  ;;  %1193 = vst.msk [vmem:[#allocation3 + $0xb8] sm:$0x3] %vm1170_vm14, %v6704_v6 }
  0xe4   :  { %v731_v24 = vpop.permute.xlu1 %730  ;;  %775 = vst.msk [vmem:[#allocation2 + $0x10] sm:$0xff] %vm772_vm10, %v729_v23 }
  0xe5   :  { %776 = vst.msk [vmem:[#allocation2 + $0x18] sm:$0xff] %vm772_vm10, %v731_v24  ;;  %452 = vrot.lane.b32.xlu0 %v5771_v10, %s6698_s28  ;;  %v1356_v24 = vld [vmem:[#allocation3 + $0x2] sm:$0xff] }
  0xe6   :  { %454 = vrot.lane.b32.xlu1 %v5725_v22, %s6698_s28  ;;  %1194 = vst.msk [vmem:[#allocation3 + $0xc0] sm:$0xff] %vm1168_vm13, %v6704_v6  ;;  %1196 = vst.msk [vmem:[#allocation3 + $0xd0] sm:$0xff] %vm1168_vm13, %v6704_v6 }
  0xe7   :  { %v826_v25 = vpop.permute.xlu0 %825  ;;  %1195 = vst.msk [vmem:[#allocation3 + $0xc8] sm:$0x3] %vm1170_vm14, %v6704_v6  ;;  %1197 = vst.msk [vmem:[#allocation3 + $0xd8] sm:$0x3] %vm1170_vm14, %v6704_v6 }
  0xe8   :  { %v149_v26 = vpop.permute.xlu1 %148  ;;  %872 = vst.msk [vmem:[#allocation2 + $0x10] sm:$0xff] %vm869_vm11, %v826_v25 }
  0xe9   :  { %193 = vst.msk [vmem:[#allocation2 + $0x20] sm:$0xff] %vm188_vm4, %v149_v26  ;;  %549 = vrot.lane.b32.xlu0 %v5787_v16, %s6699_s12  ;;  %v5777_v16 = vld [vmem:[%s8771_s0 + $0x131] sm:$0xff] }
  0xea   :  { %551 = vrot.lane.b32.xlu1 %v5741_v19, %s6699_s12  ;;  %1198 = vst.msk [vmem:[#allocation3 + $0xe0] sm:$0xff] %vm1168_vm13, %v6704_v6  ;;  %1200 = vst.msk [vmem:[#allocation3 + $0xf0] sm:$0xff] %vm1168_vm13, %v6704_v6 }
  0xeb   :  { %v828_v27 = vpop.permute.xlu0 %827  ;;  %1199 = vst.msk [vmem:[#allocation3 + $0xe8] sm:$0x3] %vm1170_vm14, %v6704_v6  ;;  %1201 = vst.msk [vmem:[#allocation3 + $0xf8] sm:$0x3] %vm1170_vm14, %v6704_v6 }
  0xec   :  { %v151_v28 = vpop.permute.xlu1 %150  ;;  %873 = vst.msk [vmem:[#allocation2 + $0x18] sm:$0xff] %vm869_vm11, %v828_v27  ;;  %v1267_v27 = vld [vmem:[#allocation3 + $0xa1] sm:$0xff] }
  0xed   :  { %194 = vst.msk [vmem:[#allocation2 + $0x28] sm:$0xff] %vm188_vm4, %v151_v28  ;;  %647 = vrot.lane.b32.xlu0 %v6953_v29, %s6700_s15  ;;  %v5789_v29 = vld [vmem:[%s8771_s0 + $0xf2] sm:$0xff] }
  0xee   :  { %649 = vrot.lane.b32.xlu1 %v6974_v32, %s6700_s15  ;;  %1202 = vst.msk [vmem:[#allocation3 + $0x100] sm:$0xff] %vm1168_vm13, %v6704_v6  ;;  %1204 = vst.msk [vmem:[#allocation3 + $0x110] sm:$0xff] %vm1168_vm13, %v6704_v6  ;;  %v1849_v28 = vld [vmem:[#allocation3 + $0x91] sm:$0xff] }
  0xef   :  { %v246_v31 = vpop.permute.xlu0 %245  ;;  %v888_v34 = vld [vmem:[#allocation2 + $0x10] sm:$0xff]  ;;  %1203 = vst.msk [vmem:[#allocation3 + $0x108] sm:$0x3] %vm1170_vm14, %v6704_v6  ;;  %1205 = vst.msk [vmem:[#allocation3 + $0x118] sm:$0x3] %vm1170_vm14, %v6704_v6 }
  0xf0   :  { %v248_v33 = vpop.permute.xlu1 %247  ;;  %290 = vst.msk [vmem:[#allocation2 + $0x20] sm:$0xff] %vm285_vm5, %v246_v31  ;;  %6319 = vmatprep.mubr.msk.f32.mxu0 %vm908_vm12, %v888_v34 }
  0xf1   :  { %291 = vst.msk [vmem:[#allocation2 + $0x28] sm:$0xff] %vm285_vm5, %v248_v33  ;;  %744 = vrot.lane.b32.xlu0 %v5725_v22, %s6701_s26  ;;  %v1364_v33 = vld [vmem:[#allocation3 + $0xa2] sm:$0xff] }
  0xf2   :  { %746 = vrot.lane.b32.xlu1 %v5773_v30, %s6701_s26  ;;  %1206 = vst.msk [vmem:[#allocation3 + $0x120] sm:$0xff] %vm1168_vm13, %v6704_v6  ;;  %1208 = vst.msk [vmem:[#allocation3 + $0x130] sm:$0xff] %vm1168_vm13, %v6704_v6 }
  0xf3   :  { %v344_v36 = vpop.permute.xlu0 %343  ;;  %v889_v39 = vld [vmem:[#allocation2 + $0x18] sm:$0xff]  ;;  %1207 = vst.msk [vmem:[#allocation3 + $0x128] sm:$0x3] %vm1170_vm14, %v6704_v6  ;;  %1209 = vst.msk [vmem:[#allocation3 + $0x138] sm:$0x3] %vm1170_vm14, %v6704_v6  ;;  %vm2415_vm14 = vcmask 1042176  }
  0xf4   :  { %v346_v37 = vpop.permute.xlu1 %345  ;;  %388 = vst.msk [vmem:[#allocation2 + $0x20] sm:$0xff] %vm383_vm6, %v344_v36  ;;  %6320 = vmatmul.mubr.msk.f32.gmra.mrb[2].mxu0 %vm908_vm12, %v889_v39 }
  0xf5   :  { %389 = vst.msk [vmem:[#allocation2 + $0x28] sm:$0xff] %vm383_vm6, %v346_v37  ;;  %841 = vrot.lane.b32.xlu0 %v5741_v19, %s6703_s14 }
  0xf6   :  { %843 = vrot.lane.b32.xlu1 %v5789_v29, %s6703_s14 }
  0xf7   :  { %v441_v40 = vpop.permute.xlu0 %440 }
  0xf8   :  { %v443_v41 = vpop.permute.xlu1 %442  ;;  %485 = vst.msk [vmem:[#allocation2 + $0x20] sm:$0xff] %vm480_vm7, %v441_v40 }
  0xf9   :  { %486 = vst.msk [vmem:[#allocation2 + $0x28] sm:$0xff] %vm480_vm7, %v443_v41  ;;  %164 = vrot.lane.b32.xlu0 %v5725_v22, %s6695_s22 }
  0xfa   :  { %166 = vrot.lane.b32.xlu1 %v5773_v30, %s6695_s22 }
  0xfb   :  { %v538_v42 = vpop.permute.xlu0 %537 }
  0xfc   :  { %v540_v43 = vpop.permute.xlu1 %539  ;;  %582 = vst.msk [vmem:[#allocation2 + $0x20] sm:$0xff] %vm577_vm8, %v538_v42 }
  0xfd   :  { %583 = vst.msk [vmem:[#allocation2 + $0x28] sm:$0xff] %vm577_vm8, %v540_v43  ;;  %261 = vrot.lane.b32.xlu0 %v5741_v19, %s6696_s23  ;;  %v1752_v19 = vld [vmem:[#allocation3 + $0x90] sm:$0xff] }
  0xfe   :  { %263 = vrot.lane.b32.xlu1 %v5789_v29, %s6696_s23 }
  0xff   :  { %v636_v44 = vpop.permute.xlu0 %635 }
 0x100   :  { %v638_v45 = vpop.permute.xlu1 %637  ;;  %680 = vst.msk [vmem:[#allocation2 + $0x20] sm:$0xff] %vm675_vm9, %v636_v44 }
 0x101   :  { %681 = vst.msk [vmem:[#allocation2 + $0x28] sm:$0xff] %vm675_vm9, %v638_v45  ;;  %359 = vrot.lane.b32.xlu0 %v6974_v32, %s6697_s19  ;;  %v5743_v32 = vld [vmem:[%s8771_s0 + $0x102] sm:$0xff] }
 0x102   :  { %361 = vrot.lane.b32.xlu1 %v6999_v35, %s6697_s19 }
 0x103   :  { %v733_v47 = vpop.permute.xlu0 %732 }
 0x104   :  { %v735_v48 = vpop.permute.xlu1 %734  ;;  %777 = vst.msk [vmem:[#allocation2 + $0x20] sm:$0xff] %vm772_vm10, %v733_v47 }
 0x105   :  { %778 = vst.msk [vmem:[#allocation2 + $0x28] sm:$0xff] %vm772_vm10, %v735_v48  ;;  %456 = vrot.lane.b32.xlu0 %v5773_v30, %s6698_s28 }
 0x106   :  { %458 = vrot.lane.b32.xlu1 %v5727_v46, %s6698_s28 }
 0x107   :  { %v830_v49 = vpop.permute.xlu0 %829 }
 0x108   :  { %v153_v50 = vpop.permute.xlu1 %152  ;;  %874 = vst.msk [vmem:[#allocation2 + $0x20] sm:$0xff] %vm869_vm11, %v830_v49 }
 0x109   :  { %195 = vst.msk [vmem:[#allocation2 + $0x30] sm:$0xff] %vm188_vm4, %v153_v50  ;;  %553 = vrot.lane.b32.xlu0 %v5789_v29, %s6699_s12 }
 0x10a   :  { %555 = vrot.lane.b32.xlu1 %v5743_v32, %s6699_s12 }
 0x10b   :  { %v832_v51 = vpop.permute.xlu0 %831 }
 0x10c   :  { %v155_v52 = vpop.permute.xlu1 %154  ;;  %875 = vst.msk [vmem:[#allocation2 + $0x28] sm:$0xff] %vm869_vm11, %v832_v51 }
 0x10d   :  { %196 = vst.msk [vmem:[#allocation2 + $0x38] sm:$0xff] %vm188_vm4, %v155_v52  ;;  %651 = vrot.lane.b32.xlu0 %v6999_v35, %s6700_s15  ;;  %v7233_v35 = vld [vmem:[%s8771_s0 + $0x112] sm:$0xff] }
 0x10e   :  { %653 = vrot.lane.b32.xlu1 %v7020_v38, %s6700_s15 }
 0x10f   :  { %v250_v54 = vpop.permute.xlu0 %249  ;;  %v890_v56 = vld [vmem:[#allocation2 + $0x20] sm:$0xff] }
 0x110   :  { %v252_v55 = vpop.permute.xlu1 %251  ;;  %292 = vst.msk [vmem:[#allocation2 + $0x30] sm:$0xff] %vm285_vm5, %v250_v54  ;;  %6322 = vmatprep.mubr.msk.f32.mxu0 %vm908_vm12, %v890_v56 }
 0x111   :  { %293 = vst.msk [vmem:[#allocation2 + $0x38] sm:$0xff] %vm285_vm5, %v252_v55  ;;  %748 = vrot.lane.b32.xlu0 %v5727_v46, %s6701_s26 }
 0x112   :  { %750 = vrot.lane.b32.xlu1 %v5775_v53, %s6701_s26 }
 0x113   :  { %v348_v57 = vpop.permute.xlu0 %347  ;;  %v891_v59 = vld [vmem:[#allocation2 + $0x28] sm:$0xff] }
 0x114   :  { %v350_v58 = vpop.permute.xlu1 %349  ;;  %390 = vst.msk [vmem:[#allocation2 + $0x30] sm:$0xff] %vm383_vm6, %v348_v57  ;;  %6323 = vmatmul.mubr.msk.f32.gmra.mrb[4].mxu0 %vm908_vm12, %v891_v59 }
 0x115   :  { %391 = vst.msk [vmem:[#allocation2 + $0x38] sm:$0xff] %vm383_vm6, %v350_v58  ;;  %845 = vrot.lane.b32.xlu0 %v5743_v32, %s6703_s14 }
 0x116   :  { %847 = vrot.lane.b32.xlu1 %v7233_v35, %s6703_s14 }
 0x117   :  { %v445_v60 = vpop.permute.xlu0 %444 }
 0x118   :  { %v447_v61 = vpop.permute.xlu1 %446  ;;  %487 = vst.msk [vmem:[#allocation2 + $0x30] sm:$0xff] %vm480_vm7, %v445_v60 }
 0x119   :  { %488 = vst.msk [vmem:[#allocation2 + $0x38] sm:$0xff] %vm480_vm7, %v447_v61  ;;  %168 = vrot.lane.b32.xlu0 %v5727_v46, %s6695_s22 }
 0x11a   :  { %170 = vrot.lane.b32.xlu1 %v5775_v53, %s6695_s22 }
 0x11b   :  { %v542_v62 = vpop.permute.xlu0 %541 }
 0x11c   :  { %v544_v63 = vpop.permute.xlu1 %543  ;;  %584 = vst.msk [vmem:[#allocation2 + $0x30] sm:$0xff] %vm577_vm8, %v542_v62 }
 0x11d   :  { %585 = vst.msk [vmem:[#allocation2 + $0x38] sm:$0xff] %vm577_vm8, %v544_v63  ;;  %265 = vrot.lane.b32.xlu0 %v5743_v32, %s6696_s23 }
 0x11e   :  { %267 = vrot.lane.b32.xlu1 %v7233_v35, %s6696_s23 }
 0x11f   :  { %v640_v1 = vpop.permute.xlu0 %639 }
 0x120   :  { %v642_v2 = vpop.permute.xlu1 %641  ;;  %682 = vst.msk [vmem:[#allocation2 + $0x30] sm:$0xff] %vm675_vm9, %v640_v1 }
 0x121   :  { %683 = vst.msk [vmem:[#allocation2 + $0x38] sm:$0xff] %vm675_vm9, %v642_v2  ;;  %363 = vrot.lane.b32.xlu0 %v7020_v38, %s6697_s19  ;;  %v7274_v38 = vld [vmem:[%s8771_s0 + $0x122] sm:$0xff]  ;;  %s6706_s0 = smov 32  }
 0x122   :  { %365 = vrot.lane.b32.xlu1 %v7253_v0, %s6697_s19 }
 0x123   :  { %v737_v4 = vpop.permute.xlu0 %736 }
 0x124   :  { %v739_v5 = vpop.permute.xlu1 %738  ;;  %779 = vst.msk [vmem:[#allocation2 + $0x30] sm:$0xff] %vm772_vm10, %v737_v4 }
 0x125   :  { %780 = vst.msk [vmem:[#allocation2 + $0x38] sm:$0xff] %vm772_vm10, %v739_v5  ;;  %460 = vrot.lane.b32.xlu0 %v5775_v53, %s6698_s28 }
 0x126   :  { %462 = vrot.lane.b32.xlu1 %v7264_v3, %s6698_s28 }
 0x127   :  { %v834_v7 = vpop.permute.xlu0 %833 }
 0x128   :  { %v836_v8 = vpop.permute.xlu1 %835  ;;  %876 = vst.msk [vmem:[#allocation2 + $0x30] sm:$0xff] %vm869_vm11, %v834_v7 }
 0x129   :  { %877 = vst.msk [vmem:[#allocation2 + $0x38] sm:$0xff] %vm869_vm11, %v836_v8  ;;  %557 = vrot.lane.b32.xlu0 %v7233_v35, %s6699_s12 }
 0x12a   :  { %559 = vrot.lane.b32.xlu1 %v7274_v38, %s6699_s12 }
 0x12b   :  { %v157_v10 = vpop.permute.xlu0 %156 }
 0x12c   :  { %v159_v11 = vpop.permute.xlu1 %158  ;;  %197 = vst.msk [vmem:[#allocation2 + $0x40] sm:$0xff] %vm188_vm4, %v157_v10 }
 0x12d   :  { %198 = vst.msk [vmem:[#allocation2 + $0x48] sm:$0xff] %vm188_vm4, %v159_v11  ;;  %655 = vrot.lane.b32.xlu0 %v7253_v0, %s6700_s15 }
 0x12e   :  { %657 = vrot.lane.b32.xlu1 %v5761_v9, %s6700_s15 }
 0x12f   :  { %v254_v12 = vpop.permute.xlu0 %253  ;;  %v892_v14 = vld [vmem:[#allocation2 + $0x30] sm:$0xff] }
 0x130   :  { %v256_v13 = vpop.permute.xlu1 %255  ;;  %v893_v15 = vld [vmem:[#allocation2 + $0x38] sm:$0xff]  ;;  %294 = vst.msk [vmem:[#allocation2 + $0x40] sm:$0xff] %vm285_vm5, %v254_v12  ;;  %6325 = vmatprep.mubr.msk.f32.mxu0 %vm908_vm12, %v892_v14 }
 0x131   :  { %295 = vst.msk [vmem:[#allocation2 + $0x48] sm:$0xff] %vm285_vm5, %v256_v13  ;;  %752 = vrot.lane.b32.xlu0 %v7264_v3, %s6701_s26  ;;  %6326 = vmatmul.mubr.msk.f32.gmra.mrb[6].mxu0 %vm908_vm12, %v893_v15 }
 0x132   :  { %754 = vrot.lane.b32.xlu1 %v5777_v16, %s6701_s26  ;;  %s6705_s26 = smov 16  }
 0x133   :  { %v352_v17 = vpop.permute.xlu0 %351 }
 0x134   :  { %v354_v18 = vpop.permute.xlu1 %353  ;;  %392 = vst.msk [vmem:[#allocation2 + $0x40] sm:$0xff] %vm383_vm6, %v352_v17 }
 0x135   :  { %393 = vst.msk [vmem:[#allocation2 + $0x48] sm:$0xff] %vm383_vm6, %v354_v18  ;;  %849 = vrot.lane.b32.xlu0 %v7274_v38, %s6703_s14 }
 0x136   :  { %851 = vrot.lane.b32.xlu1 %v5793_v20, %s6703_s14  ;;  %s6707_s14 = smov 96  }
 0x137   :  { %v449_v22 = vpop.permute.xlu0 %448 }
 0x138   :  { %v451_v23 = vpop.permute.xlu1 %450  ;;  %489 = vst.msk [vmem:[#allocation2 + $0x40] sm:$0xff] %vm480_vm7, %v449_v22 }
 0x139   :  { %490 = vst.msk [vmem:[#allocation2 + $0x48] sm:$0xff] %vm480_vm7, %v451_v23  ;;  %1291 = vrot.lane.b32.xlu0 %v1259_v21, %s6705_s26 }
 0x13a   :  { %1388 = vrot.lane.b32.xlu1 %v1356_v24, %s6706_s0  ;;  %v1227_v24 = vld [vmem:[#allocation3] sm:$0xff] }
 0x13b   :  { %v546_v25 = vpop.permute.xlu0 %545  ;;  %1243 = vst.msk [vmem:[#allocation4] sm:$0xff] %vm1168_vm13, %v1227_v24 }
 0x13c   :  { %v548_v26 = vpop.permute.xlu1 %547  ;;  %586 = vst.msk [vmem:[#allocation2 + $0x40] sm:$0xff] %vm577_vm8, %v546_v25  ;;  %v1235_v25 = vld [vmem:[#allocation3 + $0xa0] sm:$0xff] }
 0x13d   :  { %587 = vst.msk [vmem:[#allocation2 + $0x48] sm:$0xff] %vm577_vm8, %v548_v26  ;;  %1791 = vrot.lane.b32.xlu0 %v1752_v19, %s6707_s14 }
 0x13e   :  { %1307 = vrot.lane.b32.xlu1 %v1267_v27, %s6705_s26  ;;  %1251 = vst.msk [vmem:[#allocation4 + $0x80] sm:$0xff] %vm1168_vm13, %v1235_v25  ;;  %v6709_v27 = vmov 0.0|0.0  }
 0x13f   :  { %v644_v30 = vpop.permute.xlu0 %643  ;;  %6389 = vmatprep.subr.bf16.mxu1 %v6709_v27 }
 0x140   :  { %v646_v31 = vpop.permute.xlu1 %645  ;;  %684 = vst.msk [vmem:[#allocation2 + $0x40] sm:$0xff] %vm675_vm9, %v644_v30  ;;  %v2004_v30 = vld [vmem:[%s8775_s4 + $0x8] sm:$0xff] }
 0x141   :  { %685 = vst.msk [vmem:[#allocation2 + $0x48] sm:$0xff] %vm675_vm9, %v646_v31  ;;  %1888 = vrot.lane.b32.xlu0 %v1849_v28, %s6708_s16  ;;  %v2003_v28 = vld [vmem:[%s8775_s4] sm:$0xff] }
 0x142   :  { %1404 = vrot.lane.b32.xlu1 %v1364_v33, %s6706_s0  ;;  %v6390_v33 = vpack.c.bf16 %v2004_v30, %v2003_v28 }
 0x143   :  { %v741_v34 = vpop.permute.xlu0 %740 }
 0x144   :  { %v161_v29 = vpop.permute.xlu1 %160  ;;  %781 = vst.msk [vmem:[#allocation2 + $0x40] sm:$0xff] %vm772_vm10, %v741_v34  ;;  %6391 = vmatpush1.bf16.msra.mxu1 %v6390_v33 }
 0x145   :  { %199 = vst.msk [vmem:[#allocation2 + $0x50] sm:$0xff] %vm188_vm4, %v161_v29  ;;  %v7470_v29 = vld [vmem:[%s8773_s2] ss:$0 sm:$0xff]  ;;  %6392 = vmatprep.subr.bf16.mxu1 %v6709_v27  ;;  %s6712_s2 = smov 80  }
 0x147   :  { %v743_v36 = vpop.permute.xlu0 %742 }
 0x148   :  { %v838_v37 = vpop.permute.xlu1 %837  ;;  %782 = vst.msk [vmem:[#allocation2 + $0x48] sm:$0xff] %vm772_vm10, %v743_v36  ;;  %v2005_v36 = vld [vmem:[%s8775_s4 + $0x10] sm:$0xff] }
 0x149   :  { %878 = vst.msk [vmem:[#allocation2 + $0x40] sm:$0xff] %vm869_vm11, %v838_v37  ;;  %v2006_v37 = vld [vmem:[%s8775_s4 + $0x18] sm:$0xff] }
 0x14b   :  { %v163_v39 = vpop.permute.xlu0 %162 }
 0x14c   :  { %v258_v40 = vpop.permute.xlu1 %257  ;;  %200 = vst.msk [vmem:[#allocation2 + $0x58] sm:$0xff] %vm188_vm4, %v163_v39 }
 0x14d   :  { %296 = vst.msk [vmem:[#allocation2 + $0x50] sm:$0xff] %vm285_vm5, %v258_v40  ;;  %v7482_v40 = vld [vmem:[%s8774_s3] ss:$0 sm:$0xff] }
 0x14f   :  { %v840_v41 = vpop.permute.xlu0 %839 }
 0x150   :  { %v260_v42 = vpop.permute.xlu1 %259  ;;  %v894_v43 = vld [vmem:[#allocation2 + $0x40] sm:$0xff]  ;;  %879 = vst.msk [vmem:[#allocation2 + $0x48] sm:$0xff] %vm869_vm11, %v840_v41 }
 0x151   :  { %297 = vst.msk [vmem:[#allocation2 + $0x58] sm:$0xff] %vm285_vm5, %v260_v42  ;;  %6328 = vmatprep.mubr.msk.f32.mxu0 %vm908_vm12, %v894_v43  ;;  %v6393_v42 = vpack.c.bf16 %v2006_v37, %v2005_v36 }
 0x153   :  { %v356_v44 = vpop.permute.xlu0 %355  ;;  %6394 = vmatpush1.bf16.msra.mxu1 %v6393_v42 }
 0x154   :  { %v358_v45 = vpop.permute.xlu1 %357  ;;  %394 = vst.msk [vmem:[#allocation2 + $0x50] sm:$0xff] %vm383_vm6, %v356_v44  ;;  %6395 = vmatprep.subr.bf16.mxu1 %v6709_v27 }
 0x155   :  { %395 = vst.msk [vmem:[#allocation2 + $0x58] sm:$0xff] %vm383_vm6, %v358_v45 }
 0x157   :  { %v453_v46 = vpop.permute.xlu0 %452  ;;  %v895_v48 = vld [vmem:[#allocation2 + $0x48] sm:$0xff] }
 0x158   :  { %v455_v47 = vpop.permute.xlu1 %454  ;;  %491 = vst.msk [vmem:[#allocation2 + $0x50] sm:$0xff] %vm480_vm7, %v453_v46  ;;  %6329 = vmatmul.mubr.msk.f32.gmra.mrb[8].mxu0 %vm908_vm12, %v895_v48  ;;  %v2007_v48 = vld [vmem:[%s8775_s4 + $0x20] sm:$0xff] }
 0x159   :  { %492 = vst.msk [vmem:[#allocation2 + $0x58] sm:$0xff] %vm480_vm7, %v455_v47 }
 0x15b   :  { %v550_v32 = vpop.permute.xlu0 %549 }
 0x15c   :  { %v552_v49 = vpop.permute.xlu1 %551  ;;  %588 = vst.msk [vmem:[#allocation2 + $0x50] sm:$0xff] %vm577_vm8, %v550_v32  ;;  %v2008_v32 = vld [vmem:[%s8775_s4 + $0x28] sm:$0xff] }
 0x15d   :  { %589 = vst.msk [vmem:[#allocation2 + $0x58] sm:$0xff] %vm577_vm8, %v552_v49 }
 0x15f   :  { %v648_v50 = vpop.permute.xlu0 %647 }
 0x160   :  { %v650_v51 = vpop.permute.xlu1 %649  ;;  %686 = vst.msk [vmem:[#allocation2 + $0x50] sm:$0xff] %vm675_vm9, %v648_v50 }
 0x161   :  { %687 = vst.msk [vmem:[#allocation2 + $0x58] sm:$0xff] %vm675_vm9, %v650_v51  ;;  %v6396_v51 = vpack.c.bf16 %v2008_v32, %v2007_v48 }
 0x163   :  { %v745_v52 = vpop.permute.xlu0 %744  ;;  %6397 = vmatpush1.bf16.msra.mxu1 %v6396_v51 }
 0x164   :  { %v747_v53 = vpop.permute.xlu1 %746  ;;  %783 = vst.msk [vmem:[#allocation2 + $0x50] sm:$0xff] %vm772_vm10, %v745_v52  ;;  %6398 = vmatprep.subr.bf16.mxu1 %v6709_v27 }
 0x165   :  { %784 = vst.msk [vmem:[#allocation2 + $0x58] sm:$0xff] %vm772_vm10, %v747_v53 }
 0x167   :  { %v842_v54 = vpop.permute.xlu0 %841 }
 0x168   :  { %v844_v55 = vpop.permute.xlu1 %843  ;;  %880 = vst.msk [vmem:[#allocation2 + $0x50] sm:$0xff] %vm869_vm11, %v842_v54 }
 0x169   :  { %881 = vst.msk [vmem:[#allocation2 + $0x58] sm:$0xff] %vm869_vm11, %v844_v55 }
 0x16b   :  { %v165_v56 = vpop.permute.xlu0 %164 }
 0x16c   :  { %v167_v35 = vpop.permute.xlu1 %166  ;;  %201 = vst.msk [vmem:[#allocation2 + $0x60] sm:$0xff] %vm188_vm4, %v165_v56  ;;  %v2009_v56 = vld [vmem:[%s8775_s4 + $0x30] sm:$0xff] }
 0x16d   :  { %202 = vst.msk [vmem:[#allocation2 + $0x68] sm:$0xff] %vm188_vm4, %v167_v35  ;;  %v2010_v35 = vld [vmem:[%s8775_s4 + $0x38] sm:$0xff] }
 0x16f   :  { %v262_v57 = vpop.permute.xlu0 %261  ;;  %v896_v59 = vld [vmem:[#allocation2 + $0x50] sm:$0xff] }
 0x170   :  { %v264_v58 = vpop.permute.xlu1 %263  ;;  %v897_v60 = vld [vmem:[#allocation2 + $0x58] sm:$0xff]  ;;  %298 = vst.msk [vmem:[#allocation2 + $0x60] sm:$0xff] %vm285_vm5, %v262_v57  ;;  %6331 = vmatprep.mubr.msk.f32.mxu0 %vm908_vm12, %v896_v59  ;;  %v6399_v57 = vpack.c.bf16 %v2010_v35, %v2009_v56  ;;  %v2011_v59 = vld [vmem:[%s8775_s4 + $0x40] sm:$0xff] }
 0x171   :  { %299 = vst.msk [vmem:[#allocation2 + $0x68] sm:$0xff] %vm285_vm5, %v264_v58  ;;  %6332 = vmatmul.mubr.msk.f32.gmra.mrb[10].mxu0 %vm908_vm12, %v897_v60  ;;  %v2012_v60 = vld [vmem:[%s8775_s4 + $0x48] sm:$0xff] }
 0x172   :  { %6400 = vmatpush1.bf16.msra.mxu1 %v6399_v57 }
 0x173   :  { %v360_v61 = vpop.permute.xlu0 %359  ;;  %6401 = vmatprep.subr.bf16.mxu1 %v6709_v27 }
 0x174   :  { %v362_v62 = vpop.permute.xlu1 %361  ;;  %396 = vst.msk [vmem:[#allocation2 + $0x60] sm:$0xff] %vm383_vm6, %v360_v61  ;;  %v6402_v61 = vpack.c.bf16 %v2012_v60, %v2011_v59 }
 0x175   :  { %397 = vst.msk [vmem:[#allocation2 + $0x68] sm:$0xff] %vm383_vm6, %v362_v62 }
 0x176   :  { %6403 = vmatpush1.bf16.msra.mxu1 %v6402_v61 }
 0x177   :  { %v457_v63 = vpop.permute.xlu0 %456  ;;  %6404 = vmatprep.subr.bf16.mxu1 %v6709_v27 }
 0x178   :  { %v459_v0 = vpop.permute.xlu1 %458  ;;  %493 = vst.msk [vmem:[#allocation2 + $0x60] sm:$0xff] %vm480_vm7, %v457_v63 }
 0x179   :  { %494 = vst.msk [vmem:[#allocation2 + $0x68] sm:$0xff] %vm480_vm7, %v459_v0 }
 0x17b   :  { %v554_v1 = vpop.permute.xlu0 %553 }
 0x17c   :  { %v556_v2 = vpop.permute.xlu1 %555  ;;  %590 = vst.msk [vmem:[#allocation2 + $0x60] sm:$0xff] %vm577_vm8, %v554_v1  ;;  %v2013_v1 = vld [vmem:[%s8775_s4 + $0x50] sm:$0xff] }
 0x17d   :  { %591 = vst.msk [vmem:[#allocation2 + $0x68] sm:$0xff] %vm577_vm8, %v556_v2  ;;  %v2014_v2 = vld [vmem:[%s8775_s4 + $0x58] sm:$0xff] }
 0x17f   :  { %v652_v3 = vpop.permute.xlu0 %651 }
 0x180   :  { %v654_v4 = vpop.permute.xlu1 %653  ;;  %688 = vst.msk [vmem:[#allocation2 + $0x60] sm:$0xff] %vm675_vm9, %v652_v3  ;;  %v6405_v3 = vpack.c.bf16 %v2014_v2, %v2013_v1 }
 0x181   :  { %689 = vst.msk [vmem:[#allocation2 + $0x68] sm:$0xff] %vm675_vm9, %v654_v4 }
 0x182   :  { %6406 = vmatpush1.bf16.msra.mxu1 %v6405_v3 }
 0x183   :  { %v749_v5 = vpop.permute.xlu0 %748  ;;  %6407 = vmatprep.subr.bf16.mxu1 %v6709_v27 }
 0x184   :  { %v751_v38 = vpop.permute.xlu1 %750  ;;  %785 = vst.msk [vmem:[#allocation2 + $0x60] sm:$0xff] %vm772_vm10, %v749_v5  ;;  %v2015_v5 = vld [vmem:[%s8775_s4 + $0x60] sm:$0xff] }
 0x185   :  { %786 = vst.msk [vmem:[#allocation2 + $0x68] sm:$0xff] %vm772_vm10, %v751_v38  ;;  %v2016_v38 = vld [vmem:[%s8775_s4 + $0x68] sm:$0xff] }
 0x187   :  { %v846_v7 = vpop.permute.xlu0 %845 }
 0x188   :  { %v848_v8 = vpop.permute.xlu1 %847  ;;  %882 = vst.msk [vmem:[#allocation2 + $0x60] sm:$0xff] %vm869_vm11, %v846_v7  ;;  %v6408_v7 = vpack.c.bf16 %v2016_v38, %v2015_v5 }
 0x189   :  { %883 = vst.msk [vmem:[#allocation2 + $0x68] sm:$0xff] %vm869_vm11, %v848_v8 }
 0x18a   :  { %6409 = vmatpush1.bf16.msra.mxu1 %v6408_v7 }
 0x18b   :  { %v169_v9 = vpop.permute.xlu0 %168  ;;  %6410 = vmatprep.subr.bf16.mxu1 %v6709_v27 }
 0x18c   :  { %v171_v10 = vpop.permute.xlu1 %170  ;;  %203 = vst.msk [vmem:[#allocation2 + $0x70] sm:$0xff] %vm188_vm4, %v169_v9  ;;  %v2017_v9 = vld [vmem:[%s8775_s4 + $0x70] sm:$0xff] }
 0x18d   :  { %204 = vst.msk [vmem:[#allocation2 + $0x78] sm:$0xff] %vm188_vm4, %v171_v10  ;;  %v2018_v10 = vld [vmem:[%s8775_s4 + $0x78] sm:$0xff]  ;;  %vm1825_vm4 = vcmask 917248  }
 0x18f   :  { %v266_v11 = vpop.permute.xlu0 %265  ;;  %v898_v13 = vld [vmem:[#allocation2 + $0x60] sm:$0xff] }
 0x190   :  { %v268_v12 = vpop.permute.xlu1 %267  ;;  %v899_v14 = vld [vmem:[#allocation2 + $0x68] sm:$0xff]  ;;  %300 = vst.msk [vmem:[#allocation2 + $0x70] sm:$0xff] %vm285_vm5, %v266_v11  ;;  %6334 = vmatprep.mubr.msk.f32.mxu0 %vm908_vm12, %v898_v13  ;;  %v6411_v11 = vpack.c.bf16 %v2018_v10, %v2017_v9 }
 0x191   :  { %301 = vst.msk [vmem:[#allocation2 + $0x78] sm:$0xff] %vm285_vm5, %v268_v12  ;;  %6335 = vmatmul.mubr.msk.f32.gmra.mrb[12].mxu0 %vm908_vm12, %v899_v14  ;;  %v2019_v12 = vld [vmem:[%s8775_s4 + $0x80] sm:$0xff]  ;;  %v2020_v13 = vld [vmem:[%s8775_s4 + $0x88] sm:$0xff]  ;;  %vm1922_vm5 = vcmask 1048448  }
 0x192   :  { %6412 = vmatpush1.bf16.msra.mxu1 %v6411_v11 }
 0x193   :  { %v364_v15 = vpop.permute.xlu0 %363  ;;  %6413 = vmatprep.subr.bf16.mxu1 %v6709_v27 }
 0x194   :  { %v366_v16 = vpop.permute.xlu1 %365  ;;  %398 = vst.msk [vmem:[#allocation2 + $0x70] sm:$0xff] %vm383_vm6, %v364_v15  ;;  %v6414_v15 = vpack.c.bf16 %v2020_v13, %v2019_v12 }
 0x195   :  { %399 = vst.msk [vmem:[#allocation2 + $0x78] sm:$0xff] %vm383_vm6, %v366_v16  ;;  %vm2276_vm6 = vcmask 261120  }
 0x196   :  { %6415 = vmatpush1.bf16.msra.mxu1 %v6414_v15 }
 0x197   :  { %v461_v17 = vpop.permute.xlu0 %460 }
 0x198   :  { %v463_v18 = vpop.permute.xlu1 %462  ;;  %495 = vst.msk [vmem:[#allocation2 + $0x70] sm:$0xff] %vm480_vm7, %v461_v17 }
 0x199   :  { %496 = vst.msk [vmem:[#allocation2 + $0x78] sm:$0xff] %vm480_vm7, %v463_v18  ;;  %vm2316_vm7 = vcmask 1041409  }
 0x19b   :  { %v558_v20 = vpop.permute.xlu0 %557 }
 0x19c   :  { %v560_v21 = vpop.permute.xlu1 %559  ;;  %592 = vst.msk [vmem:[#allocation2 + $0x70] sm:$0xff] %vm577_vm8, %v558_v20 }
 0x19d   :  { %593 = vst.msk [vmem:[#allocation2 + $0x78] sm:$0xff] %vm577_vm8, %v560_v21  ;;  %vm2318_vm8 = vcmask 1043459  }
 0x19f   :  { %v656_v22 = vpop.permute.xlu0 %655 }
 0x1a0   :  { %v658_v23 = vpop.permute.xlu1 %657  ;;  %690 = vst.msk [vmem:[#allocation2 + $0x70] sm:$0xff] %vm675_vm9, %v656_v22 }
 0x1a1   :  { %691 = vst.msk [vmem:[#allocation2 + $0x78] sm:$0xff] %vm675_vm9, %v658_v23  ;;  %vm2320_vm9 = vcmask 1045509  }
 0x1a3   :  { %v753_v19 = vpop.permute.xlu0 %752 }
 0x1a4   :  { %787 = vst.msk [vmem:[#allocation2 + $0x70] sm:$0xff] %vm772_vm10, %v753_v19  ;;  %v755_v26 = vpop.permute.xlu1 %754 }
 0x1a5   :  { %788 = vst.msk [vmem:[#allocation2 + $0x78] sm:$0xff] %vm772_vm10, %v755_v26  ;;  %vm2322_vm10 = vcmask 1047559  }
 0x1a7   :  { %v850_v31 = vpop.permute.xlu0 %849 }
 0x1a8   :  { %884 = vst.msk [vmem:[#allocation2 + $0x70] sm:$0xff] %vm869_vm11, %v850_v31  ;;  %v852_v34 = vpop.permute.xlu1 %851 }
 0x1a9   :  { %885 = vst.msk [vmem:[#allocation2 + $0x78] sm:$0xff] %vm869_vm11, %v852_v34  ;;  %vm2325_vm11 = vcmask 254976  }
 0x1ab   :  { %v6318_v39 = vpop.f32.mrb[0].mxu0  ;;  %v1292_v41 = vpop.permute.xlu0 %1291 }
 0x1ac   :  { %v1114_v43 = vmul.f32 %v6318_v39, %v7470_v29  ;;  %v1027_v44 = vpop.f32.mrb[1].mxu0  ;;  %v1389_v45 = vpop.permute.xlu1 %1388  ;;  %1340 = vst.msk [vmem:[#allocation4] sm:$0xff] %vm1339_vm0, %v1292_v41 }
 0x1ad   :  { %v1113_v46 = vmul.f32 %v7470_v29, %v1027_v44  ;;  %1437 = vst.msk [vmem:[#allocation4] sm:$0xff] %vm1436_vm15, %v1389_v45 }
 0x1ae   :  { %v1137_v47 = vadd.f32 %v7482_v40, %v1114_v43 }
 0x1af   :  { %v1136_v49 = vadd.f32 %v7482_v40, %v1113_v46  ;;  %v900_v50 = vld [vmem:[#allocation2 + $0x70] sm:$0xff] }
 0x1b0   :  { %v1153_v52 = vmax.f32 %v1137_v47, 0.0  ;;  %6337 = vmatprep.mubr.msk.f32.mxu0 %vm908_vm12, %v900_v50  ;;  %v901_v53 = vld [vmem:[#allocation2 + $0x78] sm:$0xff]  ;;  %v1308_v54 = vpop.permute.xlu1 %1307 }
 0x1b1   :  { %v1152_v55 = vmax.f32 %v1136_v49, 0.0  ;;  %6338 = vmatmul.mubr.msk.f32.gmra.mrb[14].mxu0 %vm908_vm12, %v901_v53  ;;  %1348 = vst.msk [vmem:[#allocation4 + $0x80] sm:$0xff] %vm1339_vm0, %v1308_v54  ;;  %vm2355_vm12 = vcmask 517376  }
 0x1b2   :  { %1212 = vst.msk [vmem:[#allocation3 + $0x21] sm:$0xff] %vm1168_vm13, %v1153_v52 }
 0x1b3   :  { %1211 = vst.msk [vmem:[#allocation3 + $0x11] sm:$0xff] %vm1168_vm13, %v1152_v55 }
 0x1b4   :  { %v1405_v58 = vpop.permute.xlu1 %1404 }
 0x1b5   :  { %1445 = vst.msk [vmem:[#allocation4 + $0x80] sm:$0xff] %vm1436_vm15, %v1405_v58 }
 0x1b9   :  { %v1745_v62 = vld [vmem:[#allocation3 + $0x20] sm:$0xff] }
 0x1ba   :  { %v1939_v63 = vld [vmem:[#allocation3 + $0x22] sm:$0xff]  ;;  %1777 = vrot.lane.b32.xlu1 %v1745_v62, %s6707_s14  ;;  %1487 = vrot.lane.b32.xlu0 %v1745_v62, %s6710_s8  ;;  %v1453_v0 = vld [vmem:[#allocation3 + $0x10] sm:$0xff]  ;;  %1245 = vst.msk [vmem:[#allocation4 + $0x20] sm:$0xff] %vm1168_vm13, %v1745_v62 }
 0x1bb   :  { %1955 = vst.msk [vmem:[#allocation4 + $0x8] sm:$0xff] %vm1168_vm13, %v1939_v63  ;;  %1244 = vst.msk [vmem:[#allocation4 + $0x10] sm:$0xff] %vm1168_vm13, %v1453_v0  ;;  %v1842_v4 = vld [vmem:[#allocation3 + $0x21] sm:$0xff]  ;;  %v1550_v20 = vld [vmem:[#allocation3 + $0x11] sm:$0xff] }
 0x1bc   :  { %v1647_v19 = vld [vmem:[#allocation3 + $0x12] sm:$0xff] }
 0x1be   :  { %1874 = vrot.lane.b32.xlu1 %v1842_v4, %s6708_s16  ;;  %1584 = vrot.lane.b32.xlu0 %v1842_v4, %s6711_s27 }
 0x1c2   :  { %v1972_v8 = vld [vmem:[#allocation4 + $0x8] sm:$0xff]  ;;  %1681 = vrot.lane.b32.xlu0 %v1939_v63, %s6712_s2  ;;  %1295 = vrot.lane.b32.xlu1 %v1842_v4, %s6705_s26 }
 0x1c3   :  { %5813 = vmatprep.mubr.msk.f32.mxu1 %vm1168_vm13, %v1972_v8 }
 0x1c6   :  { %1485 = vrot.lane.b32.xlu0 %v1453_v0, %s6710_s8  ;;  %1392 = vrot.lane.b32.xlu1 %v1939_v63, %s6706_s0  ;;  %v7626_v63 = vpop.permute.xlu0 %1791  ;;  %v1946_v0 = vld [vmem:[#allocation3 + $0x92] sm:$0xff] }
 0x1c7   :  { %v6321_v14 = vpop.f32.mrb[2].mxu0  ;;  %1962 = vst.msk [vmem:[#allocation4 + $0x78] sm:$0xff] %vm1168_vm13, %v1946_v0 }
 0x1c8   :  { %v1116_v16 = vmul.f32 %v6321_v14, %v7470_v29  ;;  %v1037_v17 = vpop.f32.mrb[3].mxu0 }
 0x1c9   :  { %v1115_v18 = vmul.f32 %v7470_v29, %v1037_v17 }
 0x1ca   :  { %v1139_v21 = vadd.f32 %v7482_v40, %v1116_v16  ;;  %1293 = vrot.lane.b32.xlu0 %v1550_v20, %s6705_s26  ;;  %1582 = vrot.lane.b32.xlu1 %v1550_v20, %s6711_s27  ;;  %v7631_v1 = vpop.permute.xlu0 %1888 }
 0x1cb   :  { %v1138_v22 = vadd.f32 %v7482_v40, %v1115_v18 }
 0x1cc   :  { %v1155_v23 = vmax.f32 %v1139_v21, 0.0 }
 0x1cd   :  { %v1154_v24 = vmax.f32 %v1138_v22, 0.0 }
 0x1ce   :  { %1214 = vst.msk [vmem:[#allocation3 + $0x41] sm:$0xff] %vm1168_vm13, %v1155_v23  ;;  %1390 = vrot.lane.b32.xlu0 %v1647_v19, %s6706_s0  ;;  %1679 = vrot.lane.b32.xlu1 %v1647_v19, %s6712_s2 }
 0x1cf   :  { %1213 = vst.msk [vmem:[#allocation3 + $0x31] sm:$0xff] %vm1168_vm13, %v1154_v24 }
 0x1d5   :  { %v1747_v25 = vld [vmem:[#allocation3 + $0x40] sm:$0xff] }
 0x1d6   :  { %v1650_v26 = vld [vmem:[#allocation3 + $0x42] sm:$0xff]  ;;  %1781 = vrot.lane.b32.xlu1 %v1747_v25, %s6707_s14  ;;  %1491 = vrot.lane.b32.xlu0 %v1747_v25, %s6710_s8  ;;  %v1746_v28 = vld [vmem:[#allocation3 + $0x30] sm:$0xff]  ;;  %1247 = vst.msk [vmem:[#allocation4 + $0x40] sm:$0xff] %vm1168_vm13, %v1747_v25 }
 0x1d7   :  { %v1649_v30 = vld [vmem:[#allocation3 + $0x32] sm:$0xff]  ;;  %1957 = vst.msk [vmem:[#allocation4 + $0x28] sm:$0xff] %vm1168_vm13, %v1650_v26  ;;  %1246 = vst.msk [vmem:[#allocation4 + $0x30] sm:$0xff] %vm1168_vm13, %v1746_v28  ;;  %v1844_v31 = vld [vmem:[#allocation3 + $0x41] sm:$0xff] }
 0x1d8   :  { %1956 = vst.msk [vmem:[#allocation4 + $0x18] sm:$0xff] %vm1168_vm13, %v1649_v30  ;;  %v1843_v33 = vld [vmem:[#allocation3 + $0x31] sm:$0xff] }
 0x1da   :  { %1878 = vrot.lane.b32.xlu1 %v1844_v31, %s6708_s16  ;;  %1588 = vrot.lane.b32.xlu0 %v1844_v31, %s6711_s27 }
 0x1de   :  { %1685 = vrot.lane.b32.xlu0 %v1650_v26, %s6712_s2  ;;  %1299 = vrot.lane.b32.xlu1 %v1844_v31, %s6705_s26 }
 0x1e2   :  { %1396 = vrot.lane.b32.xlu1 %v1650_v26, %s6706_s0  ;;  %1779 = vrot.lane.b32.xlu0 %v1746_v28, %s6707_s14 }
 0x1e6   :  { %1876 = vrot.lane.b32.xlu0 %v1843_v33, %s6708_s16  ;;  %1489 = vrot.lane.b32.xlu1 %v1746_v28, %s6710_s8 }
 0x1e7   :  { %v6324_v34 = vpop.f32.mrb[4].mxu0 }
 0x1e8   :  { %v1118_v36 = vmul.f32 %v6324_v34, %v7470_v29  ;;  %v1047_v37 = vpop.f32.mrb[5].mxu0 }
 0x1e9   :  { %v1117_v39 = vmul.f32 %v7470_v29, %v1047_v37 }
 0x1ea   :  { %v1141_v41 = vadd.f32 %v7482_v40, %v1118_v36  ;;  %1586 = vrot.lane.b32.xlu1 %v1843_v33, %s6711_s27  ;;  %1297 = vrot.lane.b32.xlu0 %v1843_v33, %s6705_s26 }
 0x1eb   :  { %v1140_v42 = vadd.f32 %v7482_v40, %v1117_v39 }
 0x1ec   :  { %v1157_v43 = vmax.f32 %v1141_v41, 0.0 }
 0x1ed   :  { %v1156_v44 = vmax.f32 %v1140_v42, 0.0 }
 0x1ee   :  { %1216 = vst.msk [vmem:[#allocation3 + $0x61] sm:$0xff] %vm1168_vm13, %v1157_v43  ;;  %1683 = vrot.lane.b32.xlu1 %v1649_v30, %s6712_s2  ;;  %1394 = vrot.lane.b32.xlu0 %v1649_v30, %s6706_s0 }
 0x1ef   :  { %1215 = vst.msk [vmem:[#allocation3 + $0x51] sm:$0xff] %vm1168_vm13, %v1156_v44 }
 0x1f5   :  { %v1749_v45 = vld [vmem:[#allocation3 + $0x60] sm:$0xff] }
 0x1f6   :  { %v1652_v46 = vld [vmem:[#allocation3 + $0x62] sm:$0xff]  ;;  %1785 = vrot.lane.b32.xlu1 %v1749_v45, %s6707_s14  ;;  %1495 = vrot.lane.b32.xlu0 %v1749_v45, %s6710_s8  ;;  %v1748_v47 = vld [vmem:[#allocation3 + $0x50] sm:$0xff]  ;;  %1249 = vst.msk [vmem:[#allocation4 + $0x60] sm:$0xff] %vm1168_vm13, %v1749_v45 }
 0x1f7   :  { %v1651_v48 = vld [vmem:[#allocation3 + $0x52] sm:$0xff]  ;;  %1959 = vst.msk [vmem:[#allocation4 + $0x48] sm:$0xff] %vm1168_vm13, %v1652_v46  ;;  %1248 = vst.msk [vmem:[#allocation4 + $0x50] sm:$0xff] %vm1168_vm13, %v1748_v47  ;;  %v1846_v32 = vld [vmem:[#allocation3 + $0x61] sm:$0xff] }
 0x1f8   :  { %1958 = vst.msk [vmem:[#allocation4 + $0x38] sm:$0xff] %vm1168_vm13, %v1651_v48  ;;  %v1845_v52 = vld [vmem:[#allocation3 + $0x51] sm:$0xff] }
 0x1fa   :  { %1882 = vrot.lane.b32.xlu1 %v1846_v32, %s6708_s16  ;;  %1592 = vrot.lane.b32.xlu0 %v1846_v32, %s6711_s27 }
 0x1fe   :  { %1689 = vrot.lane.b32.xlu0 %v1652_v46, %s6712_s2  ;;  %1303 = vrot.lane.b32.xlu1 %v1846_v32, %s6705_s26 }
 0x202   :  { %1400 = vrot.lane.b32.xlu1 %v1652_v46, %s6706_s0  ;;  %1783 = vrot.lane.b32.xlu0 %v1748_v47, %s6707_s14 }
 0x204   :  { %v6327_v49 = vpop.f32.mrb[6].mxu0 }
 0x205   :  { %v1120_v50 = vmul.f32 %v6327_v49, %v7470_v29  ;;  %v1057_v51 = vpop.f32.mrb[7].mxu0 }
 0x206   :  { %v1119_v53 = vmul.f32 %v7470_v29, %v1057_v51  ;;  %1880 = vrot.lane.b32.xlu0 %v1845_v52, %s6708_s16  ;;  %1493 = vrot.lane.b32.xlu1 %v1748_v47, %s6710_s8  ;;  %v1974_v47 = vld [vmem:[#allocation4 + $0x18] sm:$0xff] }
 0x207   :  { %v1143_v54 = vadd.f32 %v7482_v40, %v1120_v50 }
 0x208   :  { %v1142_v55 = vadd.f32 %v7482_v40, %v1119_v53 }
 0x209   :  { %v1159_v56 = vmax.f32 %v1143_v54, 0.0 }
 0x20a   :  { %v1158_v35 = vmax.f32 %v1142_v55, 0.0  ;;  %1590 = vrot.lane.b32.xlu1 %v1845_v52, %s6711_s27  ;;  %1301 = vrot.lane.b32.xlu0 %v1845_v52, %s6705_s26 }
 0x20b   :  { %1218 = vst.msk [vmem:[#allocation3 + $0x81] sm:$0xff] %vm1168_vm13, %v1159_v56 }
 0x20c   :  { %1217 = vst.msk [vmem:[#allocation3 + $0x71] sm:$0xff] %vm1168_vm13, %v1158_v35 }
 0x20e   :  { %1687 = vrot.lane.b32.xlu1 %v1651_v48, %s6712_s2  ;;  %1398 = vrot.lane.b32.xlu0 %v1651_v48, %s6706_s0 }
 0x212   :  { %v1751_v57 = vld [vmem:[#allocation3 + $0x80] sm:$0xff] }
 0x213   :  { %v1654_v58 = vld [vmem:[#allocation3 + $0x82] sm:$0xff]  ;;  %1789 = vrot.lane.b32.xlu1 %v1751_v57, %s6707_s14  ;;  %1499 = vrot.lane.b32.xlu0 %v1751_v57, %s6710_s8  ;;  %v1459_v59 = vld [vmem:[#allocation3 + $0x70] sm:$0xff] }
 0x214   :  { %v1653_v60 = vld [vmem:[#allocation3 + $0x72] sm:$0xff]  ;;  %1961 = vst.msk [vmem:[#allocation4 + $0x68] sm:$0xff] %vm1168_vm13, %v1654_v58  ;;  %1250 = vst.msk [vmem:[#allocation4 + $0x70] sm:$0xff] %vm1168_vm13, %v1459_v59  ;;  %v1848_v61 = vld [vmem:[#allocation3 + $0x81] sm:$0xff] }
 0x215   :  { %1960 = vst.msk [vmem:[#allocation4 + $0x58] sm:$0xff] %vm1168_vm13, %v1653_v60  ;;  %v1556_v62 = vld [vmem:[#allocation3 + $0x71] sm:$0xff] }
 0x217   :  { %1886 = vrot.lane.b32.xlu1 %v1848_v61, %s6708_s16  ;;  %1596 = vrot.lane.b32.xlu0 %v1848_v61, %s6711_s27 }
 0x21b   :  { %1693 = vrot.lane.b32.xlu0 %v1654_v58, %s6712_s2  ;;  %1497 = vrot.lane.b32.xlu1 %v1459_v59, %s6710_s8 }
 0x21f   :  { %1787 = vrot.lane.b32.xlu0 %v1459_v59, %s6707_s14  ;;  %1594 = vrot.lane.b32.xlu1 %v1556_v62, %s6711_s27 }
 0x223   :  { %1884 = vrot.lane.b32.xlu0 %v1556_v62, %s6708_s16  ;;  %1691 = vrot.lane.b32.xlu1 %v1653_v60, %s6712_s2 }
 0x227   :  { %1305 = vrot.lane.b32.xlu0 %v1556_v62, %s6705_s26  ;;  %v1976_v62 = vld [vmem:[#allocation4 + $0x28] sm:$0xff] }
 0x22b   :  { %1402 = vrot.lane.b32.xlu0 %v1653_v60, %s6706_s0  ;;  %v6330_v2 = vpop.f32.mrb[8].mxu0 }
 0x22c   :  { %v1122_v3 = vmul.f32 %v6330_v2, %v7470_v29  ;;  %v1778_v4 = vpop.permute.xlu1 %1777  ;;  %v1488_v5 = vpop.permute.xlu0 %1487 }
 0x22d   :  { %v1067_v38 = vpop.f32.mrb[9].mxu0 }
 0x22e   :  { %v1145_v7 = vadd.f32 %v7482_v40, %v1122_v3  ;;  %v1121_v8 = vmul.f32 %v7470_v29, %v1067_v38 }
 0x230   :  { %v1161_v9 = vmax.f32 %v1145_v7, 0.0  ;;  %v1144_v10 = vadd.f32 %v7482_v40, %v1121_v8  ;;  %v1875_v11 = vpop.permute.xlu1 %1874  ;;  %v1585_v12 = vpop.permute.xlu0 %1584 }
 0x232   :  { %1220 = vst.msk [vmem:[#allocation3 + $0xc1] sm:$0xff] %vm1168_vm13, %v1161_v9  ;;  %v1160_v13 = vmax.f32 %v1144_v10, 0.0 }
 0x234   :  { %1219 = vst.msk [vmem:[#allocation3 + $0xb1] sm:$0xff] %vm1168_vm13, %v1160_v13  ;;  %v1682_v14 = vpop.permute.xlu0 %1681  ;;  %v1296_v15 = vpop.permute.xlu1 %1295  ;;  %v1978_v13 = vld [vmem:[#allocation4 + $0x38] sm:$0xff] }
 0x235   :  { %1342 = vst.msk [vmem:[#allocation4 + $0x20] sm:$0xff] %vm1339_vm0, %v1296_v15 }
 0x238   :  { %v1486_v16 = vpop.permute.xlu0 %1485  ;;  %v1393_v17 = vpop.permute.xlu1 %1392 }
 0x239   :  { %1534 = vst.msk [vmem:[#allocation4] sm:$0xff] %vm1533_vm1, %v1486_v16  ;;  %v1753_v18 = vld [vmem:[#allocation3 + $0xc0] sm:$0xff] }
 0x23a   :  { %v7643_v20 = vld [vmem:[#allocation3 + $0xc2] sm:$0xff]  ;;  %1439 = vst.msk [vmem:[#allocation4 + $0x20] sm:$0xff] %vm1436_vm15, %v1393_v17  ;;  %1793 = vrot.lane.b32.xlu1 %v1753_v18, %s6707_s14 }
 0x23b   :  { %1963 = vst.msk [vmem:[#allocation4 + $0x88] sm:$0xff] %vm1168_vm13, %v7643_v20  ;;  %1253 = vst.msk [vmem:[#allocation4 + $0xa0] sm:$0xff] %vm1168_vm13, %v1753_v18  ;;  %v1268_v21 = vld [vmem:[#allocation3 + $0xb1] sm:$0xff]  ;;  %v1559_v36 = vld [vmem:[#allocation3 + $0xc1] sm:$0xff] }
 0x23c   :  { %v1461_v22 = vld [vmem:[#allocation3 + $0xb0] sm:$0xff]  ;;  %1309 = vrot.lane.b32.xlu0 %v1268_v21, %s6705_s26  ;;  %v1294_v23 = vpop.permute.xlu0 %1293  ;;  %v1583_v24 = vpop.permute.xlu1 %1582 }
 0x23d   :  { %1252 = vst.msk [vmem:[#allocation4 + $0x90] sm:$0xff] %vm1168_vm13, %v1461_v22  ;;  %v1365_v19 = vld [vmem:[#allocation3 + $0xb2] sm:$0xff] }
 0x23e   :  { %1341 = vst.msk [vmem:[#allocation4 + $0x10] sm:$0xff] %vm1339_vm0, %v1294_v23  ;;  %1501 = vrot.lane.b32.xlu1 %v1461_v22, %s6710_s8 }
 0x23f   :  { %1631 = vst.msk [vmem:[#allocation4] sm:$0xff] %vm1630_vm2, %v1583_v24 }
 0x240   :  { %1406 = vrot.lane.b32.xlu0 %v1365_v19, %s6706_s0  ;;  %v1391_v25 = vpop.permute.xlu0 %1390  ;;  %v1680_v26 = vpop.permute.xlu1 %1679 }
 0x241   :  { %1438 = vst.msk [vmem:[#allocation4 + $0x10] sm:$0xff] %vm1436_vm15, %v1391_v25 }
 0x242   :  { %1728 = vst.msk [vmem:[#allocation4] sm:$0xff] %vm1727_vm3, %v1680_v26  ;;  %1598 = vrot.lane.b32.xlu1 %v1268_v21, %s6711_s27 }
 0x243   :  { %1535 = vst.msk [vmem:[#allocation4 + $0x10] sm:$0xff] %vm1533_vm1, %v1488_v5 }
 0x244   :  { %1826 = vst.msk [vmem:[#allocation4] sm:$0xff] %vm1825_vm4, %v1778_v4  ;;  %1503 = vrot.lane.b32.xlu0 %v1753_v18, %s6710_s8  ;;  %v6333_v28 = vpop.f32.mrb[10].mxu0 }
 0x245   :  { %1632 = vst.msk [vmem:[#allocation4 + $0x10] sm:$0xff] %vm1630_vm2, %v1585_v12  ;;  %v1124_v30 = vmul.f32 %v6333_v28, %v7470_v29  ;;  %v1077_v31 = vpop.f32.mrb[11].mxu0 }
 0x246   :  { %1923 = vst.msk [vmem:[#allocation4] sm:$0xff] %vm1922_vm5, %v1875_v11  ;;  %v1123_v33 = vmul.f32 %v7470_v29, %v1077_v31  ;;  %1695 = vrot.lane.b32.xlu1 %v1365_v19, %s6712_s2 }
 0x247   :  { %1729 = vst.msk [vmem:[#allocation4 + $0x10] sm:$0xff] %vm1727_vm3, %v1682_v14  ;;  %v1147_v34 = vadd.f32 %v7482_v40, %v1124_v30 }
 0x248   :  { %v1146_v37 = vadd.f32 %v7482_v40, %v1123_v33  ;;  %1600 = vrot.lane.b32.xlu0 %v1559_v36, %s6711_s27  ;;  %v1782_v39 = vpop.permute.xlu1 %1781  ;;  %v1492_v41 = vpop.permute.xlu0 %1491 }
 0x249   :  { %v1163_v42 = vmax.f32 %v1147_v34, 0.0 }
 0x24a   :  { %v1162_v43 = vmax.f32 %v1146_v37, 0.0  ;;  %1890 = vrot.lane.b32.xlu1 %v1559_v36, %s6708_s16 }
 0x24b   :  { %1222 = vst.msk [vmem:[#allocation3 + $0xe1] sm:$0xff] %vm1168_vm13, %v1163_v42 }
 0x24c   :  { %1221 = vst.msk [vmem:[#allocation3 + $0xd1] sm:$0xff] %vm1168_vm13, %v1162_v43  ;;  %v1879_v45 = vpop.permute.xlu1 %1878  ;;  %v1589_v46 = vpop.permute.xlu0 %1588 }
 0x24d   :  { %v1971_v44 = vld [vmem:[#allocation4] sm:$0xff] }
 0x24e   :  { %2134 = vmatmul.mubr.f32.vlgmr.msra.gmra.mrb[0].mxu1 %v1971_v44  ;;  %1697 = vrot.lane.b32.xlu1 %v7643_v20, %s6712_s2 }
 0x24f   :  { %5814 = vmatprep.mubr.msk.f32.mxu1 %vm1168_vm13, %v1974_v47 }
 0x250   :  { %v1686_v48 = vpop.permute.xlu0 %1685  ;;  %v1300_v32 = vpop.permute.xlu1 %1299 }
 0x251   :  { %1344 = vst.msk [vmem:[#allocation4 + $0x40] sm:$0xff] %vm1339_vm0, %v1300_v32 }
 0x252   :  { %v1755_v49 = vld [vmem:[#allocation3 + $0xe0] sm:$0xff] }
 0x253   :  { %v7678_v50 = vld [vmem:[#allocation3 + $0xe2] sm:$0xff]  ;;  %v1851_v51 = vld [vmem:[#allocation3 + $0xd1] sm:$0xff]  ;;  %1255 = vst.msk [vmem:[#allocation4 + $0xc0] sm:$0xff] %vm1168_vm13, %v1755_v49 }
 0x254   :  { %v1754_v52 = vld [vmem:[#allocation3 + $0xd0] sm:$0xff]  ;;  %1965 = vst.msk [vmem:[#allocation4 + $0xa8] sm:$0xff] %vm1168_vm13, %v7678_v50  ;;  %v1397_v54 = vpop.permute.xlu1 %1396  ;;  %v1780_v55 = vpop.permute.xlu0 %1779  ;;  %1892 = vrot.lane.b32.xlu1 %v1851_v51, %s6708_s16  ;;  %v1852_v38 = vld [vmem:[#allocation3 + $0xe1] sm:$0xff] }
 0x255   :  { %v1657_v53 = vld [vmem:[#allocation3 + $0xd2] sm:$0xff]  ;;  %1795 = vrot.lane.b32.xlu0 %v1754_v52, %s6707_s14  ;;  %1254 = vst.msk [vmem:[#allocation4 + $0xb0] sm:$0xff] %vm1168_vm13, %v1754_v52 }
 0x256   :  { %1964 = vst.msk [vmem:[#allocation4 + $0x98] sm:$0xff] %vm1168_vm13, %v1657_v53 }
 0x257   :  { %1441 = vst.msk [vmem:[#allocation4 + $0x40] sm:$0xff] %vm1436_vm15, %v1397_v54 }
 0x258   :  { %1827 = vst.msk [vmem:[#allocation4 + $0x10] sm:$0xff] %vm1825_vm4, %v1780_v55  ;;  %v1877_v56 = vpop.permute.xlu0 %1876  ;;  %v1490_v35 = vpop.permute.xlu1 %1489  ;;  %1408 = vrot.lane.b32.xlu1 %v7643_v20, %s6706_s0 }
 0x259   :  { %1311 = vrot.lane.b32.xlu0 %v1559_v36, %s6705_s26  ;;  %1924 = vst.msk [vmem:[#allocation4 + $0x10] sm:$0xff] %vm1922_vm5, %v1877_v56  ;;  %v1980_v36 = vld [vmem:[#allocation4 + $0x48] sm:$0xff] }
 0x25a   :  { %1536 = vst.msk [vmem:[#allocation4 + $0x20] sm:$0xff] %vm1533_vm1, %v1490_v35 }
 0x25c   :  { %v1587_v57 = vpop.permute.xlu1 %1586  ;;  %v1298_v58 = vpop.permute.xlu0 %1297  ;;  %1602 = vrot.lane.b32.xlu1 %v1851_v51, %s6711_s27 }
 0x25d   :  { %1505 = vrot.lane.b32.xlu0 %v1754_v52, %s6710_s8  ;;  %1633 = vst.msk [vmem:[#allocation4 + $0x20] sm:$0xff] %vm1630_vm2, %v1587_v57  ;;  %v1982_v52 = vld [vmem:[#allocation4 + $0x58] sm:$0xff] }
 0x25e   :  { %1343 = vst.msk [vmem:[#allocation4 + $0x30] sm:$0xff] %vm1339_vm0, %v1298_v58 }
 0x260   :  { %v1684_v59 = vpop.permute.xlu1 %1683  ;;  %v1395_v60 = vpop.permute.xlu0 %1394  ;;  %1699 = vrot.lane.b32.xlu1 %v1657_v53, %s6712_s2  ;;  %v1973_v61 = vld [vmem:[#allocation4 + $0x10] sm:$0xff] }
 0x261   :  { %1313 = vrot.lane.b32.xlu0 %v1851_v51, %s6705_s26  ;;  %1730 = vst.msk [vmem:[#allocation4 + $0x20] sm:$0xff] %vm1727_vm3, %v1684_v59  ;;  %2139 = vmatmul.mubr.f32.gmra.mrb[2].mxu1 %v1973_v61 }
 0x262   :  { %1440 = vst.msk [vmem:[#allocation4 + $0x30] sm:$0xff] %vm1436_vm15, %v1395_v60  ;;  %5815 = vmatprep.mubr.msk.f32.mxu1 %vm1168_vm13, %v1976_v62 }
 0x263   :  { %1828 = vst.msk [vmem:[#allocation4 + $0x20] sm:$0xff] %vm1825_vm4, %v1782_v39 }
 0x264   :  { %1537 = vst.msk [vmem:[#allocation4 + $0x30] sm:$0xff] %vm1533_vm1, %v1492_v41  ;;  %1797 = vrot.lane.b32.xlu1 %v1755_v49, %s6707_s14  ;;  %v6336_v0 = vpop.f32.mrb[12].mxu0 }
 0x265   :  { %1925 = vst.msk [vmem:[#allocation4 + $0x20] sm:$0xff] %vm1922_vm5, %v1879_v45  ;;  %1410 = vrot.lane.b32.xlu0 %v1657_v53, %s6706_s0  ;;  %v1126_v2 = vmul.f32 %v6336_v0, %v7470_v29  ;;  %v1087_v3 = vpop.f32.mrb[13].mxu0  ;;  %v1984_v0 = vld [vmem:[#allocation4 + $0x68] sm:$0xff] }
 0x266   :  { %1634 = vst.msk [vmem:[#allocation4 + $0x30] sm:$0xff] %vm1630_vm2, %v1589_v46  ;;  %v1125_v4 = vmul.f32 %v7470_v29, %v1087_v3 }
 0x267   :  { %1731 = vst.msk [vmem:[#allocation4 + $0x30] sm:$0xff] %vm1727_vm3, %v1686_v48  ;;  %v1149_v5 = vadd.f32 %v7482_v40, %v1126_v2  ;;  %v1986_v2 = vld [vmem:[#allocation4 + $0x78] sm:$0xff] }
 0x268   :  { %v1148_v7 = vadd.f32 %v7482_v40, %v1125_v4  ;;  %v1786_v8 = vpop.permute.xlu1 %1785  ;;  %v1496_v9 = vpop.permute.xlu0 %1495  ;;  %1894 = vrot.lane.b32.xlu1 %v1852_v38, %s6708_s16 }
 0x269   :  { %1507 = vrot.lane.b32.xlu0 %v1755_v49, %s6710_s8  ;;  %v1165_v10 = vmax.f32 %v1149_v5, 0.0  ;;  %v1954_v5 = vld [vmem:[#allocation3 + $0x132] sm:$0xff] }
 0x26a   :  { %v1164_v11 = vmax.f32 %v1148_v7, 0.0  ;;  %1970 = vst.msk [vmem:[#allocation4 + $0xf8] sm:$0xff] %vm1168_vm13, %v1954_v5  ;;  %v1988_v7 = vld [vmem:[#allocation4 + $0x88] sm:$0xff] }
 0x26b   :  { %1224 = vst.msk [vmem:[#allocation3 + $0x101] sm:$0xff] %vm1168_vm13, %v1165_v10  ;;  %v1857_v10 = vld [vmem:[#allocation3 + $0x131] sm:$0xff] }
 0x26c   :  { %v1975_v12 = vld [vmem:[#allocation4 + $0x20] sm:$0xff]  ;;  %1223 = vst.msk [vmem:[#allocation3 + $0xf1] sm:$0xff] %vm1168_vm13, %v1164_v11  ;;  %v1883_v14 = vpop.permute.xlu1 %1882  ;;  %v1593_v15 = vpop.permute.xlu0 %1592  ;;  %1701 = vrot.lane.b32.xlu1 %v7678_v50, %s6712_s2 }
 0x26d   :  { %2144 = vmatmul.mubr.f32.gmra.mrb[4].mxu1 %v1975_v12  ;;  %1604 = vrot.lane.b32.xlu0 %v1852_v38, %s6711_s27 }
 0x26e   :  { %5816 = vmatprep.mubr.msk.f32.mxu1 %vm1168_vm13, %v1978_v13 }
 0x270   :  { %v1690_v16 = vpop.permute.xlu0 %1689  ;;  %v1304_v17 = vpop.permute.xlu1 %1303 }
 0x271   :  { %1346 = vst.msk [vmem:[#allocation4 + $0x60] sm:$0xff] %vm1339_vm0, %v1304_v17 }
 0x272   :  { %v1757_v18 = vld [vmem:[#allocation3 + $0x100] sm:$0xff] }
 0x273   :  { %v7723_v20 = vld [vmem:[#allocation3 + $0x102] sm:$0xff]  ;;  %v1853_v21 = vld [vmem:[#allocation3 + $0xf1] sm:$0xff]  ;;  %1257 = vst.msk [vmem:[#allocation4 + $0xe0] sm:$0xff] %vm1168_vm13, %v1757_v18 }
 0x274   :  { %v1756_v22 = vld [vmem:[#allocation3 + $0xf0] sm:$0xff]  ;;  %1967 = vst.msk [vmem:[#allocation4 + $0xc8] sm:$0xff] %vm1168_vm13, %v7723_v20  ;;  %v1401_v24 = vpop.permute.xlu1 %1400  ;;  %v1784_v19 = vpop.permute.xlu0 %1783  ;;  %1896 = vrot.lane.b32.xlu1 %v1853_v21, %s6708_s16  ;;  %v1854_v43 = vld [vmem:[#allocation3 + $0x101] sm:$0xff] }
 0x275   :  { %v1659_v23 = vld [vmem:[#allocation3 + $0xf2] sm:$0xff]  ;;  %1799 = vrot.lane.b32.xlu0 %v1756_v22, %s6707_s14  ;;  %1256 = vst.msk [vmem:[#allocation4 + $0xd0] sm:$0xff] %vm1168_vm13, %v1756_v22 }
 0x276   :  { %1966 = vst.msk [vmem:[#allocation4 + $0xb8] sm:$0xff] %vm1168_vm13, %v1659_v23 }
 0x277   :  { %1443 = vst.msk [vmem:[#allocation4 + $0x60] sm:$0xff] %vm1436_vm15, %v1401_v24 }
 0x278   :  { %1829 = vst.msk [vmem:[#allocation4 + $0x30] sm:$0xff] %vm1825_vm4, %v1784_v19  ;;  %v1881_v25 = vpop.permute.xlu0 %1880  ;;  %v1494_v26 = vpop.permute.xlu1 %1493  ;;  %1412 = vrot.lane.b32.xlu1 %v7678_v50, %s6706_s0 }
 0x279   :  { %1315 = vrot.lane.b32.xlu0 %v1852_v38, %s6705_s26  ;;  %1926 = vst.msk [vmem:[#allocation4 + $0x30] sm:$0xff] %vm1922_vm5, %v1881_v25 }
 0x27a   :  { %1538 = vst.msk [vmem:[#allocation4 + $0x40] sm:$0xff] %vm1533_vm1, %v1494_v26 }
 0x27c   :  { %v1591_v28 = vpop.permute.xlu1 %1590  ;;  %v1302_v30 = vpop.permute.xlu0 %1301  ;;  %1606 = vrot.lane.b32.xlu1 %v1853_v21, %s6711_s27 }
 0x27d   :  { %1509 = vrot.lane.b32.xlu0 %v1756_v22, %s6710_s8  ;;  %1635 = vst.msk [vmem:[#allocation4 + $0x40] sm:$0xff] %vm1630_vm2, %v1591_v28 }
 0x27e   :  { %1345 = vst.msk [vmem:[#allocation4 + $0x50] sm:$0xff] %vm1339_vm0, %v1302_v30  ;;  %v1992_v30 = vld [vmem:[#allocation4 + $0xa8] sm:$0xff] }
 0x280   :  { %v1688_v31 = vpop.permute.xlu1 %1687  ;;  %v1399_v33 = vpop.permute.xlu0 %1398  ;;  %1703 = vrot.lane.b32.xlu1 %v1659_v23, %s6712_s2  ;;  %v1977_v34 = vld [vmem:[#allocation4 + $0x30] sm:$0xff] }
 0x281   :  { %1317 = vrot.lane.b32.xlu0 %v1853_v21, %s6705_s26  ;;  %1732 = vst.msk [vmem:[#allocation4 + $0x40] sm:$0xff] %vm1727_vm3, %v1688_v31  ;;  %2149 = vmatmul.mubr.f32.gmra.mrb[6].mxu1 %v1977_v34  ;;  %v1990_v21 = vld [vmem:[#allocation4 + $0x98] sm:$0xff] }
 0x282   :  { %1442 = vst.msk [vmem:[#allocation4 + $0x50] sm:$0xff] %vm1436_vm15, %v1399_v33  ;;  %5817 = vmatprep.mubr.msk.f32.mxu1 %vm1168_vm13, %v1980_v36 }
 0x283   :  { %1830 = vst.msk [vmem:[#allocation4 + $0x40] sm:$0xff] %vm1825_vm4, %v1786_v8 }
 0x284   :  { %1539 = vst.msk [vmem:[#allocation4 + $0x50] sm:$0xff] %vm1533_vm1, %v1496_v9  ;;  %1801 = vrot.lane.b32.xlu1 %v1757_v18, %s6707_s14  ;;  %v6339_v37 = vpop.f32.mrb[14].mxu0  ;;  %v1760_v9 = vld [vmem:[#allocation3 + $0x130] sm:$0xff] }
 0x285   :  { %1927 = vst.msk [vmem:[#allocation4 + $0x40] sm:$0xff] %vm1922_vm5, %v1883_v14  ;;  %1414 = vrot.lane.b32.xlu0 %v1659_v23, %s6706_s0  ;;  %v1128_v39 = vmul.f32 %v6339_v37, %v7470_v29  ;;  %v1790_v41 = vpop.permute.xlu1 %1789  ;;  %v1500_v42 = vpop.permute.xlu0 %1499 }
 0x286   :  { %1636 = vst.msk [vmem:[#allocation4 + $0x50] sm:$0xff] %vm1630_vm2, %v1593_v15  ;;  %v1097_v44 = vpop.f32.mrb[15].mxu0 }
 0x287   :  { %1733 = vst.msk [vmem:[#allocation4 + $0x50] sm:$0xff] %vm1727_vm3, %v1690_v16  ;;  %v1151_v45 = vadd.f32 %v7482_v40, %v1128_v39  ;;  %v1127_v46 = vmul.f32 %v7470_v29, %v1097_v44  ;;  %v1994_v44 = vld [vmem:[#allocation4 + $0xb8] sm:$0xff] }
 0x288   :  { %1898 = vrot.lane.b32.xlu1 %v1854_v43, %s6708_s16 }
 0x289   :  { %1511 = vrot.lane.b32.xlu0 %v1757_v18, %s6710_s8  ;;  %v1167_v47 = vmax.f32 %v1151_v45, 0.0  ;;  %v1150_v48 = vadd.f32 %v7482_v40, %v1127_v46  ;;  %v1887_v32 = vpop.permute.xlu1 %1886  ;;  %v1597_v49 = vpop.permute.xlu0 %1596 }
 0x28b   :  { %1226 = vst.msk [vmem:[#allocation3 + $0x121] sm:$0xff] %vm1168_vm13, %v1167_v47  ;;  %v1166_v51 = vmax.f32 %v1150_v48, 0.0 }
 0x28c   :  { %v1979_v50 = vld [vmem:[#allocation4 + $0x40] sm:$0xff]  ;;  %1705 = vrot.lane.b32.xlu1 %v7723_v20, %s6712_s2 }
 0x28d   :  { %2154 = vmatmul.mubr.f32.gmra.mrb[8].mxu1 %v1979_v50  ;;  %1225 = vst.msk [vmem:[#allocation3 + $0x111] sm:$0xff] %vm1168_vm13, %v1166_v51  ;;  %v1694_v29 = vpop.permute.xlu0 %1693  ;;  %v1498_v53 = vpop.permute.xlu1 %1497  ;;  %1608 = vrot.lane.b32.xlu0 %v1854_v43, %s6711_s27  ;;  %v1996_v51 = vld [vmem:[#allocation4 + $0xc8] sm:$0xff] }
 0x28e   :  { %5818 = vmatprep.mubr.msk.f32.mxu1 %vm1168_vm13, %v1982_v52  ;;  %1540 = vst.msk [vmem:[#allocation4 + $0x60] sm:$0xff] %vm1533_vm1, %v1498_v53 }
 0x291   :  { %v1788_v40 = vpop.permute.xlu0 %1787  ;;  %v1595_v54 = vpop.permute.xlu1 %1594 }
 0x292   :  { %1831 = vst.msk [vmem:[#allocation4 + $0x50] sm:$0xff] %vm1825_vm4, %v1788_v40  ;;  %v1662_v55 = vld [vmem:[#allocation3 + $0x122] sm:$0xff] }
 0x293   :  { %1637 = vst.msk [vmem:[#allocation4 + $0x60] sm:$0xff] %vm1630_vm2, %v1595_v54  ;;  %v1759_v4 = vld [vmem:[#allocation3 + $0x120] sm:$0xff] }
 0x294   :  { %1969 = vst.msk [vmem:[#allocation4 + $0xe8] sm:$0xff] %vm1168_vm13, %v1662_v55  ;;  %v1855_v56 = vld [vmem:[#allocation3 + $0x111] sm:$0xff]  ;;  %v1856_v38 = vld [vmem:[#allocation3 + $0x121] sm:$0xff] }
 0x295   :  { %v1758_v35 = vld [vmem:[#allocation3 + $0x110] sm:$0xff]  ;;  %1900 = vrot.lane.b32.xlu1 %v1855_v56, %s6708_s16  ;;  %v1885_v58 = vpop.permute.xlu0 %1884  ;;  %v1692_v59 = vpop.permute.xlu1 %1691 }
 0x296   :  { %v1661_v57 = vld [vmem:[#allocation3 + $0x112] sm:$0xff]  ;;  %1803 = vrot.lane.b32.xlu0 %v1758_v35, %s6707_s14  ;;  %1258 = vst.msk [vmem:[#allocation4 + $0xf0] sm:$0xff] %vm1168_vm13, %v1758_v35 }
 0x297   :  { %1968 = vst.msk [vmem:[#allocation4 + $0xd8] sm:$0xff] %vm1168_vm13, %v1661_v57 }
 0x298   :  { %1928 = vst.msk [vmem:[#allocation4 + $0x50] sm:$0xff] %vm1922_vm5, %v1885_v58 }
 0x299   :  { %1734 = vst.msk [vmem:[#allocation4 + $0x60] sm:$0xff] %vm1727_vm3, %v1692_v59  ;;  %1416 = vrot.lane.b32.xlu1 %v7723_v20, %s6706_s0  ;;  %v1306_v60 = vpop.permute.xlu0 %1305 }
 0x29a   :  { %1832 = vst.msk [vmem:[#allocation4 + $0x60] sm:$0xff] %vm1825_vm4, %v1790_v41  ;;  %1319 = vrot.lane.b32.xlu0 %v1854_v43, %s6705_s26 }
 0x29b   :  { %1929 = vst.msk [vmem:[#allocation4 + $0x60] sm:$0xff] %vm1922_vm5, %v1887_v32 }
 0x29c   :  { %1347 = vst.msk [vmem:[#allocation4 + $0x70] sm:$0xff] %vm1339_vm0, %v1306_v60 }
 0x29d   :  { %1610 = vrot.lane.b32.xlu1 %v1855_v56, %s6711_s27  ;;  %v1403_v61 = vpop.permute.xlu0 %1402 }
 0x29e   :  { %1513 = vrot.lane.b32.xlu0 %v1758_v35, %s6710_s8  ;;  %1444 = vst.msk [vmem:[#allocation4 + $0x70] sm:$0xff] %vm1436_vm15, %v1403_v61  ;;  %v1998_v58 = vld [vmem:[#allocation4 + $0xd8] sm:$0xff] }
 0x29f   :  { %v1981_v62 = vld [vmem:[#allocation4 + $0x50] sm:$0xff]  ;;  %1541 = vst.msk [vmem:[#allocation4 + $0x70] sm:$0xff] %vm1533_vm1, %v1500_v42 }
 0x2a0   :  { %2159 = vmatmul.mubr.f32.gmra.mrb[10].mxu1 %v1981_v62  ;;  %1638 = vst.msk [vmem:[#allocation4 + $0x70] sm:$0xff] %vm1630_vm2, %v1597_v49 }
 0x2a1   :  { %5819 = vmatprep.mubr.msk.f32.mxu1 %vm1168_vm13, %v1984_v0  ;;  %1735 = vst.msk [vmem:[#allocation4 + $0x70] sm:$0xff] %vm1727_vm3, %v1694_v29  ;;  %1707 = vrot.lane.b32.xlu1 %v1661_v57, %s6712_s2 }
 0x2a2   :  { %1321 = vrot.lane.b32.xlu0 %v1855_v56, %s6705_s26  ;;  %v1983_v3 = vld [vmem:[#allocation4 + $0x60] sm:$0xff]  ;;  %1833 = vst.msk [vmem:[#allocation4 + $0x70] sm:$0xff] %vm1825_vm4, %v7626_v63 }
 0x2a3   :  { %1930 = vst.msk [vmem:[#allocation4 + $0x70] sm:$0xff] %vm1922_vm5, %v7631_v1 }
 0x2a4   :  { %2164 = vmatmul.mubr.f32.gmra.mrb[12].mxu1 %v1983_v3 }
 0x2a5   :  { %5820 = vmatprep.mubr.msk.f32.mxu1 %vm1168_vm13, %v1986_v2  ;;  %1805 = vrot.lane.b32.xlu1 %v1759_v4, %s6707_s14 }
 0x2a6   :  { %1418 = vrot.lane.b32.xlu0 %v1661_v57, %s6706_s0 }
 0x2a9   :  { %1902 = vrot.lane.b32.xlu1 %v1856_v38, %s6708_s16 }
 0x2aa   :  { %1515 = vrot.lane.b32.xlu0 %v1759_v4, %s6710_s8  ;;  %v1985_v63 = vld [vmem:[#allocation4 + $0x70] sm:$0xff]  ;;  %v2000_v4 = vld [vmem:[#allocation4 + $0xe8] sm:$0xff] }
 0x2ab   :  { %2169 = vmatmul.mubr.f32.gmra.mrb[14].mxu1 %v1985_v63 }
 0x2ac   :  { %5821 = vmatprep.mubr.msk.f32.mxu1 %vm1168_vm13, %v1988_v7  ;;  %v1794_v1 = vpop.permute.xlu1 %1793 }
 0x2ad   :  { %1709 = vrot.lane.b32.xlu1 %v1662_v55, %s6712_s2 }
 0x2ae   :  { %1612 = vrot.lane.b32.xlu0 %v1856_v38, %s6711_s27  ;;  %v1310_v8 = vpop.permute.xlu0 %1309 }
 0x2af   :  { %1349 = vst.msk [vmem:[#allocation4 + $0x90] sm:$0xff] %vm1339_vm0, %v1310_v8 }
 0x2b0   :  { %v1502_v11 = vpop.permute.xlu1 %1501 }
 0x2b1   :  { %1542 = vst.msk [vmem:[#allocation4 + $0x80] sm:$0xff] %vm1533_vm1, %v1502_v11  ;;  %1904 = vrot.lane.b32.xlu1 %v1857_v10, %s6708_s16  ;;  %v7868_v11 = vld [vmem:[#allocation7] ss:$0 sm:$0xff] }
 0x2b2   :  { %1807 = vrot.lane.b32.xlu0 %v1760_v9, %s6707_s14  ;;  %v1407_v12 = vpop.permute.xlu0 %1406  ;;  %v7866_v9 = vld [vmem:[%s8776_s5] ss:$0 sm:$0xff] }
 0x2b3   :  { %1446 = vst.msk [vmem:[#allocation4 + $0x90] sm:$0xff] %vm1436_vm15, %v1407_v12 }
 0x2b4   :  { %v1599_v13 = vpop.permute.xlu1 %1598 }
 0x2b5   :  { %1639 = vst.msk [vmem:[#allocation4 + $0x80] sm:$0xff] %vm1630_vm2, %v1599_v13 }
 0x2b6   :  { %v1504_v14 = vpop.permute.xlu0 %1503 }
 0x2b7   :  { %1543 = vst.msk [vmem:[#allocation4 + $0x90] sm:$0xff] %vm1533_vm1, %v1504_v14 }
 0x2b8   :  { %v1696_v15 = vpop.permute.xlu1 %1695 }
 0x2b9   :  { %1736 = vst.msk [vmem:[#allocation4 + $0x80] sm:$0xff] %vm1727_vm3, %v1696_v15 }
 0x2ba   :  { %1834 = vst.msk [vmem:[#allocation4 + $0x80] sm:$0xff] %vm1825_vm4, %v1794_v1  ;;  %v1601_v16 = vpop.permute.xlu0 %1600 }
 0x2bb   :  { %1640 = vst.msk [vmem:[#allocation4 + $0x90] sm:$0xff] %vm1630_vm2, %v1601_v16 }
 0x2bc   :  { %v1891_v17 = vpop.permute.xlu1 %1890 }
 0x2bd   :  { %1931 = vst.msk [vmem:[#allocation4 + $0x80] sm:$0xff] %vm1922_vm5, %v1891_v17  ;;  %v2002_v17 = vld [vmem:[#allocation4 + $0xf8] sm:$0xff] }
 0x2c0   :  { %v1698_v18 = vpop.permute.xlu1 %1697 }
 0x2c1   :  { %1737 = vst.msk [vmem:[#allocation4 + $0x90] sm:$0xff] %vm1727_vm3, %v1698_v18 }
 0x2c4   :  { %v1987_v20 = vld [vmem:[#allocation4 + $0x80] sm:$0xff] }
 0x2c5   :  { %2174 = vmatmul.mubr.f32.gmra.mrb[16].mxu1 %v1987_v20 }
 0x2c6   :  { %5822 = vmatprep.mubr.msk.f32.mxu1 %vm1168_vm13, %v1990_v21  ;;  %v1893_v22 = vpop.permute.xlu1 %1892 }
 0x2c7   :  { %v1796_v23 = vpop.permute.xlu0 %1795 }
 0x2c8   :  { %1835 = vst.msk [vmem:[#allocation4 + $0x90] sm:$0xff] %vm1825_vm4, %v1796_v23 }
 0x2c9   :  { %1932 = vst.msk [vmem:[#allocation4 + $0x90] sm:$0xff] %vm1922_vm5, %v1893_v22 }
 0x2ca   :  { %v1409_v24 = vpop.permute.xlu1 %1408 }
 0x2cb   :  { %v1312_v19 = vpop.permute.xlu0 %1311 }
 0x2cc   :  { %1350 = vst.msk [vmem:[#allocation4 + $0xa0] sm:$0xff] %vm1339_vm0, %v1312_v19 }
 0x2cd   :  { %1447 = vst.msk [vmem:[#allocation4 + $0xa0] sm:$0xff] %vm1436_vm15, %v1409_v24 }
 0x2ce   :  { %v1603_v25 = vpop.permute.xlu1 %1602 }
 0x2cf   :  { %v1506_v26 = vpop.permute.xlu0 %1505 }
 0x2d0   :  { %1544 = vst.msk [vmem:[#allocation4 + $0xa0] sm:$0xff] %vm1533_vm1, %v1506_v26  ;;  %v1989_v28 = vld [vmem:[#allocation4 + $0x90] sm:$0xff] }
 0x2d1   :  { %1641 = vst.msk [vmem:[#allocation4 + $0xa0] sm:$0xff] %vm1630_vm2, %v1603_v25  ;;  %2179 = vmatmul.mubr.f32.gmra.mrb[18].mxu1 %v1989_v28 }
 0x2d2   :  { %5823 = vmatprep.mubr.msk.f32.mxu1 %vm1168_vm13, %v1992_v30  ;;  %v1700_v31 = vpop.permute.xlu1 %1699 }
 0x2d3   :  { %v1314_v33 = vpop.permute.xlu0 %1313  ;;  %1738 = vst.msk [vmem:[#allocation4 + $0xa0] sm:$0xff] %vm1727_vm3, %v1700_v31 }
 0x2d4   :  { %1351 = vst.msk [vmem:[#allocation4 + $0xb0] sm:$0xff] %vm1339_vm0, %v1314_v33 }
 0x2d6   :  { %v1798_v34 = vpop.permute.xlu1 %1797 }
 0x2d7   :  { %v1411_v36 = vpop.permute.xlu0 %1410  ;;  %1836 = vst.msk [vmem:[#allocation4 + $0xa0] sm:$0xff] %vm1825_vm4, %v1798_v34 }
 0x2d8   :  { %1448 = vst.msk [vmem:[#allocation4 + $0xb0] sm:$0xff] %vm1436_vm15, %v1411_v36 }
 0x2da   :  { %v1895_v37 = vpop.permute.xlu1 %1894 }
 0x2db   :  { %v1508_v39 = vpop.permute.xlu0 %1507  ;;  %1933 = vst.msk [vmem:[#allocation4 + $0xa0] sm:$0xff] %vm1922_vm5, %v1895_v37 }
 0x2dc   :  { %1545 = vst.msk [vmem:[#allocation4 + $0xb0] sm:$0xff] %vm1533_vm1, %v1508_v39 }
 0x2de   :  { %v1702_v41 = vpop.permute.xlu1 %1701 }
 0x2df   :  { %v1605_v42 = vpop.permute.xlu0 %1604 }
 0x2e0   :  { %1642 = vst.msk [vmem:[#allocation4 + $0xb0] sm:$0xff] %vm1630_vm2, %v1605_v42 }
 0x2e1   :  { %1739 = vst.msk [vmem:[#allocation4 + $0xb0] sm:$0xff] %vm1727_vm3, %v1702_v41 }
 0x2e2   :  { %v1991_v43 = vld [vmem:[#allocation4 + $0xa0] sm:$0xff] }
 0x2e3   :  { %2184 = vmatmul.mubr.f32.gmra.mrb[20].mxu1 %v1991_v43 }
 0x2e4   :  { %5824 = vmatprep.mubr.msk.f32.mxu1 %vm1168_vm13, %v1994_v44 }
 0x2e6   :  { %v1897_v45 = vpop.permute.xlu1 %1896 }
 0x2e7   :  { %v1800_v46 = vpop.permute.xlu0 %1799 }
 0x2e8   :  { %1837 = vst.msk [vmem:[#allocation4 + $0xb0] sm:$0xff] %vm1825_vm4, %v1800_v46 }
 0x2e9   :  { %1934 = vst.msk [vmem:[#allocation4 + $0xb0] sm:$0xff] %vm1922_vm5, %v1897_v45 }
 0x2ea   :  { %v1413_v47 = vpop.permute.xlu1 %1412 }
 0x2eb   :  { %v1316_v48 = vpop.permute.xlu0 %1315 }
 0x2ec   :  { %1352 = vst.msk [vmem:[#allocation4 + $0xc0] sm:$0xff] %vm1339_vm0, %v1316_v48 }
 0x2ed   :  { %1449 = vst.msk [vmem:[#allocation4 + $0xc0] sm:$0xff] %vm1436_vm15, %v1413_v47 }
 0x2ee   :  { %v1607_v32 = vpop.permute.xlu1 %1606 }
 0x2ef   :  { %v1510_v49 = vpop.permute.xlu0 %1509 }
 0x2f0   :  { %v1993_v50 = vld [vmem:[#allocation4 + $0xb0] sm:$0xff]  ;;  %1546 = vst.msk [vmem:[#allocation4 + $0xc0] sm:$0xff] %vm1533_vm1, %v1510_v49 }
 0x2f1   :  { %2189 = vmatmul.mubr.f32.gmra.mrb[22].mxu1 %v1993_v50  ;;  %1643 = vst.msk [vmem:[#allocation4 + $0xc0] sm:$0xff] %vm1630_vm2, %v1607_v32 }
 0x2f2   :  { %5825 = vmatprep.mubr.msk.f32.mxu1 %vm1168_vm13, %v1996_v51  ;;  %v1704_v52 = vpop.permute.xlu1 %1703 }
 0x2f3   :  { %v1318_v29 = vpop.permute.xlu0 %1317  ;;  %1740 = vst.msk [vmem:[#allocation4 + $0xc0] sm:$0xff] %vm1727_vm3, %v1704_v52 }
 0x2f4   :  { %1353 = vst.msk [vmem:[#allocation4 + $0xd0] sm:$0xff] %vm1339_vm0, %v1318_v29 }
 0x2f6   :  { %v1802_v53 = vpop.permute.xlu1 %1801 }
 0x2f7   :  { %v1415_v40 = vpop.permute.xlu0 %1414  ;;  %1838 = vst.msk [vmem:[#allocation4 + $0xc0] sm:$0xff] %vm1825_vm4, %v1802_v53 }
 0x2f8   :  { %1450 = vst.msk [vmem:[#allocation4 + $0xd0] sm:$0xff] %vm1436_vm15, %v1415_v40 }
 0x2fa   :  { %v1899_v54 = vpop.permute.xlu1 %1898 }
 0x2fb   :  { %v1512_v55 = vpop.permute.xlu0 %1511  ;;  %1935 = vst.msk [vmem:[#allocation4 + $0xc0] sm:$0xff] %vm1922_vm5, %v1899_v54 }
 0x2fc   :  { %1547 = vst.msk [vmem:[#allocation4 + $0xd0] sm:$0xff] %vm1533_vm1, %v1512_v55 }
 0x2fe   :  { %v1706_v35 = vpop.permute.xlu1 %1705 }
 0x2ff   :  { %v1609_v56 = vpop.permute.xlu0 %1608 }
 0x300   :  { %1644 = vst.msk [vmem:[#allocation4 + $0xd0] sm:$0xff] %vm1630_vm2, %v1609_v56 }
 0x301   :  { %1741 = vst.msk [vmem:[#allocation4 + $0xd0] sm:$0xff] %vm1727_vm3, %v1706_v35 }
 0x302   :  { %v1995_v57 = vld [vmem:[#allocation4 + $0xc0] sm:$0xff] }
 0x303   :  { %2194 = vmatmul.mubr.f32.gmra.mrb[24].mxu1 %v1995_v57 }
 0x304   :  { %5826 = vmatprep.mubr.msk.f32.mxu1 %vm1168_vm13, %v1998_v58 }
 0x307   :  { %v1901_v59 = vpop.permute.xlu1 %1900 }
 0x308   :  { %v1804_v60 = vpop.permute.xlu0 %1803 }
 0x309   :  { %1839 = vst.msk [vmem:[#allocation4 + $0xd0] sm:$0xff] %vm1825_vm4, %v1804_v60 }
 0x30a   :  { %1936 = vst.msk [vmem:[#allocation4 + $0xd0] sm:$0xff] %vm1922_vm5, %v1901_v59 }
 0x30b   :  { %v1417_v61 = vpop.permute.xlu1 %1416 }
 0x30c   :  { %v1320_v62 = vpop.permute.xlu0 %1319 }
 0x30d   :  { %1354 = vst.msk [vmem:[#allocation4 + $0xe0] sm:$0xff] %vm1339_vm0, %v1320_v62 }
 0x30e   :  { %1451 = vst.msk [vmem:[#allocation4 + $0xe0] sm:$0xff] %vm1436_vm15, %v1417_v61 }
 0x30f   :  { %v1611_v0 = vpop.permute.xlu1 %1610 }
 0x310   :  { %v1514_v2 = vpop.permute.xlu0 %1513 }
 0x311   :  { %1548 = vst.msk [vmem:[#allocation4 + $0xe0] sm:$0xff] %vm1533_vm1, %v1514_v2  ;;  %v1997_v3 = vld [vmem:[#allocation4 + $0xd0] sm:$0xff] }
 0x312   :  { %1645 = vst.msk [vmem:[#allocation4 + $0xe0] sm:$0xff] %vm1630_vm2, %v1611_v0  ;;  %2199 = vmatmul.mubr.f32.gmra.mrb[26].mxu1 %v1997_v3  ;;  %v6464_v3 = vld [vmem:[%s8778_s7 + $0x40] sm:$0xff]  }
 0x313   :  { %5827 = vmatprep.mubr.msk.f32.mxu1 %vm1168_vm13, %v2000_v4  ;;  %v1708_v5 = vpop.permute.xlu1 %1707  ;;  %v6465_v4 = vld [vmem:[%s8778_s7] sm:$0xff]   ;;  %6111 = vmatprep.subr.bf16.mxu0 %v6464_v3 }
 0x314   :  { %v1322_v38 = vpop.permute.xlu0 %1321  ;;  %1742 = vst.msk [vmem:[#allocation4 + $0xe0] sm:$0xff] %vm1727_vm3, %v1708_v5  ;;  %6112 = vmatpush3.bf16.msra.mxu0 %v6465_v4 }
 0x315   :  { %1355 = vst.msk [vmem:[#allocation4 + $0xf0] sm:$0xff] %vm1339_vm0, %v1322_v38  ;;  %vm5680_vm0 = vcmask 25600  }
 0x317   :  { %v1806_v63 = vpop.permute.xlu1 %1805 }
 0x318   :  { %v1419_v7 = vpop.permute.xlu0 %1418  ;;  %1840 = vst.msk [vmem:[#allocation4 + $0xe0] sm:$0xff] %vm1825_vm4, %v1806_v63 }
 0x319   :  { %1452 = vst.msk [vmem:[#allocation4 + $0xf0] sm:$0xff] %vm1436_vm15, %v1419_v7  ;;  %v6466_v7 = vld [vmem:[%s8778_s7 + $0x48] sm:$0xff]   ;;  %vm6714_vm15 = vmmov 0  }
 0x31a   :  { %6113 = vmatprep.subr.bf16.mxu0 %v6466_v7 }
 0x31b   :  { %v1903_v1 = vpop.permute.xlu1 %1902 }
 0x31c   :  { %v1516_v8 = vpop.permute.xlu0 %1515  ;;  %1937 = vst.msk [vmem:[#allocation4 + $0xe0] sm:$0xff] %vm1922_vm5, %v1903_v1  ;;  %v6467_v1 = vld [vmem:[%s8778_s7 + $0x8] sm:$0xff]  }
 0x31d   :  { %1549 = vst.msk [vmem:[#allocation4 + $0xf0] sm:$0xff] %vm1533_vm1, %v1516_v8  ;;  %6114 = vmatpush3.bf16.msra.mxu0 %v6467_v1 }
 0x31f   :  { %v1710_v15 = vpop.permute.xlu1 %1709 }
 0x320   :  { %v1613_v12 = vpop.permute.xlu0 %1612 }
 0x321   :  { %v2135_v10 = vpop.f32.mrb[0].mxu1  ;;  %1646 = vst.msk [vmem:[#allocation4 + $0xf0] sm:$0xff] %vm1630_vm2, %v1613_v12 }
 0x322   :  { %v2221_v13 = vmul.f32 %v7866_v9, %v2135_v10  ;;  %v2137_v14 = vpop.f32.mrb[1].mxu1  ;;  %1743 = vst.msk [vmem:[#allocation4 + $0xf0] sm:$0xff] %vm1727_vm3, %v1710_v15 }
 0x323   :  { %v1999_v20 = vld [vmem:[#allocation4 + $0xe0] sm:$0xff]  ;;  %v1905_v22 = vpop.permute.xlu1 %1904 }
 0x324   :  { %v2244_v16 = vadd.f32 %v7868_v11, %v2221_v13  ;;  %v1808_v18 = vpop.permute.xlu0 %1807  ;;  %2204 = vmatmul.mubr.f32.gmra.mrb[28].mxu1 %v1999_v20 }
 0x325   :  { %1841 = vst.msk [vmem:[#allocation4 + $0xf0] sm:$0xff] %vm1825_vm4, %v1808_v18  ;;  %5828 = vmatprep.mubr.msk.f32.mxu1 %vm1168_vm13, %v2002_v17  ;;  %vm2385_vm13 = vcmask 779776  }
 0x326   :  { %v2260_v21 = vmax.f32 %v2244_v16, 0.0  ;;  %1938 = vst.msk [vmem:[#allocation4 + $0xf0] sm:$0xff] %vm1922_vm5, %v1905_v22 }
 0x328   :  { %2277 = vst.msk [vmem:[#allocation5] sm:$0xff] %vm2276_vm6, %v2260_v21 }
 0x32d   :  { %v2001_v23 = vld [vmem:[#allocation4 + $0xf0] sm:$0xff] }
 0x32e   :  { %2209 = vmatmul.mubr.f32.gmra.mrb[30].mxu1 %v2001_v23 }
 0x32f   :  { %v5841_v10 = vld.sshfl [vmem:[#allocation5 + $0x5] sm:$0x1 pattern:$0x76325410] }
 0x330   :  { %v5833_v14 = vld.sshfl [vmem:[#allocation5 + $0x1] sm:$0x1 pattern:$0x76325410] }
 0x331   :  { %v5843_v18 = vld.sshfl [vmem:[#allocation5 + $0x6] sm:$0x1 pattern:$0x76325410] }
 0x332   :  { %v5835_v23 = vld.sshfl [vmem:[#allocation5 + $0x2] sm:$0x1 pattern:$0x76325410] }
 0x334   :  { %v2140_v24 = vpop.f32.mrb[2].mxu1 }
 0x335   :  { %v2222_v19 = vmul.f32 %v7866_v9, %v2140_v24  ;;  %v2142_v25 = vpop.f32.mrb[3].mxu1 }
 0x337   :  { %v2245_v26 = vadd.f32 %v7868_v11, %v2222_v19  ;;  %v6468_v19 = vld [vmem:[%s8778_s7 + $0x50] sm:$0xff]  }
 0x338   :  { %6115 = vmatprep.subr.bf16.mxu0 %v6468_v19 }
 0x339   :  { %v2261_v28 = vmax.f32 %v2245_v26, 0.0 }
 0x33b   :  { %2278 = vst.msk [vmem:[#allocation5 + $0x8] sm:$0xff] %vm2276_vm6, %v2261_v28 }
 0x340   :  { %v2145_v30 = vpop.f32.mrb[4].mxu1 }
 0x341   :  { %v2223_v31 = vmul.f32 %v7866_v9, %v2145_v30  ;;  %v2147_v33 = vpop.f32.mrb[5].mxu1  ;;  %v5845_v30 = vld.sshfl [vmem:[#allocation5 + $0x7] sm:$0x1 pattern:$0x76325410] }
 0x342   :  { %v6469_v33 = vld [vmem:[%s8778_s7 + $0x10] sm:$0xff]   ;;  %v5849_v1 = vld.sshfl [vmem:[#allocation5 + $0x9] sm:$0x1 pattern:$0x76325410] }
 0x343   :  { %v2246_v34 = vadd.f32 %v7868_v11, %v2223_v31  ;;  %6116 = vmatpush3.bf16.msra.mxu0 %v6469_v33 }
 0x345   :  { %v2262_v36 = vmax.f32 %v2246_v34, 0.0 }
 0x347   :  { %2279 = vst.msk [vmem:[#allocation5 + $0x10] sm:$0xff] %vm2276_vm6, %v2262_v36 }
 0x354   :  { %v2150_v37 = vpop.f32.mrb[6].mxu1 }
 0x355   :  { %v2224_v39 = vmul.f32 %v7866_v9, %v2150_v37  ;;  %v2152_v41 = vpop.f32.mrb[7].mxu1 }
 0x357   :  { %v2247_v42 = vadd.f32 %v7868_v11, %v2224_v39 }
 0x359   :  { %v2263_v43 = vmax.f32 %v2247_v42, 0.0 }
 0x35b   :  { %2280 = vst.msk [vmem:[#allocation5 + $0x18] sm:$0xff] %vm2276_vm6, %v2263_v43 }
 0x360   :  { %v2155_v44 = vpop.f32.mrb[8].mxu1 }
 0x361   :  { %v2225_v45 = vmul.f32 %v7866_v9, %v2155_v44  ;;  %v2157_v46 = vpop.f32.mrb[9].mxu1 }
 0x363   :  { %v2248_v47 = vadd.f32 %v7868_v11, %v2225_v45 }
 0x365   :  { %v2264_v48 = vmax.f32 %v2248_v47, 0.0 }
 0x367   :  { %2281 = vst.msk [vmem:[#allocation5 + $0x20] sm:$0xff] %vm2276_vm6, %v2264_v48 }
 0x373   :  { %v2160_v32 = vpop.f32.mrb[10].mxu1 }
 0x374   :  { %v2226_v49 = vmul.f32 %v7866_v9, %v2160_v32  ;;  %v2162_v50 = vpop.f32.mrb[11].mxu1 }
 0x376   :  { %v2249_v51 = vadd.f32 %v7868_v11, %v2226_v49 }
 0x377   :  { %v2165_v52 = vpop.f32.mrb[12].mxu1 }
 0x378   :  { %v2265_v29 = vmax.f32 %v2249_v51, 0.0  ;;  %v2227_v53 = vmul.f32 %v7866_v9, %v2165_v52  ;;  %v2167_v40 = vpop.f32.mrb[13].mxu1  ;;  %v6470_v51 = vld [vmem:[%s8778_s7 + $0x58] sm:$0xff]  }
 0x379   :  { %v6471_v52 = vld [vmem:[%s8778_s7 + $0x18] sm:$0xff]   ;;  %v5837_v40 = vld.sshfl [vmem:[#allocation5 + $0x3] sm:$0x1 pattern:$0x76325410]  ;;  %6117 = vmatprep.subr.bf16.mxu0 %v6470_v51 }
 0x37a   :  { %2282 = vst.msk [vmem:[#allocation5 + $0x28] sm:$0xff] %vm2276_vm6, %v2265_v29  ;;  %v2250_v54 = vadd.f32 %v7868_v11, %v2227_v53  ;;  %6118 = vmatpush3.bf16.msra.mxu0 %v6471_v52 }
 0x37c   :  { %v2266_v55 = vmax.f32 %v2250_v54, 0.0 }
 0x37e   :  { %2283 = vst.msk [vmem:[#allocation5 + $0x30] sm:$0xff] %vm2276_vm6, %v2266_v55  ;;  %v2170_v56 = vpop.f32.mrb[14].mxu1  ;;  %v5839_v55 = vld.sshfl [vmem:[#allocation5 + $0x4] sm:$0x1 pattern:$0x76325410] }
 0x37f   :  { %v2228_v35 = vmul.f32 %v7866_v9, %v2170_v56  ;;  %v2172_v57 = vpop.f32.mrb[15].mxu1 }
 0x381   :  { %v2251_v58 = vadd.f32 %v7868_v11, %v2228_v35 }
 0x383   :  { %v2267_v59 = vmax.f32 %v2251_v58, 0.0 }
 0x385   :  { %2284 = vst.msk [vmem:[#allocation5 + $0x38] sm:$0xff] %vm2276_vm6, %v2267_v59 }
 0x398   :  { %v2175_v60 = vpop.f32.mrb[16].mxu1 }
 0x399   :  { %v2229_v61 = vmul.f32 %v7866_v9, %v2175_v60  ;;  %v2177_v62 = vpop.f32.mrb[17].mxu1  ;;  %v5831_v60 = vld.sshfl [vmem:[#allocation5] sm:$0x1 pattern:$0x76325410] }
 0x39b   :  { %v2252_v0 = vadd.f32 %v7868_v11, %v2229_v61 }
 0x39d   :  { %v2268_v2 = vmax.f32 %v2252_v0, 0.0  ;;  %v5857_v0 = vld.sshfl [vmem:[#allocation5 + $0xd] sm:$0x1 pattern:$0x76325410] }
 0x39f   :  { %2285 = vst.msk [vmem:[#allocation5 + $0x40] sm:$0xff] %vm2276_vm6, %v2268_v2 }
 0x3a4   :  { %v2180_v5 = vpop.f32.mrb[18].mxu1 }
 0x3a5   :  { %v2230_v38 = vmul.f32 %v7866_v9, %v2180_v5  ;;  %v2182_v63 = vpop.f32.mrb[19].mxu1  ;;  %v6472_v5 = vld [vmem:[%s8778_s7 + $0x60] sm:$0xff]  }
 0x3a6   :  { %v5842_v12 = vld.sshfl [vmem:[#allocation5 + $0x45] sm:$0x1 pattern:$0x76325410]  ;;  %6119 = vmatprep.subr.bf16.mxu0 %v6472_v5 }
 0x3a7   :  { %v2253_v8 = vadd.f32 %v7868_v11, %v2230_v38  ;;  %v2464_v13 = vrot.slane %v5842_v12, 7  ;;  %v5834_v15 = vld.sshfl [vmem:[#allocation5 + $0x41] sm:$0x1 pattern:$0x76325410] }
 0x3a8   :  { %v2347_v17 = vrot.slane %v5834_v15, 7  ;;  %v5844_v20 = vld.sshfl [vmem:[#allocation5 + $0x46] sm:$0x1 pattern:$0x76325410] }
 0x3a9   :  { %v2269_v16 = vmax.f32 %v2253_v8, 0.0  ;;  %v2465_v21 = vsel %vm2316_vm7, %v2464_v13, %v5841_v10  ;;  %v2493_v22 = vrot.slane %v5844_v20, 7  ;;  %v5836_v24 = vld.sshfl [vmem:[#allocation5 + $0x42] sm:$0x1 pattern:$0x76325410] }
 0x3aa   :  { %v2466_v25 = vsel %vm2318_vm8, %v2464_v13, %v2465_v21  ;;  %v2348_v26 = vsel %vm2316_vm7, %v2347_v17, %v5833_v14  ;;  %v2377_v28 = vrot.slane %v5836_v24, 7  ;;  %v5846_v31 = vld.sshfl [vmem:[#allocation5 + $0x47] sm:$0x1 pattern:$0x76325410] }
 0x3ab   :  { %2286 = vst.msk [vmem:[#allocation5 + $0x48] sm:$0xff] %vm2276_vm6, %v2269_v16  ;;  %v2467_v34 = vsel %vm2320_vm9, %v2464_v13, %v2466_v25  ;;  %v2349_v36 = vsel %vm2318_vm8, %v2347_v17, %v2348_v26  ;;  %v2494_v37 = vsel %vm2316_vm7, %v2493_v22, %v5843_v18  ;;  %v2522_v39 = vrot.slane %v5846_v31, 7  ;;  %v5838_v41 = vld.sshfl [vmem:[#allocation5 + $0x43] sm:$0x1 pattern:$0x76325410] }
 0x3ac   :  { %v2468_v42 = vsel %vm2322_vm10, %v2464_v13, %v2467_v34  ;;  %v2350_v43 = vsel %vm2320_vm9, %v2347_v17, %v2349_v36  ;;  %v2495_v44 = vsel %vm2318_vm8, %v2493_v22, %v2494_v37  ;;  %v2378_v45 = vsel %vm2316_vm7, %v2377_v28, %v5835_v23  ;;  %v5840_v46 = vld.sshfl [vmem:[#allocation5 + $0x44] sm:$0x1 pattern:$0x76325410]  ;;  %v6474_v34 = vld [vmem:[%s8778_s7 + $0x68] sm:$0xff]  }
 0x3ad   :  { %2469 = vrot.lane.b32.xlu1 %v2468_v42, %s6706_s0  ;;  %v2351_v47 = vsel %vm2322_vm10, %v2347_v17, %v2350_v43  ;;  %v2496_v48 = vsel %vm2320_vm9, %v2493_v22, %v2495_v44  ;;  %v2379_v32 = vsel %vm2318_vm8, %v2377_v28, %v2378_v45  ;;  %v2523_v49 = vsel %vm2316_vm7, %v2522_v39, %v5845_v30  ;;  %v5832_v50 = vld.sshfl [vmem:[#allocation5 + $0x40] sm:$0x1 pattern:$0x76325410] }
 0x3ae   :  { %2352 = vrot.lane.b32.xlu0 %v2351_v47, %s6706_s0  ;;  %v2380_v29 = vsel %vm2320_vm9, %v2377_v28, %v2379_v32  ;;  %v2524_v53 = vsel %vm2318_vm8, %v2522_v39, %v2523_v49  ;;  %v2407_v54 = vrot.slane %v5838_v41, 7  ;;  %v2437_v56 = vrot.slane %v5840_v46, 7  ;;  %v6473_v38 = vld [vmem:[%s8778_s7 + $0x20] sm:$0xff]   ;;  %v6475_v49 = vld [vmem:[%s8778_s7 + $0x28] sm:$0xff]  }
 0x3af   :  { %v2315_v35 = vrot.slane %v5832_v50, 7  ;;  %v2497_v57 = vsel %vm2322_vm10, %v2493_v22, %v2496_v48  ;;  %v2525_v58 = vsel %vm2320_vm9, %v2522_v39, %v2524_v53  ;;  %v2381_v61 = vsel %vm2322_vm10, %v2377_v28, %v2380_v29  ;;  %v5859_v15 = vld.sshfl [vmem:[#allocation5 + $0xe] sm:$0x1 pattern:$0x76325410]  ;;  %6120 = vmatpush3.bf16.msra.mxu0 %v6473_v38  ;;  %v6476_v53 = vld [vmem:[%s8778_s7 + $0x70] sm:$0xff]  }
 0x3b0   :  { %v2408_v59 = vsel %vm2316_vm7, %v2407_v54, %v5837_v40  ;;  %v2438_v3 = vsel %vm2316_vm7, %v2437_v56, %v5839_v55  ;;  %v2526_v13 = vsel %vm2322_vm10, %v2522_v39, %v2525_v58  ;;  %v5851_v28 = vld.sshfl [vmem:[#allocation5 + $0xa] sm:$0x1 pattern:$0x76325410]  ;;  %6121 = vmatprep.subr.bf16.mxu0 %v6474_v34 }
 0x3b1   :  { %2498 = vrot.lane.b32.xlu1 %v2497_v57, %s6711_s27  ;;  %v2409_v62 = vsel %vm2318_vm8, %v2407_v54, %v2408_v59  ;;  %v2317_v4 = vsel %vm2316_vm7, %v2315_v35, %v5831_v60  ;;  %v2439_v10 = vsel %vm2318_vm8, %v2437_v56, %v2438_v3  ;;  %v5861_v31 = vld.sshfl [vmem:[#allocation5 + $0xf] sm:$0x1 pattern:$0x76325410]  ;;  %v6477_v60 = vld [vmem:[%s8778_s7 + $0x30] sm:$0xff]  }
 0x3b2   :  { %v5858_v2 = vld.sshfl [vmem:[#allocation5 + $0x4d] sm:$0x1 pattern:$0x76325410]  ;;  %2382 = vrot.lane.b32.xlu0 %v2381_v61, %s6711_s27  ;;  %v2410_v63 = vsel %vm2320_vm9, %v2407_v54, %v2409_v62  ;;  %v2319_v12 = vsel %vm2318_vm8, %v2315_v35, %v2317_v4  ;;  %v2440_v17 = vsel %vm2320_vm9, %v2437_v56, %v2439_v10 }
 0x3b3   :  { %v2692_v7 = vrot.slane %v5858_v2, 7  ;;  %v5850_v8 = vld.sshfl [vmem:[#allocation5 + $0x49] sm:$0x1 pattern:$0x76325410]  ;;  %v2321_v18 = vsel %vm2320_vm9, %v2315_v35, %v2319_v12  ;;  %v2441_v23 = vsel %vm2322_vm10, %v2437_v56, %v2440_v17  ;;  %v2411_v19 = vsel %vm2322_vm10, %v2407_v54, %v2410_v63  ;;  %6122 = vmatpush3.bf16.msra.mxu0 %v6475_v49  ;;  %v6479_v17 = vld [vmem:[%s8778_s7 + $0x38] sm:$0xff]  }
 0x3b4   :  { %v2578_v14 = vrot.slane %v5850_v8, 7  ;;  %v5860_v16 = vld.sshfl [vmem:[#allocation5 + $0x4e] sm:$0x1 pattern:$0x76325410]  ;;  %v2323_v24 = vsel %vm2322_vm10, %v2315_v35, %v2321_v18  ;;  %6123 = vmatprep.subr.bf16.mxu0 %v6476_v53  ;;  %v6480_v18 = vld [vmem:[%s8778_s7 + $0x140] sm:$0xff]  }
 0x3b5   :  { %v2693_v20 = vsel %vm2316_vm7, %v2692_v7, %v5857_v0  ;;  %v2721_v21 = vrot.slane %v5860_v16, 7  ;;  %v5852_v22 = vld.sshfl [vmem:[#allocation5 + $0x4a] sm:$0x1 pattern:$0x76325410]  ;;  %2527 = vrot.lane.b32.xlu1 %v2526_v13, %s6707_s14  ;;  %v6478_v16 = vld [vmem:[%s8778_s7 + $0x78] sm:$0xff]   ;;  %6155 = vmatprep.subr.bf16.mxu1 %v6480_v18 }
 0x3b6   :  { %v2694_v25 = vsel %vm2318_vm8, %v2692_v7, %v2693_v20  ;;  %v2579_v26 = vsel %vm2316_vm7, %v2578_v14, %v5849_v1  ;;  %v2607_v30 = vrot.slane %v5852_v22, 7  ;;  %v5862_v33 = vld.sshfl [vmem:[#allocation5 + $0x4f] sm:$0x1 pattern:$0x76325410]  ;;  %2412 = vrot.lane.b32.xlu0 %v2411_v19, %s6707_s14  ;;  %v2185_v36 = vpop.f32.mrb[20].mxu1 }
 0x3b7   :  { %2443 = vst.msk [vmem:[#allocation6 + $0x2] sm:$0x3] %vm2325_vm11, %v2441_v23  ;;  %2326 = vst.msk [vmem:[#allocation6] sm:$0x3] %vm2325_vm11, %v2323_v24  ;;  %v2695_v37 = vsel %vm2320_vm9, %v2692_v7, %v2694_v25  ;;  %v2580_v39 = vsel %vm2318_vm8, %v2578_v14, %v2579_v26  ;;  %v2722_v41 = vsel %vm2316_vm7, %v2721_v21, %v5859_v15  ;;  %v2750_v42 = vrot.slane %v5862_v33, 7  ;;  %v2187_v45 = vpop.f32.mrb[21].mxu1 }
 0x3b8   :  { %v5854_v43 = vld.sshfl [vmem:[#allocation5 + $0x4b] sm:$0x1 pattern:$0x76325410]  ;;  %v2231_v44 = vmul.f32 %v7866_v9, %v2185_v36  ;;  %v2696_v46 = vsel %vm2322_vm10, %v2692_v7, %v2695_v37  ;;  %v2581_v47 = vsel %vm2320_vm9, %v2578_v14, %v2580_v39  ;;  %v2723_v48 = vsel %vm2318_vm8, %v2721_v21, %v2722_v41  ;;  %6124 = vmatpush3.bf16.msra.mxu0 %v6477_v60  ;;  %v6481_v22 = vld [vmem:[%s8778_s7 + $0x100] sm:$0xff]   ;;  %v6489_v60 = vld [vmem:[%s8778_s7 + $0x150] sm:$0xff]  }
 0x3b9   :  { %v5856_v32 = vld.sshfl [vmem:[#allocation5 + $0x4c] sm:$0x1 pattern:$0x76325410]  ;;  %v2582_v50 = vsel %vm2322_vm10, %v2578_v14, %v2581_v47  ;;  %v2608_v51 = vsel %vm2316_vm7, %v2607_v30, %v5851_v28  ;;  %v2751_v52 = vsel %vm2316_vm7, %v2750_v42, %v5861_v31  ;;  %2697 = vrot.lane.b32.xlu1 %v2696_v46, %s6706_s0  ;;  %v2724_v54 = vsel %vm2320_vm9, %v2721_v21, %v2723_v48  ;;  %v6482_v19 = vld [vmem:[%s8778_s7 + $0xc0] sm:$0xff]  }
 0x3ba   :  { %v5848_v29 = vld.sshfl [vmem:[#allocation5 + $0x48] sm:$0x1 pattern:$0x76325410]  ;;  %v2254_v40 = vadd.f32 %v7868_v11, %v2231_v44  ;;  %v2609_v55 = vsel %vm2318_vm8, %v2607_v30, %v2608_v51  ;;  %v2752_v56 = vsel %vm2318_vm8, %v2750_v42, %v2751_v52  ;;  %2583 = vrot.lane.b32.xlu0 %v2582_v50, %s6706_s0  ;;  %v2636_v58 = vrot.slane %v5854_v43, 7  ;;  %6125 = vmatprep.subr.bf16.mxu0 %v6478_v16 }
 0x3bb   :  { %v5853_v35 = vld.sshfl [vmem:[#allocation5 + $0xb] sm:$0x1 pattern:$0x76325410]  ;;  %v2610_v57 = vsel %vm2320_vm9, %v2607_v30, %v2609_v55  ;;  %v2665_v59 = vrot.slane %v5856_v32, 7  ;;  %v2551_v0 = vrot.slane %v5848_v29, 7  ;;  %v2725_v2 = vsel %vm2322_vm10, %v2721_v21, %v2724_v54  ;;  %6156 = vmatpush3.bf16.msra.mxu1 %v6481_v22 }
 0x3bc   :  { %v2270_v61 = vmax.f32 %v2254_v40, 0.0  ;;  %v5855_v62 = vld.sshfl [vmem:[#allocation5 + $0xc] sm:$0x1 pattern:$0x76325410]  ;;  %v2753_v3 = vsel %vm2320_vm9, %v2750_v42, %v2752_v56  ;;  %v2637_v4 = vsel %vm2316_vm7, %v2636_v58, %v5853_v35  ;;  %v2611_v63 = vsel %vm2322_vm10, %v2607_v30, %v2610_v57  ;;  %6126 = vmatpush3.bf16.msra.mxu0 %v6479_v17 }
 0x3bd   :  { %v2666_v5 = vsel %vm2316_vm7, %v2665_v59, %v5855_v62  ;;  %v5847_v38 = vld.sshfl [vmem:[#allocation5 + $0x8] sm:$0x1 pattern:$0x76325410]  ;;  %2726 = vrot.lane.b32.xlu1 %v2725_v2, %s6711_s27  ;;  %v2638_v7 = vsel %vm2318_vm8, %v2636_v58, %v2637_v4  ;;  %v2754_v20 = vsel %vm2322_vm10, %v2750_v42, %v2753_v3  ;;  %6133 = vmatprep.subr.bf16.mxu0 %v6482_v19  ;;  %v6494_v19 = vld [vmem:[%s8778_s7 + $0x118] sm:$0xff]  }
 0x3be   :  { %2287 = vst.msk [vmem:[#allocation5 + $0x50] sm:$0xff] %vm2276_vm6, %v2270_v61  ;;  %v2667_v1 = vsel %vm2318_vm8, %v2665_v59, %v2666_v5  ;;  %v2552_v8 = vsel %vm2316_vm7, %v2551_v0, %v5847_v38  ;;  %2612 = vrot.lane.b32.xlu0 %v2611_v63, %s6711_s27  ;;  %v2639_v10 = vsel %vm2320_vm9, %v2636_v58, %v2638_v7  ;;  %v5873_v26 = vld.sshfl [vmem:[#allocation5 + $0x15] sm:$0x1 pattern:$0x76325410]  ;;  %v6485_v36 = vld [vmem:[%s8778_s7 + $0x148] sm:$0xff]  }
 0x3bf   :  { %v2668_v12 = vsel %vm2320_vm9, %v2665_v59, %v2667_v1  ;;  %v2553_v13 = vsel %vm2318_vm8, %v2551_v0, %v2552_v8  ;;  %v2640_v23 = vsel %vm2322_vm10, %v2636_v58, %v2639_v10  ;;  %v5865_v33 = vld.sshfl [vmem:[#allocation5 + $0x11] sm:$0x1 pattern:$0x76325410]  ;;  %6157 = vmatprep.subr.bf16.mxu1 %v6485_v36  ;;  %v6487_v55 = vld [vmem:[%s8778_s7 + $0x108] sm:$0xff]  }
 0x3c0   :  { %v2669_v14 = vsel %vm2322_vm10, %v2665_v59, %v2668_v12  ;;  %v2554_v15 = vsel %vm2320_vm9, %v2551_v0, %v2553_v13  ;;  %v5875_v41 = vld.sshfl [vmem:[#allocation5 + $0x16] sm:$0x1 pattern:$0x76325410]  ;;  %6158 = vmatpush3.bf16.msra.mxu1 %v6487_v55  ;;  %v6493_v12 = vld [vmem:[%s8778_s7 + $0x158] sm:$0xff]  }
 0x3c1   :  { %2671 = vst.msk [vmem:[#allocation6 + $0x6] sm:$0x3] %vm2325_vm11, %v2669_v14  ;;  %v2555_v21 = vsel %vm2322_vm10, %v2551_v0, %v2554_v15  ;;  %2755 = vrot.lane.b32.xlu1 %v2754_v20, %s6707_s14  ;;  %v5867_v45 = vld.sshfl [vmem:[#allocation5 + $0x12] sm:$0x1 pattern:$0x76325410]  ;;  %6159 = vmatprep.subr.bf16.mxu1 %v6489_v60 }
 0x3c2   :  { %2557 = vst.msk [vmem:[#allocation6 + $0x4] sm:$0x3] %vm2325_vm11, %v2555_v21  ;;  %2641 = vrot.lane.b32.xlu0 %v2640_v23, %s6707_s14  ;;  %v5877_v50 = vld.sshfl [vmem:[#allocation5 + $0x17] sm:$0x1 pattern:$0x76325410] }
 0x3c3   :  { %v5869_v3 = vld.sshfl [vmem:[#allocation5 + $0x13] sm:$0x1 pattern:$0x76325410] }
 0x3c4   :  { %v2190_v24 = vpop.f32.mrb[22].mxu1  ;;  %v5871_v7 = vld.sshfl [vmem:[#allocation5 + $0x14] sm:$0x1 pattern:$0x76325410] }
 0x3c5   :  { %v2232_v25 = vmul.f32 %v7866_v9, %v2190_v24  ;;  %v5874_v28 = vld.sshfl [vmem:[#allocation5 + $0x55] sm:$0x1 pattern:$0x76325410]  ;;  %v2192_v30 = vpop.f32.mrb[23].mxu1 }
 0x3c6   :  { %v2920_v31 = vrot.slane %v5874_v28, 7  ;;  %v5866_v34 = vld.sshfl [vmem:[#allocation5 + $0x51] sm:$0x1 pattern:$0x76325410] }
 0x3c7   :  { %v2255_v37 = vadd.f32 %v7868_v11, %v2232_v25  ;;  %v2806_v39 = vrot.slane %v5866_v34, 7  ;;  %v5876_v42 = vld.sshfl [vmem:[#allocation5 + $0x56] sm:$0x1 pattern:$0x76325410] }
 0x3c8   :  { %v2921_v43 = vsel %vm2316_vm7, %v2920_v31, %v5873_v26  ;;  %v2949_v44 = vrot.slane %v5876_v42, 7  ;;  %v5868_v46 = vld.sshfl [vmem:[#allocation5 + $0x52] sm:$0x1 pattern:$0x76325410] }
 0x3c9   :  { %v2271_v47 = vmax.f32 %v2255_v37, 0.0  ;;  %v2922_v48 = vsel %vm2318_vm8, %v2920_v31, %v2921_v43  ;;  %v2807_v32 = vsel %vm2316_vm7, %v2806_v39, %v5865_v33  ;;  %v2835_v49 = vrot.slane %v5868_v46, 7  ;;  %v5878_v51 = vld.sshfl [vmem:[#allocation5 + $0x57] sm:$0x1 pattern:$0x76325410] }
 0x3ca   :  { %v2923_v52 = vsel %vm2320_vm9, %v2920_v31, %v2922_v48  ;;  %v2808_v29 = vsel %vm2318_vm8, %v2806_v39, %v2807_v32  ;;  %v2950_v53 = vsel %vm2316_vm7, %v2949_v44, %v5875_v41  ;;  %v2978_v40 = vrot.slane %v5878_v51, 7  ;;  %v5870_v54 = vld.sshfl [vmem:[#allocation5 + $0x53] sm:$0x1 pattern:$0x76325410] }
 0x3cb   :  { %2288 = vst.msk [vmem:[#allocation5 + $0x58] sm:$0xff] %vm2276_vm6, %v2271_v47  ;;  %v2924_v56 = vsel %vm2322_vm10, %v2920_v31, %v2923_v52  ;;  %v2809_v35 = vsel %vm2320_vm9, %v2806_v39, %v2808_v29  ;;  %v2951_v57 = vsel %vm2318_vm8, %v2949_v44, %v2950_v53  ;;  %v2836_v58 = vsel %vm2316_vm7, %v2835_v49, %v5867_v45  ;;  %v5872_v59 = vld.sshfl [vmem:[#allocation5 + $0x54] sm:$0x1 pattern:$0x76325410]  ;;  %v6497_v31 = vld [vmem:[%s8778_s7 + $0x160] sm:$0xff]  }
 0x3cc   :  { %2925 = vrot.lane.b32.xlu1 %v2924_v56, %s6706_s0  ;;  %v2810_v61 = vsel %vm2322_vm10, %v2806_v39, %v2809_v35  ;;  %v2952_v62 = vsel %vm2320_vm9, %v2949_v44, %v2951_v57  ;;  %v2837_v0 = vsel %vm2318_vm8, %v2835_v49, %v2836_v58  ;;  %v2979_v2 = vsel %vm2316_vm7, %v2978_v40, %v5877_v50  ;;  %v5864_v4 = vld.sshfl [vmem:[#allocation5 + $0x50] sm:$0x1 pattern:$0x76325410]  ;;  %v6498_v53 = vld [vmem:[%s8778_s7 + $0x120] sm:$0xff]  }
 0x3cd   :  { %2811 = vrot.lane.b32.xlu0 %v2810_v61, %s6706_s0  ;;  %v2838_v5 = vsel %vm2320_vm9, %v2835_v49, %v2837_v0  ;;  %v2980_v38 = vsel %vm2318_vm8, %v2978_v40, %v2979_v2  ;;  %v2864_v63 = vrot.slane %v5870_v54, 7  ;;  %v6490_v1 = vld [vmem:[%s8778_s7 + $0x110] sm:$0xff]   ;;  %v2893_v8 = vrot.slane %v5872_v59, 7  ;;  %v6501_v2 = vld [vmem:[%s8778_s7 + $0x168] sm:$0xff]  }
 0x3ce   :  { %v2779_v10 = vrot.slane %v5864_v4, 7  ;;  %v2953_v13 = vsel %vm2322_vm10, %v2949_v44, %v2952_v62  ;;  %v2839_v14 = vsel %vm2322_vm10, %v2835_v49, %v2838_v5  ;;  %v5863_v16 = vld.sshfl [vmem:[#allocation5 + $0x10] sm:$0x1 pattern:$0x76325410]  ;;  %v2981_v17 = vsel %vm2320_vm9, %v2978_v40, %v2980_v38  ;;  %6160 = vmatpush3.bf16.msra.mxu1 %v6490_v1 }
 0x3cf   :  { %v2865_v15 = vsel %vm2316_vm7, %v2864_v63, %v5869_v3  ;;  %v2894_v20 = vsel %vm2316_vm7, %v2893_v8, %v5871_v7  ;;  %v5889_v25 = vld.sshfl [vmem:[#allocation5 + $0x1d] sm:$0x1 pattern:$0x76325410]  ;;  %6161 = vmatprep.subr.bf16.mxu1 %v6493_v12  ;;  %v2982_v33 = vsel %vm2322_vm10, %v2978_v40, %v2981_v17 }
 0x3d0   :  { %2954 = vrot.lane.b32.xlu1 %v2953_v13, %s6711_s27  ;;  %v2866_v18 = vsel %vm2318_vm8, %v2864_v63, %v2865_v15  ;;  %v2780_v21 = vsel %vm2316_vm7, %v2779_v10, %v5863_v16  ;;  %v2895_v23 = vsel %vm2318_vm8, %v2893_v8, %v2894_v20  ;;  %v5881_v36 = vld.sshfl [vmem:[#allocation5 + $0x19] sm:$0x1 pattern:$0x76325410]  ;;  %v6503_v16 = vld [vmem:[%s8778_s7 + $0x128] sm:$0xff]  }
 0x3d1   :  { %2840 = vrot.lane.b32.xlu0 %v2839_v14, %s6711_s27  ;;  %v2867_v22 = vsel %vm2320_vm9, %v2864_v63, %v2866_v18  ;;  %v2781_v24 = vsel %vm2318_vm8, %v2779_v10, %v2780_v21  ;;  %v2896_v28 = vsel %vm2320_vm9, %v2893_v8, %v2895_v23  ;;  %v5891_v44 = vld.sshfl [vmem:[#allocation5 + $0x1e] sm:$0x1 pattern:$0x76325410]  ;;  %v6505_v21 = vld [vmem:[%s8778_s7 + $0x170] sm:$0xff]  }
 0x3d2   :  { %v5890_v26 = vld.sshfl [vmem:[#allocation5 + $0x5d] sm:$0x1 pattern:$0x76325410]  ;;  %v2782_v30 = vsel %vm2320_vm9, %v2779_v10, %v2781_v24  ;;  %v2897_v39 = vsel %vm2322_vm10, %v2893_v8, %v2896_v28  ;;  %v2868_v42 = vsel %vm2322_vm10, %v2864_v63, %v2867_v22  ;;  %6162 = vmatpush3.bf16.msra.mxu1 %v6494_v19 }
 0x3d3   :  { %v3148_v34 = vrot.slane %v5890_v26, 7  ;;  %v5882_v37 = vld.sshfl [vmem:[#allocation5 + $0x59] sm:$0x1 pattern:$0x76325410]  ;;  %v2783_v41 = vsel %vm2322_vm10, %v2779_v10, %v2782_v30  ;;  %6163 = vmatprep.subr.bf16.mxu1 %v6497_v31 }
 0x3d4   :  { %2983 = vrot.lane.b32.xlu1 %v2982_v33, %s6707_s14  ;;  %v3034_v43 = vrot.slane %v5882_v37, 7  ;;  %v5892_v45 = vld.sshfl [vmem:[#allocation5 + $0x5e] sm:$0x1 pattern:$0x76325410] }
 0x3d5   :  { %2899 = vst.msk [vmem:[#allocation6 + $0xa] sm:$0x3] %vm2325_vm11, %v2897_v39  ;;  %2785 = vst.msk [vmem:[#allocation6 + $0x8] sm:$0x3] %vm2325_vm11, %v2783_v41  ;;  %2869 = vrot.lane.b32.xlu0 %v2868_v42, %s6707_s14  ;;  %v3149_v46 = vsel %vm2316_vm7, %v3148_v34, %v5889_v25  ;;  %v3177_v47 = vrot.slane %v5892_v45, 7  ;;  %v6509_v42 = vld [vmem:[%s8778_s7 + $0x178] sm:$0xff]  }
 0x3d6   :  { %v5884_v48 = vld.sshfl [vmem:[#allocation5 + $0x5a] sm:$0x1 pattern:$0x76325410]  ;;  %v3150_v32 = vsel %vm2318_vm8, %v3148_v34, %v3149_v46  ;;  %v3035_v49 = vsel %vm2316_vm7, %v3034_v43, %v5881_v36  ;;  %v2195_v40 = vpop.f32.mrb[24].mxu1  ;;  %6164 = vmatpush3.bf16.msra.mxu1 %v6498_v53  ;;  %v6507_v36 = vld [vmem:[%s8778_s7 + $0x130] sm:$0xff]  }
 0x3d7   :  { %v5883_v50 = vld.sshfl [vmem:[#allocation5 + $0x1a] sm:$0x1 pattern:$0x76325410]  ;;  %v3063_v51 = vrot.slane %v5884_v48, 7  ;;  %v3151_v54 = vsel %vm2320_vm9, %v3148_v34, %v3150_v32  ;;  %v3036_v55 = vsel %vm2318_vm8, %v3034_v43, %v3035_v49  ;;  %v3178_v56 = vsel %vm2316_vm7, %v3177_v47, %v5891_v44  ;;  %v2197_v62 = vpop.f32.mrb[25].mxu1  ;;  %6165 = vmatprep.subr.bf16.mxu1 %v6501_v2 }
 0x3d8   :  { %v5893_v52 = vld.sshfl [vmem:[#allocation5 + $0x1f] sm:$0x1 pattern:$0x76325410]  ;;  %v2233_v58 = vmul.f32 %v7866_v9, %v2195_v40  ;;  %v3152_v59 = vsel %vm2322_vm10, %v3148_v34, %v3151_v54  ;;  %v3037_v60 = vsel %vm2320_vm9, %v3034_v43, %v3036_v55  ;;  %v3179_v61 = vsel %vm2318_vm8, %v3177_v47, %v3178_v56  ;;  %v6513_v46 = vld [vmem:[%s8778_s7 + $0x240] sm:$0xff]  }
 0x3d9   :  { %v5894_v29 = vld.sshfl [vmem:[#allocation5 + $0x5f] sm:$0x1 pattern:$0x76325410]  ;;  %3153 = vrot.lane.b32.xlu1 %v3152_v59, %s6706_s0  ;;  %v3038_v3 = vsel %vm2322_vm10, %v3034_v43, %v3037_v60  ;;  %v3180_v4 = vsel %vm2320_vm9, %v3177_v47, %v3179_v61  ;;  %v3064_v5 = vsel %vm2316_vm7, %v3063_v51, %v5883_v50 }
 0x3da   :  { %v3206_v35 = vrot.slane %v5894_v29, 7  ;;  %v5886_v57 = vld.sshfl [vmem:[#allocation5 + $0x5b] sm:$0x1 pattern:$0x76325410]  ;;  %v2256_v7 = vadd.f32 %v7868_v11, %v2233_v58  ;;  %3039 = vrot.lane.b32.xlu0 %v3038_v3, %s6706_s0  ;;  %v3065_v1 = vsel %vm2318_vm8, %v3063_v51, %v3064_v5  ;;  %v3181_v18 = vsel %vm2322_vm10, %v3177_v47, %v3180_v4  ;;  %6166 = vmatpush3.bf16.msra.mxu1 %v6503_v16 }
 0x3db   :  { %v5888_v0 = vld.sshfl [vmem:[#allocation5 + $0x5c] sm:$0x1 pattern:$0x76325410]  ;;  %v3066_v13 = vsel %vm2320_vm9, %v3063_v51, %v3065_v1  ;;  %v3092_v14 = vrot.slane %v5886_v57, 7  ;;  %6167 = vmatprep.subr.bf16.mxu1 %v6505_v21 }
 0x3dc   :  { %v3207_v38 = vsel %vm2316_vm7, %v3206_v35, %v5893_v52  ;;  %v5880_v63 = vld.sshfl [vmem:[#allocation5 + $0x58] sm:$0x1 pattern:$0x76325410]  ;;  %v3121_v15 = vrot.slane %v5888_v0, 7  ;;  %v2272_v17 = vmax.f32 %v2256_v7, 0.0  ;;  %v3067_v22 = vsel %vm2322_vm10, %v3063_v51, %v3066_v13 }
 0x3dd   :  { %v3208_v8 = vsel %vm2318_vm8, %v3206_v35, %v3207_v38  ;;  %v5885_v10 = vld.sshfl [vmem:[#allocation5 + $0x1b] sm:$0x1 pattern:$0x76325410]  ;;  %v3007_v20 = vrot.slane %v5880_v63, 7  ;;  %3182 = vrot.lane.b32.xlu1 %v3181_v18, %s6711_s27 }
 0x3de   :  { %v5887_v12 = vld.sshfl [vmem:[#allocation5 + $0x1c] sm:$0x1 pattern:$0x76325410]  ;;  %v3209_v23 = vsel %vm2320_vm9, %v3206_v35, %v3208_v8  ;;  %v3093_v24 = vsel %vm2316_vm7, %v3092_v14, %v5885_v10  ;;  %2289 = vst.msk [vmem:[#allocation5 + $0x60] sm:$0xff] %vm2276_vm6, %v2272_v17  ;;  %3068 = vrot.lane.b32.xlu0 %v3067_v22, %s6711_s27  ;;  %6168 = vmatpush3.bf16.msra.mxu1 %v6507_v36 }
 0x3df   :  { %v3122_v19 = vsel %vm2316_vm7, %v3121_v15, %v5887_v12  ;;  %v5879_v25 = vld.sshfl [vmem:[#allocation5 + $0x18] sm:$0x1 pattern:$0x76325410]  ;;  %v3094_v26 = vsel %vm2318_vm8, %v3092_v14, %v3093_v24  ;;  %v3210_v37 = vsel %vm2322_vm10, %v3206_v35, %v3209_v23  ;;  %6169 = vmatprep.subr.bf16.mxu1 %v6509_v42 }
 0x3e0   :  { %v3123_v28 = vsel %vm2318_vm8, %v3121_v15, %v3122_v19  ;;  %v3008_v30 = vsel %vm2316_vm7, %v3007_v20, %v5879_v25  ;;  %v3095_v31 = vsel %vm2320_vm9, %v3092_v14, %v3094_v26  ;;  %v6511_v45 = vld [vmem:[%s8778_s7 + $0x138] sm:$0xff]   ;;  %v5905_v48 = vld.sshfl [vmem:[#allocation5 + $0x25] sm:$0x1 pattern:$0x76325410] }
 0x3e1   :  { %v3124_v33 = vsel %vm2320_vm9, %v3121_v15, %v3123_v28  ;;  %v3009_v34 = vsel %vm2318_vm8, %v3007_v20, %v3008_v30  ;;  %3211 = vrot.lane.b32.xlu1 %v3210_v37, %s6707_s14  ;;  %v3096_v43 = vsel %vm2322_vm10, %v3092_v14, %v3095_v31  ;;  %v5897_v51 = vld.sshfl [vmem:[#allocation5 + $0x21] sm:$0x1 pattern:$0x76325410] }
 0x3e2   :  { %v3125_v39 = vsel %vm2322_vm10, %v3121_v15, %v3124_v33  ;;  %v3010_v41 = vsel %vm2320_vm9, %v3007_v20, %v3009_v34  ;;  %3097 = vrot.lane.b32.xlu0 %v3096_v43, %s6707_s14  ;;  %v5907_v40 = vld.sshfl [vmem:[#allocation5 + $0x26] sm:$0x1 pattern:$0x76325410]  ;;  %6170 = vmatpush3.bf16.msra.mxu1 %v6511_v45 }
 0x3e3   :  { %3127 = vst.msk [vmem:[#allocation6 + $0xe] sm:$0x3] %vm2325_vm11, %v3125_v39  ;;  %v3011_v44 = vsel %vm2322_vm10, %v3007_v20, %v3010_v41  ;;  %v5899_v57 = vld.sshfl [vmem:[#allocation5 + $0x22] sm:$0x1 pattern:$0x76325410]  ;;  %6199 = vmatprep.subr.bf16.mxu1 %v6513_v46 }
 0x3e4   :  { %3013 = vst.msk [vmem:[#allocation6 + $0xc] sm:$0x3] %vm2325_vm11, %v3011_v44  ;;  %v5909_v7 = vld.sshfl [vmem:[#allocation5 + $0x27] sm:$0x1 pattern:$0x76325410] }
 0x3e5   :  { %v2200_v47 = vpop.f32.mrb[26].mxu1  ;;  %v5906_v32 = vld.sshfl [vmem:[#allocation5 + $0x65] sm:$0x1 pattern:$0x76325410] }
 0x3e6   :  { %v2234_v49 = vmul.f32 %v7866_v9, %v2200_v47  ;;  %v3376_v50 = vrot.slane %v5906_v32, 7  ;;  %v5898_v52 = vld.sshfl [vmem:[#allocation5 + $0x61] sm:$0x1 pattern:$0x76325410]  ;;  %v2202_v29 = vpop.f32.mrb[27].mxu1 }
 0x3e7   :  { %v3262_v53 = vrot.slane %v5898_v52, 7  ;;  %v5908_v54 = vld.sshfl [vmem:[#allocation5 + $0x66] sm:$0x1 pattern:$0x76325410] }
 0x3e8   :  { %v2257_v55 = vadd.f32 %v7868_v11, %v2234_v49  ;;  %v3377_v56 = vsel %vm2316_vm7, %v3376_v50, %v5905_v48  ;;  %v3405_v35 = vrot.slane %v5908_v54, 7  ;;  %v5900_v58 = vld.sshfl [vmem:[#allocation5 + $0x62] sm:$0x1 pattern:$0x76325410] }
 0x3e9   :  { %v3378_v59 = vsel %vm2318_vm8, %v3376_v50, %v3377_v56  ;;  %v3263_v9 = vsel %vm2316_vm7, %v3262_v53, %v5897_v51  ;;  %v3291_v60 = vrot.slane %v5900_v58, 7  ;;  %v5910_v61 = vld.sshfl [vmem:[#allocation5 + $0x67] sm:$0x1 pattern:$0x76325410] }
 0x3ea   :  { %v2273_v62 = vmax.f32 %v2257_v55, 0.0  ;;  %v3379_v0 = vsel %vm2320_vm9, %v3376_v50, %v3378_v59  ;;  %v3264_v2 = vsel %vm2318_vm8, %v3262_v53, %v3263_v9  ;;  %v3406_v3 = vsel %vm2316_vm7, %v3405_v35, %v5907_v40  ;;  %v5902_v11 = vld.sshfl [vmem:[#allocation5 + $0x63] sm:$0x1 pattern:$0x76325410] }
 0x3eb   :  { %v3380_v4 = vsel %vm2322_vm10, %v3376_v50, %v3379_v0  ;;  %v3265_v5 = vsel %vm2320_vm9, %v3262_v53, %v3264_v2  ;;  %v3407_v38 = vsel %vm2318_vm8, %v3405_v35, %v3406_v3  ;;  %v3292_v63 = vsel %vm2316_vm7, %v3291_v60, %v5899_v57  ;;  %v5904_v1 = vld.sshfl [vmem:[#allocation5 + $0x64] sm:$0x1 pattern:$0x76325410]  ;;  %v6596_v2 = vld [vmem:[%s8776_s5] ss:$0 sm:$0xff] }
 0x3ec   :  { %2290 = vst.msk [vmem:[#allocation5 + $0x68] sm:$0xff] %vm2276_vm6, %v2273_v62  ;;  %3381 = vrot.lane.b32.xlu1 %v3380_v4, %s6706_s0  ;;  %v3266_v8 = vsel %vm2322_vm10, %v3262_v53, %v3265_v5  ;;  %v3408_v10 = vsel %vm2320_vm9, %v3405_v35, %v3407_v38  ;;  %v3293_v12 = vsel %vm2318_vm8, %v3291_v60, %v3292_v63  ;;  %v3434_v13 = vrot.slane %v5910_v61, 7  ;;  %v5896_v14 = vld.sshfl [vmem:[#allocation5 + $0x60] sm:$0x1 pattern:$0x76325410] }
 0x3ed   :  { %3267 = vrot.lane.b32.xlu0 %v3266_v8, %s6706_s0  ;;  %v3294_v15 = vsel %vm2320_vm9, %v3291_v60, %v3293_v12  ;;  %v5901_v16 = vld.sshfl [vmem:[#allocation5 + $0x23] sm:$0x1 pattern:$0x76325410]  ;;  %v3320_v17 = vrot.slane %v5902_v11, 7  ;;  %v3349_v18 = vrot.slane %v5904_v1, 7  ;;  %v3409_v20 = vsel %vm2322_vm10, %v3405_v35, %v3408_v10 }
 0x3ee   :  { %v3435_v21 = vsel %vm2316_vm7, %v3434_v13, %v5909_v7  ;;  %v5903_v22 = vld.sshfl [vmem:[#allocation5 + $0x24] sm:$0x1 pattern:$0x76325410]  ;;  %v3235_v23 = vrot.slane %v5896_v14, 7  ;;  %v3295_v24 = vsel %vm2322_vm10, %v3291_v60, %v3294_v15 }
 0x3ef   :  { %v3436_v19 = vsel %vm2318_vm8, %v3434_v13, %v3435_v21  ;;  %v3321_v25 = vsel %vm2316_vm7, %v3320_v17, %v5901_v16  ;;  %v3350_v26 = vsel %vm2316_vm7, %v3349_v18, %v5903_v22  ;;  %v5895_v28 = vld.sshfl [vmem:[#allocation5 + $0x20] sm:$0x1 pattern:$0x76325410] }
 0x3f0   :  { %3410 = vrot.lane.b32.xlu1 %v3409_v20, %s6711_s27  ;;  %v3437_v30 = vsel %vm2320_vm9, %v3434_v13, %v3436_v19  ;;  %v3322_v31 = vsel %vm2318_vm8, %v3320_v17, %v3321_v25  ;;  %v3351_v33 = vsel %vm2318_vm8, %v3349_v18, %v3350_v26  ;;  %v3236_v34 = vsel %vm2316_vm7, %v3235_v23, %v5895_v28  ;;  %v5921_v44 = vld.sshfl [vmem:[#allocation5 + $0x2d] sm:$0x1 pattern:$0x76325410] }
 0x3f1   :  { %3296 = vrot.lane.b32.xlu0 %v3295_v24, %s6711_s27  ;;  %v3323_v36 = vsel %vm2320_vm9, %v3320_v17, %v3322_v31  ;;  %v3352_v37 = vsel %vm2320_vm9, %v3349_v18, %v3351_v33  ;;  %v3237_v39 = vsel %vm2318_vm8, %v3235_v23, %v3236_v34  ;;  %v3438_v43 = vsel %vm2322_vm10, %v3434_v13, %v3437_v30  ;;  %v5913_v32 = vld.sshfl [vmem:[#allocation5 + $0x29] sm:$0x1 pattern:$0x76325410]  ;;  %v6597_v13 = vld [vmem:[#allocation7] ss:$0 sm:$0xff] }
 0x3f2   :  { %v3353_v41 = vsel %vm2322_vm10, %v3349_v18, %v3352_v37  ;;  %v3238_v42 = vsel %vm2320_vm9, %v3235_v23, %v3237_v39  ;;  %v3324_v47 = vsel %vm2322_vm10, %v3320_v17, %v3323_v36  ;;  %v5923_v51 = vld.sshfl [vmem:[#allocation5 + $0x2e] sm:$0x1 pattern:$0x76325410] }
 0x3f3   :  { %v5922_v45 = vld.sshfl [vmem:[#allocation5 + $0x6d] sm:$0x1 pattern:$0x76325410]  ;;  %3355 = vst.msk [vmem:[#allocation6 + $0x12] sm:$0x3] %vm2325_vm11, %v3353_v41  ;;  %v3239_v46 = vsel %vm2322_vm10, %v3235_v23, %v3238_v42 }
 0x3f4   :  { %3439 = vrot.lane.b32.xlu1 %v3438_v43, %s6707_s14  ;;  %v3604_v48 = vrot.slane %v5922_v45, 7  ;;  %v5914_v49 = vld.sshfl [vmem:[#allocation5 + $0x69] sm:$0x1 pattern:$0x76325410] }
 0x3f5   :  { %3241 = vst.msk [vmem:[#allocation6 + $0x10] sm:$0x3] %vm2325_vm11, %v3239_v46  ;;  %3325 = vrot.lane.b32.xlu0 %v3324_v47, %s6707_s14  ;;  %v3490_v50 = vrot.slane %v5914_v49, 7 }
 0x3f6   :  { %v5924_v52 = vld.sshfl [vmem:[#allocation5 + $0x6e] sm:$0x1 pattern:$0x76325410]  ;;  %v3605_v29 = vsel %vm2316_vm7, %v3604_v48, %v5921_v44 }
 0x3f7   :  { %v3633_v53 = vrot.slane %v5924_v52, 7  ;;  %v5916_v40 = vld.sshfl [vmem:[#allocation5 + $0x6a] sm:$0x1 pattern:$0x76325410]  ;;  %v3606_v54 = vsel %vm2318_vm8, %v3604_v48, %v3605_v29  ;;  %v3491_v55 = vsel %vm2316_vm7, %v3490_v50, %v5913_v32  ;;  %v2205_v59 = vpop.f32.mrb[28].mxu1 }
 0x3f8   :  { %v5915_v56 = vld.sshfl [vmem:[#allocation5 + $0x2a] sm:$0x1 pattern:$0x76325410]  ;;  %v3519_v35 = vrot.slane %v5916_v40, 7  ;;  %v3607_v9 = vsel %vm2320_vm9, %v3604_v48, %v3606_v54  ;;  %v3492_v60 = vsel %vm2318_vm8, %v3490_v50, %v3491_v55  ;;  %v2235_v3 = vmul.f32 %v6596_v2, %v2205_v59  ;;  %v2207_v38 = vpop.f32.mrb[29].mxu1 }
 0x3f9   :  { %v5925_v57 = vld.sshfl [vmem:[#allocation5 + $0x2f] sm:$0x1 pattern:$0x76325410]  ;;  %v3634_v61 = vsel %vm2316_vm7, %v3633_v53, %v5923_v51  ;;  %v3608_v11 = vsel %vm2322_vm10, %v3604_v48, %v3607_v9  ;;  %v3493_v4 = vsel %vm2320_vm9, %v3490_v50, %v3492_v60 }
 0x3fa   :  { %v5926_v58 = vld.sshfl [vmem:[#allocation5 + $0x6f] sm:$0x1 pattern:$0x76325410]  ;;  %v3635_v5 = vsel %vm2318_vm8, %v3633_v53, %v3634_v61  ;;  %3609 = vrot.lane.b32.xlu1 %v3608_v11, %s6706_s0  ;;  %v3494_v7 = vsel %vm2322_vm10, %v3490_v50, %v3493_v4  ;;  %v3520_v8 = vsel %vm2316_vm7, %v3519_v35, %v5915_v56  ;;  %v2258_v14 = vadd.f32 %v6597_v13, %v2235_v3 }
 0x3fb   :  { %v3662_v62 = vrot.slane %v5926_v58, 7  ;;  %v5918_v0 = vld.sshfl [vmem:[#allocation5 + $0x6b] sm:$0x1 pattern:$0x76325410]  ;;  %v3636_v1 = vsel %vm2320_vm9, %v3633_v53, %v3635_v5  ;;  %3495 = vrot.lane.b32.xlu0 %v3494_v7, %s6706_s0  ;;  %v3521_v15 = vsel %vm2318_vm8, %v3519_v35, %v3520_v8 }
 0x3fc   :  { %v5920_v63 = vld.sshfl [vmem:[#allocation5 + $0x6c] sm:$0x1 pattern:$0x76325410]  ;;  %v3522_v17 = vsel %vm2320_vm9, %v3519_v35, %v3521_v15  ;;  %v3548_v20 = vrot.slane %v5918_v0, 7  ;;  %v2274_v22 = vmax.f32 %v2258_v14, 0.0  ;;  %v3637_v23 = vsel %vm2322_vm10, %v3633_v53, %v3636_v1 }
 0x3fd   :  { %v3663_v10 = vsel %vm2316_vm7, %v3662_v62, %v5925_v57  ;;  %v5912_v12 = vld.sshfl [vmem:[#allocation5 + $0x68] sm:$0x1 pattern:$0x76325410]  ;;  %v3577_v21 = vrot.slane %v5920_v63, 7  ;;  %v3523_v25 = vsel %vm2322_vm10, %v3519_v35, %v3522_v17 }
 0x3fe   :  { %v3664_v16 = vsel %vm2318_vm8, %v3662_v62, %v3663_v10  ;;  %v5917_v18 = vld.sshfl [vmem:[#allocation5 + $0x2b] sm:$0x1 pattern:$0x76325410]  ;;  %v3463_v19 = vrot.slane %v5912_v12, 7  ;;  %3638 = vrot.lane.b32.xlu1 %v3637_v23, %s6711_s27  ;;  %2291 = vst.msk [vmem:[#allocation5 + $0x70] sm:$0xff] %vm2276_vm6, %v2274_v22 }
 0x3ff   :  { %v5919_v24 = vld.sshfl [vmem:[#allocation5 + $0x2c] sm:$0x1 pattern:$0x76325410]  ;;  %v3665_v26 = vsel %vm2320_vm9, %v3662_v62, %v3664_v16  ;;  %v3549_v28 = vsel %vm2316_vm7, %v3548_v20, %v5917_v18  ;;  %3524 = vrot.lane.b32.xlu0 %v3523_v25, %s6711_s27 }
 0x400   :  { %v3578_v30 = vsel %vm2316_vm7, %v3577_v21, %v5919_v24  ;;  %v5911_v31 = vld.sshfl [vmem:[#allocation5 + $0x28] sm:$0x1 pattern:$0x76325410]  ;;  %v3550_v33 = vsel %vm2318_vm8, %v3548_v20, %v3549_v28  ;;  %v3666_v43 = vsel %vm2322_vm10, %v3662_v62, %v3665_v26 }
 0x401   :  { %v3579_v34 = vsel %vm2318_vm8, %v3577_v21, %v3578_v30  ;;  %v3464_v36 = vsel %vm2316_vm7, %v3463_v19, %v5911_v31  ;;  %v3551_v37 = vsel %vm2320_vm9, %v3548_v20, %v3550_v33  ;;  %v2210_v42 = vpop.f32.mrb[30].mxu1  ;;  %v5937_v51 = vld.sshfl [vmem:[#allocation5 + $0x35] sm:$0x1 pattern:$0x76325410] }
 0x402   :  { %v3580_v39 = vsel %vm2320_vm9, %v3577_v21, %v3579_v34  ;;  %v3465_v41 = vsel %vm2318_vm8, %v3463_v19, %v3464_v36  ;;  %v2236_v46 = vmul.f32 %v6596_v2, %v2210_v42  ;;  %3667 = vrot.lane.b32.xlu1 %v3666_v43, %s6707_s14  ;;  %v3552_v47 = vsel %vm2322_vm10, %v3548_v20, %v3551_v37  ;;  %v2212_v48 = vpop.f32.mrb[31].mxu1  ;;  %v5929_v53 = vld.sshfl [vmem:[#allocation5 + $0x31] sm:$0x1 pattern:$0x76325410] }
 0x403   :  { %v3581_v44 = vsel %vm2322_vm10, %v3577_v21, %v3580_v39  ;;  %v3466_v45 = vsel %vm2320_vm9, %v3463_v19, %v3465_v41  ;;  %3553 = vrot.lane.b32.xlu0 %v3552_v47, %s6707_s14  ;;  %v5939_v55 = vld.sshfl [vmem:[#allocation5 + $0x36] sm:$0x1 pattern:$0x76325410] }
 0x404   :  { %3583 = vst.msk [vmem:[#allocation6 + $0x16] sm:$0x3] %vm2325_vm11, %v3581_v44  ;;  %v3467_v32 = vsel %vm2322_vm10, %v3463_v19, %v3466_v45  ;;  %v2259_v49 = vadd.f32 %v6597_v13, %v2236_v46  ;;  %v5931_v58 = vld.sshfl [vmem:[#allocation5 + $0x32] sm:$0x1 pattern:$0x76325410] }
 0x405   :  { %3469 = vst.msk [vmem:[#allocation6 + $0x14] sm:$0x3] %vm2325_vm11, %v3467_v32  ;;  %v5938_v52 = vld.sshfl [vmem:[#allocation5 + $0x75] sm:$0x1 pattern:$0x76325410] }
 0x406   :  { %v2275_v50 = vmax.f32 %v2259_v49, 0.0  ;;  %v3832_v29 = vrot.slane %v5938_v52, 7  ;;  %v5930_v40 = vld.sshfl [vmem:[#allocation5 + $0x71] sm:$0x1 pattern:$0x76325410] }
 0x407   :  { %v3718_v54 = vrot.slane %v5930_v40, 7  ;;  %v5940_v56 = vld.sshfl [vmem:[#allocation5 + $0x76] sm:$0x1 pattern:$0x76325410] }
 0x408   :  { %2292 = vst.msk [vmem:[#allocation5 + $0x78] sm:$0xff] %vm2276_vm6, %v2275_v50  ;;  %v3833_v35 = vsel %vm2316_vm7, %v3832_v29, %v5937_v51  ;;  %v3861_v57 = vrot.slane %v5940_v56, 7  ;;  %v5932_v59 = vld.sshfl [vmem:[#allocation5 + $0x72] sm:$0x1 pattern:$0x76325410] }
 0x409   :  { %v3834_v9 = vsel %vm2318_vm8, %v3832_v29, %v3833_v35  ;;  %v3719_v60 = vsel %vm2316_vm7, %v3718_v54, %v5929_v53  ;;  %v3747_v61 = vrot.slane %v5932_v59, 7  ;;  %v5941_v62 = vld.sshfl [vmem:[#allocation5 + $0x37] sm:$0x1 pattern:$0x76325410] }
 0x40a   :  { %v5942_v0 = vld.sshfl [vmem:[#allocation5 + $0x77] sm:$0x1 pattern:$0x76325410]  ;;  %v3835_v2 = vsel %vm2320_vm9, %v3832_v29, %v3834_v9  ;;  %v3720_v3 = vsel %vm2318_vm8, %v3718_v54, %v3719_v60  ;;  %v3862_v11 = vsel %vm2316_vm7, %v3861_v57, %v5939_v55 }
 0x40b   :  { %v3890_v4 = vrot.slane %v5942_v0, 7  ;;  %v5934_v5 = vld.sshfl [vmem:[#allocation5 + $0x73] sm:$0x1 pattern:$0x76325410]  ;;  %v3836_v38 = vsel %vm2322_vm10, %v3832_v29, %v3835_v2  ;;  %v3721_v63 = vsel %vm2320_vm9, %v3718_v54, %v3720_v3  ;;  %v3863_v7 = vsel %vm2318_vm8, %v3861_v57, %v3862_v11 }
 0x40c   :  { %v3748_v1 = vsel %vm2316_vm7, %v3747_v61, %v5931_v58  ;;  %v5936_v8 = vld.sshfl [vmem:[#allocation5 + $0x74] sm:$0x1 pattern:$0x76325410]  ;;  %3837 = vrot.lane.b32.xlu1 %v3836_v38, %s6706_s0  ;;  %v3722_v10 = vsel %vm2322_vm10, %v3718_v54, %v3721_v63  ;;  %v3864_v12 = vsel %vm2320_vm9, %v3861_v57, %v3863_v7  ;;  %v3776_v20 = vrot.slane %v5934_v5, 7 }
 0x40d   :  { %v3749_v13 = vsel %vm2318_vm8, %v3747_v61, %v3748_v1  ;;  %v3891_v14 = vsel %vm2316_vm7, %v3890_v4, %v5941_v62  ;;  %v5933_v15 = vld.sshfl [vmem:[#allocation5 + $0x33] sm:$0x1 pattern:$0x76325410]  ;;  %3723 = vrot.lane.b32.xlu0 %v3722_v10, %s6706_s0  ;;  %v3805_v19 = vrot.slane %v5936_v8, 7  ;;  %v3865_v28 = vsel %vm2322_vm10, %v3861_v57, %v3864_v12 }
 0x40e   :  { %v5928_v16 = vld.sshfl [vmem:[#allocation5 + $0x70] sm:$0x1 pattern:$0x76325410]  ;;  %v3750_v17 = vsel %vm2320_vm9, %v3747_v61, %v3749_v13  ;;  %v3892_v18 = vsel %vm2318_vm8, %v3890_v4, %v3891_v14  ;;  %v3777_v31 = vsel %vm2316_vm7, %v3776_v20, %v5933_v15 }
 0x40f   :  { %v5935_v21 = vld.sshfl [vmem:[#allocation5 + $0x34] sm:$0x1 pattern:$0x76325410]  ;;  %v3893_v22 = vsel %vm2320_vm9, %v3890_v4, %v3892_v18  ;;  %v3691_v26 = vrot.slane %v5928_v16, 7  ;;  %v3751_v30 = vsel %vm2322_vm10, %v3747_v61, %v3750_v17  ;;  %v3778_v39 = vsel %vm2318_vm8, %v3776_v20, %v3777_v31 }
 0x410   :  { %v5953_v23 = vld.sshfl [vmem:[#allocation5 + $0x3d] sm:$0x1 pattern:$0x76325410]  ;;  %3866 = vrot.lane.b32.xlu1 %v3865_v28, %s6711_s27  ;;  %v3894_v37 = vsel %vm2322_vm10, %v3890_v4, %v3893_v22  ;;  %v3806_v44 = vsel %vm2316_vm7, %v3805_v19, %v5935_v21  ;;  %v3779_v45 = vsel %vm2320_vm9, %v3776_v20, %v3778_v39 }
 0x411   :  { %v5954_v24 = vld.sshfl [vmem:[#allocation5 + $0x7d] sm:$0x1 pattern:$0x76325410]  ;;  %3752 = vrot.lane.b32.xlu0 %v3751_v30, %s6711_s27  ;;  %v3807_v53 = vsel %vm2318_vm8, %v3805_v19, %v3806_v44  ;;  %v3780_v57 = vsel %vm2322_vm10, %v3776_v20, %v3779_v45 }
 0x412   :  { %v5927_v25 = vld.sshfl [vmem:[#allocation5 + $0x30] sm:$0x1 pattern:$0x76325410]  ;;  %v4060_v33 = vrot.slane %v5954_v24, 7  ;;  %v3808_v63 = vsel %vm2320_vm9, %v3805_v19, %v3807_v53 }
 0x413   :  { %v5945_v34 = vld.sshfl [vmem:[#allocation5 + $0x39] sm:$0x1 pattern:$0x76325410]  ;;  %v3692_v49 = vsel %vm2316_vm7, %v3691_v26, %v5927_v25  ;;  %v3809_v10 = vsel %vm2322_vm10, %v3805_v19, %v3808_v63 }
 0x414   :  { %v5946_v36 = vld.sshfl [vmem:[#allocation5 + $0x79] sm:$0x1 pattern:$0x76325410]  ;;  %v4061_v46 = vsel %vm2316_vm7, %v4060_v33, %v5953_v23  ;;  %3895 = vrot.lane.b32.xlu1 %v3894_v37, %s6707_s14  ;;  %v3693_v7 = vsel %vm2318_vm8, %v3691_v26, %v3692_v49  ;;  %3811 = vst.msk [vmem:[#allocation6 + $0x1a] sm:$0x3] %vm2325_vm11, %v3809_v10 }
 0x415   :  { %v3946_v41 = vrot.slane %v5946_v36, 7  ;;  %v5955_v42 = vld.sshfl [vmem:[#allocation5 + $0x3e] sm:$0x1 pattern:$0x76325410]  ;;  %v4062_v50 = vsel %vm2318_vm8, %v4060_v33, %v4061_v46  ;;  %3781 = vrot.lane.b32.xlu0 %v3780_v57, %s6707_s14  ;;  %v3694_v12 = vsel %vm2320_vm9, %v3691_v26, %v3693_v7  ;;  %v6491_v7 = vld [vmem:[%s8778_s7 + $0xd0] sm:$0xff]  }
 0x416   :  { %v5956_v43 = vld.sshfl [vmem:[#allocation5 + $0x7e] sm:$0x1 pattern:$0x76325410]  ;;  %v4063_v40 = vsel %vm2320_vm9, %v4060_v33, %v4062_v50  ;;  %v3695_v14 = vsel %vm2322_vm10, %v3691_v26, %v3694_v12  ;;  %v6713_v49 = vmov 1983009808  }
 0x417   :  { %v4089_v47 = vrot.slane %v5956_v43, 7  ;;  %v5947_v48 = vld.sshfl [vmem:[#allocation5 + $0x3a] sm:$0x1 pattern:$0x76325410]  ;;  %v3947_v51 = vsel %vm2316_vm7, %v3946_v41, %v5945_v34  ;;  %v4064_v0 = vsel %vm2322_vm10, %v4060_v33, %v4063_v40  ;;  %v4137_v50 = vunpack.c.l.s4 %v6713_v49  ;;  %v6519_v49 = vld [vmem:[%s8778_s7 + $0x1c8] sm:$0xff]  }
 0x418   :  { %v5948_v32 = vld.sshfl [vmem:[#allocation5 + $0x7a] sm:$0x1 pattern:$0x76325410]  ;;  %v3948_v54 = vsel %vm2318_vm8, %v3946_v41, %v3947_v51  ;;  %4065 = vrot.lane.b32.xlu1 %v4064_v0, %s6706_s0  ;;  %3697 = vst.msk [vmem:[#allocation6 + $0x18] sm:$0x3] %vm2325_vm11, %v3695_v14  ;;  %v4139_v51 = vlaneseq }
 0x419   :  { %v3975_v52 = vrot.slane %v5948_v32, 7  ;;  %v5958_v29 = vld.sshfl [vmem:[#allocation5 + $0x7f] sm:$0x1 pattern:$0x76325410]  ;;  %v4090_v55 = vsel %vm2316_vm7, %v4089_v47, %v5955_v42  ;;  %v3949_v58 = vsel %vm2320_vm9, %v3946_v41, %v3948_v54  ;;  %v4138_v53 = vunpack.c.0.s8 %v4137_v50  ;;  %v6520_v50 = vld [vmem:[%s8778_s7 + $0x208] sm:$0xff]  }
 0x41a   :  { %v4118_v56 = vrot.slane %v5958_v29, 7  ;;  %v5950_v35 = vld.sshfl [vmem:[#allocation5 + $0x7b] sm:$0x1 pattern:$0x76325410]  ;;  %v4091_v59 = vsel %vm2318_vm8, %v4089_v47, %v4090_v55  ;;  %v3950_v4 = vsel %vm2322_vm10, %v3946_v41, %v3949_v58  ;;  %v4140_v40 = vshrl.u32 %v4139_v51, 7 }
 0x41b   :  { %v3976_v9 = vsel %vm2316_vm7, %v3975_v52, %v5947_v48  ;;  %v5957_v60 = vld.sshfl [vmem:[#allocation5 + $0x3f] sm:$0x1 pattern:$0x76325410]  ;;  %v4004_v3 = vrot.slane %v5950_v35, 7  ;;  %v4092_v5 = vsel %vm2320_vm9, %v4089_v47, %v4091_v59  ;;  %3951 = vrot.lane.b32.xlu0 %v3950_v4, %s6706_s0 }
 0x41c   :  { %v3977_v61 = vsel %vm2318_vm8, %v3975_v52, %v3976_v9  ;;  %v5952_v62 = vld.sshfl [vmem:[#allocation5 + $0x7c] sm:$0x1 pattern:$0x76325410]  ;;  %v4119_v2 = vsel %vm2316_vm7, %v4118_v56, %v5957_v60  ;;  %v4093_v21 = vsel %vm2322_vm10, %v4089_v47, %v4092_v5  ;;  %v8356_v54 = vsub.s32 %v4138_v53, %v4140_v40  ;;  %v6523_v40 = vld [vmem:[%s8778_s7 + $0x1d0] sm:$0xff]  }
 0x41d   :  { %v5944_v11 = vld.sshfl [vmem:[#allocation5 + $0x78] sm:$0x1 pattern:$0x76325410]  ;;  %v3978_v1 = vsel %vm2320_vm9, %v3975_v52, %v3977_v61  ;;  %v4120_v13 = vsel %vm2318_vm8, %v4118_v56, %v4119_v2  ;;  %v4033_v16 = vrot.slane %v5952_v62, 7  ;;  %4094 = vrot.lane.b32.xlu1 %v4093_v21, %s6711_s27  ;;  %v6483_v62 = vld [vmem:[%s8778_s7 + $0x80] sm:$0xff]  }
 0x41e   :  { %v5949_v38 = vld.sshfl [vmem:[#allocation5 + $0x3b] sm:$0x1 pattern:$0x76325410]  ;;  %v3919_v17 = vrot.slane %v5944_v11, 7  ;;  %v3979_v24 = vsel %vm2322_vm10, %v3975_v52, %v3978_v1  ;;  %v4121_v19 = vsel %vm2320_vm9, %v4118_v56, %v4120_v13  ;;  %v6486_v11 = vld [vmem:[%s8778_s7 + $0xc8] sm:$0xff]  }
 0x41f   :  { %v4005_v8 = vsel %vm2316_vm7, %v4004_v3, %v5949_v38  ;;  %v5951_v15 = vld.sshfl [vmem:[#allocation5 + $0x3c] sm:$0x1 pattern:$0x76325410]  ;;  %3980 = vrot.lane.b32.xlu0 %v3979_v24, %s6711_s27  ;;  %v2470_v36 = vpop.permute.xlu1 %2469  ;;  %v4122_v37 = vsel %vm2322_vm10, %v4118_v56, %v4121_v19  ;;  %v6488_v38 = vld [vmem:[%s8778_s7 + $0x88] sm:$0xff]   ;;  %v6492_v1 = vld [vmem:[%s8778_s7 + $0x90] sm:$0xff]  }
 0x420   :  { %v4006_v18 = vsel %vm2318_vm8, %v4004_v3, %v4005_v8  ;;  %v5943_v20 = vld.sshfl [vmem:[#allocation5 + $0x38] sm:$0x1 pattern:$0x76325410]  ;;  %v4034_v22 = vsel %vm2316_vm7, %v4033_v16, %v5951_v15  ;;  %2472 = vst.msk [vmem:[#allocation6 + $0x2] sm:$0x3] %vm2355_vm12, %v2470_v36  ;;  %v2353_v39 = vpop.permute.xlu0 %2352 }
 0x421   :  { %v3920_v23 = vsel %vm2316_vm7, %v3919_v17, %v5943_v20  ;;  %v4035_v25 = vsel %vm2318_vm8, %v4033_v16, %v4034_v22  ;;  %v4007_v28 = vsel %vm2320_vm9, %v4004_v3, %v4006_v18  ;;  %4123 = vrot.lane.b32.xlu1 %v4122_v37, %s6707_s14  ;;  %2356 = vst.msk [vmem:[#allocation6] sm:$0x3] %vm2355_vm12, %v2353_v39  ;;  %v6495_v10 = vld [vmem:[%s8778_s7 + $0xd8] sm:$0xff]   ;;  %v6499_v15 = vld [vmem:[%s8778_s7 + $0xe0] sm:$0xff]   ;;  %v6502_v20 = vld [vmem:[%s8778_s7 + $0xe8] sm:$0xff]  }
 0x422   :  { %v3921_v26 = vsel %vm2318_vm8, %v3919_v17, %v3920_v23  ;;  %v4036_v30 = vsel %vm2320_vm9, %v4033_v16, %v4035_v25  ;;  %v4008_v41 = vsel %vm2322_vm10, %v4004_v3, %v4007_v28  ;;  %v6496_v13 = vld [vmem:[%s8778_s7 + $0x98] sm:$0xff]   ;;  %v6504_v22 = vld [vmem:[%s8778_s7 + $0xa8] sm:$0xff]   ;;  %v6506_v23 = vld [vmem:[%s8778_s7 + $0xf0] sm:$0xff]  }
 0x423   :  { %v3922_v31 = vsel %vm2320_vm9, %v3919_v17, %v3921_v26  ;;  %v4037_v33 = vsel %vm2322_vm10, %v4033_v16, %v4036_v30  ;;  %4009 = vrot.lane.b32.xlu0 %v4008_v41, %s6707_s14  ;;  %v2499_v42 = vpop.permute.xlu1 %2498  ;;  %v6508_v24 = vld [vmem:[%s8778_s7 + $0xb0] sm:$0xff]   ;;  %v6510_v19 = vld [vmem:[%s8778_s7 + $0xf8] sm:$0xff]   ;;  %v6514_v36 = vld [vmem:[%s8778_s7 + $0x1c0] sm:$0xff]  }
 0x424   :  { %v3923_v34 = vsel %vm2322_vm10, %v3919_v17, %v3922_v31  ;;  %4039 = vst.msk [vmem:[#allocation6 + $0x1e] sm:$0x3] %vm2325_vm11, %v4037_v33  ;;  %v2383_v43 = vpop.permute.xlu0 %2382  ;;  %v6500_v17 = vld [vmem:[%s8778_s7 + $0xa0] sm:$0xff]   ;;  %v6512_v31 = vld [vmem:[%s8778_s7 + $0xb8] sm:$0xff]  }
 0x425   :  { %3925 = vst.msk [vmem:[#allocation6 + $0x1c] sm:$0x3] %vm2325_vm11, %v3923_v34  ;;  %v6515_v41 = vld [vmem:[%s8778_s7 + $0x200] sm:$0xff]  }
 0x426   :  { %2501 = vst.msk [vmem:[#allocation6 + $0x2] sm:$0x3] %vm2385_vm13, %v2499_v42  ;;  %2386 = vst.msk [vmem:[#allocation6] sm:$0x3] %vm2385_vm13, %v2383_v43 }
 0x427   :  { %v2528_v44 = vpop.permute.xlu1 %2527 }
 0x428   :  { %2530 = vst.msk [vmem:[#allocation6 + $0x2] sm:$0x3] %vm2415_vm14, %v2528_v44  ;;  %v2413_v45 = vpop.permute.xlu0 %2412 }
 0x429   :  { %2416 = vst.msk [vmem:[#allocation6] sm:$0x3] %vm2415_vm14, %v2413_v45  ;;  %v6516_v45 = vld [vmem:[%s8778_s7 + $0x180] sm:$0xff]  }
 0x42b   :  { %v2698_v46 = vpop.permute.xlu1 %2697 }
 0x42c   :  { %2700 = vst.msk [vmem:[#allocation6 + $0x6] sm:$0x3] %vm2355_vm12, %v2698_v46  ;;  %v2584_v47 = vpop.permute.xlu0 %2583 }
 0x42d   :  { %2586 = vst.msk [vmem:[#allocation6 + $0x4] sm:$0x3] %vm2355_vm12, %v2584_v47 }
 0x42f   :  { %v2727_v48 = vpop.permute.xlu1 %2726 }
 0x430   :  { %2729 = vst.msk [vmem:[#allocation6 + $0x6] sm:$0x3] %vm2385_vm13, %v2727_v48  ;;  %v2613_v32 = vpop.permute.xlu0 %2612 }
 0x431   :  { %2615 = vst.msk [vmem:[#allocation6 + $0x4] sm:$0x3] %vm2385_vm13, %v2613_v32  ;;  %v6518_v32 = vld [vmem:[%s8778_s7 + $0x248] sm:$0xff]  }
 0x433   :  { %v2756_v52 = vpop.permute.xlu1 %2755 }
 0x434   :  { %2758 = vst.msk [vmem:[#allocation6 + $0x6] sm:$0x3] %vm2415_vm14, %v2756_v52  ;;  %v2642_v29 = vpop.permute.xlu0 %2641  ;;  %v6521_v52 = vld [vmem:[%s8778_s7 + $0x188] sm:$0xff]  }
 0x435   :  { %2644 = vst.msk [vmem:[#allocation6 + $0x4] sm:$0x3] %vm2415_vm14, %v2642_v29  ;;  %v6522_v29 = vld [vmem:[%s8778_s7 + $0x250] sm:$0xff]  }
 0x43c   :  { %v4127_v55 = vld [vmem:[#allocation6] sm:$0xff] }
 0x43d   :  { %v4142_v35 = vrot.slane %v4127_v55, %v8356_v54  ;;  %v4135_v57 = vcombine.high %v4127_v55, %v4127_v55  ;;  %v6524_v55 = vld [vmem:[%s8778_s7 + $0x210] sm:$0xff]  }
 0x43e   :  { %v2926_v56 = vpop.permute.xlu1 %2925 }
 0x43f   :  { %2928 = vst.msk [vmem:[#allocation6 + $0xa] sm:$0x3] %vm2355_vm12, %v2926_v56  ;;  %v2812_v58 = vpop.permute.xlu0 %2811  ;;  %v4150_v59 = vcombine.high %v4142_v35, %v4142_v35  ;;  %v8362_v9 = vrot.slane %v4135_v57, %v8356_v54  ;;  %v4219_v3 = vpack.c.bf16 %v4142_v35, %v4142_v35  ;;  %v6525_v56 = vld [vmem:[%s8778_s7 + $0x190] sm:$0xff]   ;;  %v6526_v35 = vld [vmem:[%s8778_s7 + $0x258] sm:$0xff]  }
 0x440   :  { %2814 = vst.msk [vmem:[#allocation6 + $0x8] sm:$0x3] %vm2355_vm12, %v2812_v58  ;;  %v6527_v57 = vld [vmem:[%s8778_s7 + $0x1d8] sm:$0xff]  }
 0x441   :  { %v4220_v61 = vpack.c.bf16 %v4150_v59, %v4150_v59  ;;  %v4151_v0 = vcombine.high %v8362_v9, %v8362_v9  ;;  %v4221_v47 = vpack.c.bf16 %v8362_v9, %v8362_v9  ;;  %v6528_v9 = vld [vmem:[%s8778_s7 + $0x218] sm:$0xff]  }
 0x442   :  { %v2955_v60 = vpop.permute.xlu1 %2954 }
 0x443   :  { %2957 = vst.msk [vmem:[#allocation6 + $0xa] sm:$0x3] %vm2385_vm13, %v2955_v60  ;;  %v2841_v2 = vpop.permute.xlu0 %2840  ;;  %5298 = vmatprep.mubr.bf16.mxu0 %v4220_v61  ;;  %v4222_v4 = vpack.c.bf16 %v4151_v0, %v4151_v0  ;;  %v6529_v60 = vld [vmem:[%s8778_s7 + $0x198] sm:$0xff]   ;;  %v6530_v61 = vld [vmem:[%s8778_s7 + $0x260] sm:$0xff]  }
 0x444   :  { %2843 = vst.msk [vmem:[#allocation6 + $0x8] sm:$0x3] %vm2385_vm13, %v2841_v2  ;;  %5299 = vmatmul.mubr.bf16.vlgmr.msra.gmra.mrb[16].mxu0 %v4219_v3  ;;  %v6532_v3 = vld [vmem:[%s8778_s7 + $0x220] sm:$0xff]  }
 0x445   :  { %6134 = vmatpush3.bf16.msra.mxu0 %v6483_v62  ;;  %5338 = vmatprep.mubr.bf16.mxu0 %v4222_v4  ;;  %v6531_v62 = vld [vmem:[%s8778_s7 + $0x1e0] sm:$0xff]   ;;  %v6534_v4 = vld [vmem:[%s8778_s7 + $0x268] sm:$0xff]  }
 0x446   :  { %v2984_v5 = vpop.permute.xlu1 %2983  ;;  %6135 = vmatprep.subr.bf16.mxu0 %v6486_v11  ;;  %v6533_v11 = vld [vmem:[%s8778_s7 + $0x1a0] sm:$0xff]  }
 0x447   :  { %2986 = vst.msk [vmem:[#allocation6 + $0xa] sm:$0x3] %vm2415_vm14, %v2984_v5  ;;  %v2870_v63 = vpop.permute.xlu0 %2869  ;;  %v6535_v5 = vld [vmem:[%s8778_s7 + $0x1e8] sm:$0xff]  }
 0x448   :  { %2872 = vst.msk [vmem:[#allocation6 + $0x8] sm:$0x3] %vm2415_vm14, %v2870_v63 }
 0x449   :  { %6136 = vmatpush3.bf16.msra.mxu0 %v6488_v38 }
 0x44a   :  { %6137 = vmatprep.subr.bf16.mxu0 %v6491_v7  ;;  %v6536_v7 = vld [vmem:[%s8778_s7 + $0x228] sm:$0xff]  }
 0x44b   :  { %v3154_v8 = vpop.permute.xlu1 %3153 }
 0x44c   :  { %3156 = vst.msk [vmem:[#allocation6 + $0xe] sm:$0x3] %vm2355_vm12, %v3154_v8  ;;  %v3040_v12 = vpop.permute.xlu0 %3039  ;;  %v6538_v8 = vld [vmem:[%s8778_s7 + $0x270] sm:$0xff]  }
 0x44d   :  { %3042 = vst.msk [vmem:[#allocation6 + $0xc] sm:$0x3] %vm2355_vm12, %v3040_v12  ;;  %6138 = vmatpush3.bf16.msra.mxu0 %v6492_v1  ;;  %v6537_v1 = vld [vmem:[%s8778_s7 + $0x1a8] sm:$0xff]   ;;  %v6540_v12 = vld [vmem:[%s8778_s7 + $0x230] sm:$0xff]  }
 0x44e   :  { %6139 = vmatprep.subr.bf16.mxu0 %v6495_v10  ;;  %v6539_v10 = vld [vmem:[%s8778_s7 + $0x1f0] sm:$0xff]  }
 0x44f   :  { %v3183_v14 = vpop.permute.xlu1 %3182 }
 0x450   :  { %3185 = vst.msk [vmem:[#allocation6 + $0xe] sm:$0x3] %vm2385_vm13, %v3183_v14  ;;  %v3069_v16 = vpop.permute.xlu0 %3068  ;;  %v6542_v14 = vld [vmem:[%s8778_s7 + $0x278] sm:$0xff]  }
 0x451   :  { %3071 = vst.msk [vmem:[#allocation6 + $0xc] sm:$0x3] %vm2385_vm13, %v3069_v16  ;;  %6140 = vmatpush3.bf16.msra.mxu0 %v6496_v13  ;;  %v6541_v13 = vld [vmem:[%s8778_s7 + $0x1b0] sm:$0xff]   ;;  %v6544_v16 = vld [vmem:[%s8778_s7 + $0x238] sm:$0xff]  }
 0x452   :  { %6141 = vmatprep.subr.bf16.mxu0 %v6499_v15  ;;  %v6543_v15 = vld [vmem:[%s8778_s7 + $0x1f8] sm:$0xff]  }
 0x453   :  { %v3212_v18 = vpop.permute.xlu1 %3211 }
 0x454   :  { %3214 = vst.msk [vmem:[#allocation6 + $0xe] sm:$0x3] %vm2415_vm14, %v3212_v18  ;;  %v3098_v21 = vpop.permute.xlu0 %3097  ;;  %v6545_v18 = vld [vmem:[%s8778_s7 + $0x1b8] sm:$0xff]  }
 0x455   :  { %3100 = vst.msk [vmem:[#allocation6 + $0xc] sm:$0x3] %vm2415_vm14, %v3098_v21  ;;  %6142 = vmatpush3.bf16.msra.mxu0 %v6500_v17  ;;  %v6546_v21 = vld [vmem:[%s8778_s7 + $0x340] sm:$0xff]  }
 0x456   :  { %6143 = vmatprep.subr.bf16.mxu0 %v6502_v20 }
 0x459   :  { %6144 = vmatpush3.bf16.msra.mxu0 %v6504_v22 }
 0x45a   :  { %6145 = vmatprep.subr.bf16.mxu0 %v6506_v23 }
 0x45c   :  { %v4128_v25 = vld [vmem:[#allocation6 + $0x8] sm:$0xff] }
 0x45d   :  { %v4159_v26 = vrot.slane %v4128_v25, %v8356_v54  ;;  %v4152_v28 = vcombine.high %v4128_v25, %v4128_v25  ;;  %6146 = vmatpush3.bf16.msra.mxu0 %v6508_v24  ;;  %v6547_v24 = vld [vmem:[%s8778_s7 + $0x2c0] sm:$0xff]  }
 0x45e   :  { %v3382_v30 = vpop.permute.xlu1 %3381  ;;  %6147 = vmatprep.subr.bf16.mxu0 %v6510_v19 }
 0x45f   :  { %3384 = vst.msk [vmem:[#allocation6 + $0x12] sm:$0x3] %vm2355_vm12, %v3382_v30  ;;  %v3268_v33 = vpop.permute.xlu0 %3267  ;;  %v4167_v34 = vcombine.high %v4159_v26, %v4159_v26  ;;  %v8427_v37 = vrot.slane %v4152_v28, %v8356_v54  ;;  %v4223_v44 = vpack.c.bf16 %v4159_v26, %v4159_v26  ;;  %v6548_v30 = vld [vmem:[%s8778_s7 + $0x300] sm:$0xff]  }
 0x460   :  { %3270 = vst.msk [vmem:[#allocation6 + $0x10] sm:$0x3] %vm2355_vm12, %v3268_v33 }
 0x461   :  { %v4224_v39 = vpack.c.bf16 %v4167_v34, %v4167_v34  ;;  %v4168_v42 = vcombine.high %v8427_v37, %v8427_v37  ;;  %6148 = vmatpush3.bf16.msra.mxu0 %v6512_v31  ;;  %v6549_v31 = vld [vmem:[%s8778_s7 + $0x280] sm:$0xff]  }
 0x462   :  { %v3411_v43 = vpop.permute.xlu1 %3410  ;;  %6177 = vmatprep.subr.bf16.mxu0 %v6514_v36  ;;  %v4225_v36 = vpack.c.bf16 %v8427_v37, %v8427_v37  ;;  %v6553_v37 = vld [vmem:[%s8778_s7 + $0x308] sm:$0xff]  }
 0x463   :  { %3413 = vst.msk [vmem:[#allocation6 + $0x12] sm:$0x3] %vm2385_vm13, %v3411_v43  ;;  %v3297_v46 = vpop.permute.xlu0 %3296  ;;  %5378 = vmatprep.mubr.bf16.mxu1 %v4224_v39  ;;  %v4226_v48 = vpack.c.bf16 %v4168_v42, %v4168_v42 }
 0x464   :  { %3299 = vst.msk [vmem:[#allocation6 + $0x10] sm:$0x3] %vm2385_vm13, %v3297_v46  ;;  %5379 = vmatmul.mubr.bf16.vlgmr.msra.gmra.mrb[32].mxu1 %v4223_v44  ;;  %5339 = vmatmul.mubr.bf16.vlgmr.msra.gmra.mrb[20].mxu0 %v4221_v47  ;;  %v6552_v44 = vld [vmem:[%s8778_s7 + $0x2c8] sm:$0xff]   ;;  %v6555_v47 = vld [vmem:[%s8778_s7 + $0x350] sm:$0xff]  }
 0x465   :  { %6200 = vmatpush3.bf16.msra.mxu1 %v6515_v41  ;;  %6178 = vmatpush3.bf16.msra.mxu0 %v6516_v45  ;;  %v6551_v41 = vld [vmem:[%s8778_s7 + $0x348] sm:$0xff]  }
 0x466   :  { %5418 = vmatprep.mubr.bf16.mxu0 %v4226_v48  ;;  %v3440_v51 = vpop.permute.xlu1 %3439  ;;  %6201 = vmatprep.subr.bf16.mxu1 %v6518_v32  ;;  %v6554_v45 = vld [vmem:[%s8778_s7 + $0x288] sm:$0xff]   ;;  %v6556_v48 = vld [vmem:[%s8778_s7 + $0x2d0] sm:$0xff]  }
 0x467   :  { %3442 = vst.msk [vmem:[#allocation6 + $0x12] sm:$0x3] %vm2415_vm14, %v3440_v51  ;;  %v3326_v53 = vpop.permute.xlu0 %3325  ;;  %6179 = vmatprep.subr.bf16.mxu0 %v6519_v49  ;;  %v6557_v49 = vld [vmem:[%s8778_s7 + $0x310] sm:$0xff]  }
 0x468   :  { %3328 = vst.msk [vmem:[#allocation6 + $0x10] sm:$0x3] %vm2415_vm14, %v3326_v53 }
 0x469   :  { %6202 = vmatpush3.bf16.msra.mxu1 %v6520_v50  ;;  %6180 = vmatpush3.bf16.msra.mxu0 %v6521_v52  ;;  %v6558_v50 = vld [vmem:[%s8778_s7 + $0x290] sm:$0xff]   ;;  %v6559_v52 = vld [vmem:[%s8778_s7 + $0x358] sm:$0xff]  }
 0x46a   :  { %6203 = vmatprep.subr.bf16.mxu1 %v6522_v29  ;;  %6181 = vmatprep.subr.bf16.mxu0 %v6523_v40  ;;  %v6560_v29 = vld [vmem:[%s8778_s7 + $0x2d8] sm:$0xff]  }
 0x46b   :  { %v6561_v40 = vld [vmem:[%s8778_s7 + $0x318] sm:$0xff]  }
 0x46c   :  { %v3610_v58 = vpop.permute.xlu1 %3609 }
 0x46d   :  { %3612 = vst.msk [vmem:[#allocation6 + $0x16] sm:$0x3] %vm2355_vm12, %v3610_v58  ;;  %v3496_v59 = vpop.permute.xlu0 %3495  ;;  %6204 = vmatpush3.bf16.msra.mxu1 %v6524_v55  ;;  %6182 = vmatpush3.bf16.msra.mxu0 %v6525_v56  ;;  %v6562_v55 = vld [vmem:[%s8778_s7 + $0x298] sm:$0xff]  }
 0x46e   :  { %3498 = vst.msk [vmem:[#allocation6 + $0x14] sm:$0x3] %vm2355_vm12, %v3496_v59  ;;  %6205 = vmatprep.subr.bf16.mxu1 %v6526_v35  ;;  %6183 = vmatprep.subr.bf16.mxu0 %v6527_v57  ;;  %v6563_v35 = vld [vmem:[%s8778_s7 + $0x360] sm:$0xff]  }
 0x46f   :  { %v6564_v57 = vld [vmem:[%s8778_s7 + $0x2e0] sm:$0xff]  }
 0x470   :  { %v3639_v0 = vpop.permute.xlu1 %3638  ;;  %v6565_v59 = vld [vmem:[%s8778_s7 + $0x320] sm:$0xff]  }
 0x471   :  { %3641 = vst.msk [vmem:[#allocation6 + $0x16] sm:$0x3] %vm2385_vm13, %v3639_v0  ;;  %v3525_v2 = vpop.permute.xlu0 %3524  ;;  %6206 = vmatpush3.bf16.msra.mxu1 %v6528_v9  ;;  %6184 = vmatpush3.bf16.msra.mxu0 %v6529_v60  ;;  %v6566_v9 = vld [vmem:[%s8778_s7 + $0x2a0] sm:$0xff]  }
 0x472   :  { %3527 = vst.msk [vmem:[#allocation6 + $0x14] sm:$0x3] %vm2385_vm13, %v3525_v2  ;;  %6207 = vmatprep.subr.bf16.mxu1 %v6530_v61  ;;  %6185 = vmatprep.subr.bf16.mxu0 %v6531_v62  ;;  %v6567_v61 = vld [vmem:[%s8778_s7 + $0x368] sm:$0xff]  }
 0x473   :  { %v6568_v62 = vld [vmem:[%s8778_s7 + $0x2e8] sm:$0xff]  }
 0x474   :  { %v3668_v38 = vpop.permute.xlu1 %3667  ;;  %v6569_v2 = vld [vmem:[%s8778_s7 + $0x328] sm:$0xff]  }
 0x475   :  { %3670 = vst.msk [vmem:[#allocation6 + $0x16] sm:$0x3] %vm2415_vm14, %v3668_v38  ;;  %v3554_v63 = vpop.permute.xlu0 %3553  ;;  %6208 = vmatpush3.bf16.msra.mxu1 %v6532_v3  ;;  %6186 = vmatpush3.bf16.msra.mxu0 %v6533_v11  ;;  %v6570_v3 = vld [vmem:[%s8778_s7 + $0x2a8] sm:$0xff]   ;;  %v6571_v11 = vld [vmem:[%s8778_s7 + $0x370] sm:$0xff]  }
 0x476   :  { %3556 = vst.msk [vmem:[#allocation6 + $0x14] sm:$0x3] %vm2415_vm14, %v3554_v63  ;;  %6209 = vmatprep.subr.bf16.mxu1 %v6534_v4  ;;  %6187 = vmatprep.subr.bf16.mxu0 %v6535_v5  ;;  %v6572_v4 = vld [vmem:[%s8778_s7 + $0x2f0] sm:$0xff]   ;;  %v6575_v63 = vld [vmem:[%s8778_s7 + $0x378] sm:$0xff]  }
 0x477   :  { %v6573_v5 = vld [vmem:[%s8778_s7 + $0x330] sm:$0xff]  }
 0x478   :  { %v6574_v38 = vld [vmem:[%s8778_s7 + $0x2b0] sm:$0xff]  }
 0x479   :  { %6210 = vmatpush3.bf16.msra.mxu1 %v6536_v7  ;;  %6188 = vmatpush3.bf16.msra.mxu0 %v6537_v1  ;;  %v6576_v7 = vld [vmem:[%s8778_s7 + $0x2f8] sm:$0xff]  }
 0x47a   :  { %6211 = vmatprep.subr.bf16.mxu1 %v6538_v8  ;;  %6189 = vmatprep.subr.bf16.mxu0 %v6539_v10 }
 0x47d   :  { %6212 = vmatpush3.bf16.msra.mxu1 %v6540_v12  ;;  %v4129_v17 = vld [vmem:[#allocation6 + $0x10] sm:$0xff]  ;;  %6190 = vmatpush3.bf16.msra.mxu0 %v6541_v13  ;;  %v6577_v12 = vld [vmem:[%s8778_s7 + $0x338] sm:$0xff]  }
 0x47e   :  { %6213 = vmatprep.subr.bf16.mxu1 %v6542_v14  ;;  %v4176_v20 = vrot.slane %v4129_v17, %v8356_v54  ;;  %v4169_v22 = vcombine.high %v4129_v17, %v4129_v17  ;;  %v3838_v23 = vpop.permute.xlu1 %3837  ;;  %6191 = vmatprep.subr.bf16.mxu0 %v6543_v15  ;;  %v6578_v13 = vld [vmem:[%s8778_s7 + $0x2b8] sm:$0xff]   ;;  %v6579_v15 = vld [vmem:[%s8778_s7 + $0x3c0] sm:$0xff]  }
 0x47f   :  { %3840 = vst.msk [vmem:[#allocation6 + $0x1a] sm:$0x3] %vm2355_vm12, %v3838_v23  ;;  %v3724_v19 = vpop.permute.xlu0 %3723 }
 0x480   :  { %v4184_v25 = vcombine.high %v4176_v20, %v4176_v20  ;;  %v8543_v26 = vrot.slane %v4169_v22, %v8356_v54  ;;  %3726 = vst.msk [vmem:[#allocation6 + $0x18] sm:$0x3] %vm2355_vm12, %v3724_v19  ;;  %v4227_v39 = vpack.c.bf16 %v4176_v20, %v4176_v20  ;;  %v6580_v20 = vld [vmem:[%s8778_s7 + $0x380] sm:$0xff]   ;;  %v6584_v19 = vld [vmem:[%s8778_s7 + $0x3d0] sm:$0xff]  }
 0x481   :  { %6214 = vmatpush3.bf16.msra.mxu1 %v6544_v16  ;;  %6192 = vmatpush3.bf16.msra.mxu0 %v6545_v18 }
 0x482   :  { %v4228_v28 = vpack.c.bf16 %v4184_v25, %v4184_v25  ;;  %6243 = vmatprep.subr.bf16.mxu1 %v6546_v21  ;;  %v4185_v33 = vcombine.high %v8543_v26, %v8543_v26  ;;  %v3867_v34 = vpop.permute.xlu1 %3866  ;;  %6221 = vmatprep.subr.bf16.mxu0 %v6547_v24  ;;  %v4229_v22 = vpack.c.bf16 %v8543_v26, %v8543_v26  ;;  %v6582_v24 = vld [vmem:[%s8778_s7 + $0x3c8] sm:$0xff]   ;;  %v6585_v25 = vld [vmem:[%s8778_s7 + $0x390] sm:$0xff]   ;;  %v6586_v26 = vld [vmem:[%s8778_s7 + $0x3d8] sm:$0xff]  }
 0x483   :  { %3869 = vst.msk [vmem:[#allocation6 + $0x1a] sm:$0x3] %vm2385_vm13, %v3867_v34  ;;  %v3753_v42 = vpop.permute.xlu0 %3752  ;;  %v6591_v34 = vld [vmem:[%s8778_s7 + $0x3a8] sm:$0xff]  }
 0x484   :  { %5458 = vmatprep.mubr.bf16.mxu1 %v4228_v28  ;;  %v4230_v43 = vpack.c.bf16 %v4185_v33, %v4185_v33  ;;  %3755 = vst.msk [vmem:[#allocation6 + $0x18] sm:$0x3] %vm2385_vm13, %v3753_v42  ;;  %5419 = vmatmul.mubr.bf16.vlgmr.msra.gmra.mrb[24].mxu0 %v4225_v36  ;;  %v6587_v28 = vld [vmem:[%s8778_s7 + $0x398] sm:$0xff]   ;;  %v6590_v33 = vld [vmem:[%s8778_s7 + $0x3e8] sm:$0xff]   ;;  %v6592_v36 = vld [vmem:[%s8778_s7 + $0x3f0] sm:$0xff]  }
 0x485   :  { %5459 = vmatmul.mubr.bf16.vlgmr.msra.gmra.mrb[36].mxu1 %v4227_v39  ;;  %6222 = vmatpush3.bf16.msra.mxu0 %v6549_v31  ;;  %v6589_v31 = vld [vmem:[%s8778_s7 + $0x3a0] sm:$0xff]   ;;  %v6593_v39 = vld [vmem:[%s8778_s7 + $0x3b0] sm:$0xff]   ;;  %v6595_v42 = vld [vmem:[%s8778_s7 + $0x3b8] sm:$0xff]  }
 0x486   :  { %6244 = vmatpush3.bf16.msra.mxu1 %v6548_v30  ;;  %5498 = vmatprep.mubr.bf16.mxu0 %v4230_v43  ;;  %v3896_v46 = vpop.permute.xlu1 %3895  ;;  %v6588_v30 = vld [vmem:[%s8778_s7 + $0x3e0] sm:$0xff]  }
 0x487   :  { %6245 = vmatprep.subr.bf16.mxu1 %v6551_v41  ;;  %3898 = vst.msk [vmem:[#allocation6 + $0x1a] sm:$0x3] %vm2415_vm14, %v3896_v46  ;;  %v3782_v32 = vpop.permute.xlu0 %3781  ;;  %6223 = vmatprep.subr.bf16.mxu0 %v6552_v44  ;;  %v6594_v41 = vld [vmem:[%s8778_s7 + $0x3f8] sm:$0xff]   ;;  %v5587_v44 = vld [vmem:[%s8780_s9] sm:$0xff] }
 0x488   :  { %3784 = vst.msk [vmem:[#allocation6 + $0x18] sm:$0x3] %vm2415_vm14, %v3782_v32  ;;  %v5591_v32 = vld [vmem:[%s8780_s9 + $0x20] sm:$0xff] }
 0x489   :  { %6224 = vmatpush3.bf16.msra.mxu0 %v6554_v45  ;;  %v5589_v45 = vld [vmem:[%s8780_s9 + $0x10] sm:$0xff] }
 0x48a   :  { %6246 = vmatpush3.bf16.msra.mxu1 %v6553_v37  ;;  %v4066_v51 = vpop.permute.xlu1 %4065  ;;  %6225 = vmatprep.subr.bf16.mxu0 %v6556_v48  ;;  %v5588_v37 = vld [vmem:[%s8780_s9 + $0x8] sm:$0xff] }
 0x48b   :  { %6247 = vmatprep.subr.bf16.mxu1 %v6555_v47  ;;  %4068 = vst.msk [vmem:[#allocation6 + $0x1e] sm:$0x3] %vm2355_vm12, %v4066_v51  ;;  %v6417_v46 = vpack.c.bf16 %v5588_v37, %v5587_v44  ;;  %v5590_v47 = vld [vmem:[%s8780_s9 + $0x18] sm:$0xff]  ;;  %v5593_v51 = vld [vmem:[%s8780_s9 + $0x30] sm:$0xff] }
 0x48c   :  { %v6420_v48 = vpack.c.bf16 %v5590_v47, %v5589_v45 }
 0x48d   :  { %v3952_v53 = vpop.permute.xlu0 %3951  ;;  %6226 = vmatpush3.bf16.msra.mxu0 %v6558_v50 }
 0x48e   :  { %3954 = vst.msk [vmem:[#allocation6 + $0x1c] sm:$0x3] %vm2355_vm12, %v3952_v53  ;;  %6248 = vmatpush3.bf16.msra.mxu1 %v6557_v49  ;;  %6227 = vmatprep.subr.bf16.mxu0 %v6560_v29  ;;  %v5592_v49 = vld [vmem:[%s8780_s9 + $0x28] sm:$0xff]  ;;  %v5595_v53 = vld [vmem:[%s8780_s9 + $0x40] sm:$0xff] }
 0x48f   :  { %6249 = vmatprep.subr.bf16.mxu1 %v6559_v52  ;;  %v4095_v56 = vpop.permute.xlu1 %4094  ;;  %v6423_v50 = vpack.c.bf16 %v5592_v49, %v5591_v32  ;;  %v5594_v52 = vld [vmem:[%s8780_s9 + $0x38] sm:$0xff] }
 0x490   :  { %4097 = vst.msk [vmem:[#allocation6 + $0x1e] sm:$0x3] %vm2385_vm13, %v4095_v56  ;;  %v6426_v29 = vpack.c.bf16 %v5594_v52, %v5593_v51  ;;  %v5597_v56 = vld [vmem:[%s8780_s9 + $0x50] sm:$0xff]  ;;  %v6088_v52 = vld [vmem:[#allocation12] ss:$0 sm:$0xff] }
 0x491   :  { %v3981_v58 = vpop.permute.xlu0 %3980  ;;  %6228 = vmatpush3.bf16.msra.mxu0 %v6562_v55 }
 0x492   :  { %3983 = vst.msk [vmem:[#allocation6 + $0x1c] sm:$0x3] %vm2385_vm13, %v3981_v58  ;;  %6250 = vmatpush3.bf16.msra.mxu1 %v6561_v40  ;;  %6229 = vmatprep.subr.bf16.mxu0 %v6564_v57  ;;  %v5596_v40 = vld [vmem:[%s8780_s9 + $0x48] sm:$0xff] }
 0x493   :  { %6251 = vmatprep.subr.bf16.mxu1 %v6563_v35  ;;  %v4124_v60 = vpop.permute.xlu1 %4123  ;;  %v6429_v55 = vpack.c.bf16 %v5596_v40, %v5595_v53  ;;  %v5598_v35 = vld [vmem:[%s8780_s9 + $0x58] sm:$0xff] }
 0x494   :  { %4126 = vst.msk [vmem:[#allocation6 + $0x1e] sm:$0x3] %vm2415_vm14, %v4124_v60  ;;  %v6432_v57 = vpack.c.bf16 %v5598_v35, %v5597_v56 }
 0x495   :  { %v4010_v0 = vpop.permute.xlu0 %4009  ;;  %6230 = vmatpush3.bf16.msra.mxu0 %v6566_v9 }
 0x496   :  { %4012 = vst.msk [vmem:[#allocation6 + $0x1c] sm:$0x3] %vm2415_vm14, %v4010_v0  ;;  %6252 = vmatpush3.bf16.msra.mxu1 %v6565_v59  ;;  %6231 = vmatprep.subr.bf16.mxu0 %v6568_v62  ;;  %v5599_v62 = vld [vmem:[%s8780_s9 + $0x60] sm:$0xff]  ;;  %v5600_v0 = vld [vmem:[%s8780_s9 + $0x68] sm:$0xff] }
 0x497   :  { %6253 = vmatprep.subr.bf16.mxu1 %v6567_v61 }
 0x499   :  { %6232 = vmatpush3.bf16.msra.mxu0 %v6570_v3  ;;  %v6435_v3 = vpack.c.bf16 %v5600_v0, %v5599_v62 }
 0x49a   :  { %6254 = vmatpush3.bf16.msra.mxu1 %v6569_v2  ;;  %6233 = vmatprep.subr.bf16.mxu0 %v6572_v4  ;;  %v5601_v2 = vld [vmem:[%s8780_s9 + $0x70] sm:$0xff] }
 0x49b   :  { %6255 = vmatprep.subr.bf16.mxu1 %v6571_v11  ;;  %v5602_v11 = vld [vmem:[%s8780_s9 + $0x78] sm:$0xff]  ;;  %s6715_s9 = smov [#allocation13]  }
 0x49c   :  { %v6438_v4 = vpack.c.bf16 %v5602_v11, %v5601_v2  ;;  %s5688_s28 = sshll.u32 %s6715_s9, 4  ;;  %s5689_s28 = int_to_ptr.vmem [resolvable:$true] %s5688_s28 }
 0x49d   :  { %v4130_v1 = vld [vmem:[#allocation6 + $0x18] sm:$0xff]  ;;  %6234 = vmatpush3.bf16.msra.mxu0 %v6574_v38  ;;  %s6664_s6 = scalar_lea.vmem %s5689_s28, 32  ;;  %p6669_p11 = scmp.lt.s32.totalorder %s5689_s28, %s5689_s28 }
 0x49e   :  { %v4193_v8 = vrot.slane %v4130_v1, %v8356_v54  ;;  %v4186_v10 = vcombine.high %v4130_v1, %v4130_v1  ;;  %6256 = vmatpush3.bf16.msra.mxu1 %v6573_v5  ;;  %6235 = vmatprep.subr.bf16.mxu0 %v6576_v7  ;;  %v5959_v5 = vld [vmem:[#allocation10] ss:$0 sm:$0xff]  ;;  %p6665_p10 = scmp.ne.s32.totalorder %s5689_s28, %s6664_s6  ;;  %p6670_p12 = scmp.lt.s32.totalorder %s6664_s6, %s6664_s6 }
 0x49f   :  { %6257 = vmatprep.subr.bf16.mxu1 %v6575_v63 }
 0x4a0   :  { %v4201_v14 = vcombine.high %v4193_v8, %v4193_v8  ;;  %v4200_v16 = vrot.slane %v4186_v10, %v8356_v54  ;;  %v4231_v21 = vpack.c.bf16 %v4193_v8, %v4193_v8  ;;  %v6583_v54 = vld [vmem:[%s8778_s7 + $0x388] sm:$0xff]   ;;  %p6671_p13 = por %p6670_p12, %p6669_p11 }
 0x4a1   :  { %6236 = vmatpush3.bf16.msra.mxu0 %v6578_v13 }
 0x4a2   :  { %v4232_v17 = vpack.c.bf16 %v4201_v14, %v4201_v14  ;;  %v4202_v18 = vcombine.high %v4200_v16, %v4200_v16  ;;  %6258 = vmatpush3.bf16.msra.mxu1 %v6577_v12  ;;  %6265 = vmatprep.subr.bf16.mxu0 %v6579_v15  ;;  %v4233_v43 = vpack.c.bf16 %v4200_v16, %v4200_v16  ;;  %p6672_p0 = pnand %p6671_p13, %p6665_p10 }
 0x4a3   :  { %6416 = vmatprep.subr.bf16.mxu1 %v6709_v27 }
 0x4a4   :  { %5538 = vmatprep.mubr.bf16.mxu1 %v4232_v17  ;;  %v4234_v23 = vpack.c.bf16 %v4202_v18, %v4202_v18  ;;  %5499 = vmatmul.mubr.bf16.vlgmr.msra.gmra.mrb[28].mxu0 %v4229_v22 }
 0x4a5   :  { %5539 = vmatmul.mubr.bf16.vlgmr.msra.gmra.mrb[40].mxu1 %v4231_v21  ;;  %6266 = vmatpush3.bf16.msra.mxu0 %v6580_v20 }
 0x4a6   :  { %5578 = vmatprep.mubr.bf16.mxu0 %v4234_v23  ;;  %6267 = vmatprep.subr.bf16.mxu0 %v6582_v24 }
 0x4a7   :  { %6418 = vmatpush3.bf16.msra.mxu1 %v6417_v46  ;;  %6372 = vmatprep.mubr.msk.f32.mxu1 %vm6714_vm15, %v6704_v6 }
 0x4a8   :  { %6419 = vmatprep.subr.bf16.mxu1 %v6709_v27 }
 0x4a9   :  { %6268 = vmatpush3.bf16.msra.mxu0 %v6583_v54 }
 0x4aa   :  { %6269 = vmatprep.subr.bf16.mxu0 %v6584_v19 }
 0x4ab   :  { %6421 = vmatpush3.bf16.msra.mxu1 %v6420_v48 }
 0x4ac   :  { %6422 = vmatprep.subr.bf16.mxu1 %v6709_v27 }
 0x4ad   :  { %6270 = vmatpush3.bf16.msra.mxu0 %v6585_v25 }
 0x4ae   :  { %6271 = vmatprep.subr.bf16.mxu0 %v6586_v26 }
 0x4af   :  { %6424 = vmatpush3.bf16.msra.mxu1 %v6423_v50 }
 0x4b0   :  { %6425 = vmatprep.subr.bf16.mxu1 %v6709_v27 }
 0x4b1   :  { %6272 = vmatpush3.bf16.msra.mxu0 %v6587_v28 }
 0x4b2   :  { %6273 = vmatprep.subr.bf16.mxu0 %v6588_v30 }
 0x4b3   :  { %6427 = vmatpush3.bf16.msra.mxu1 %v6426_v29 }
 0x4b4   :  { %6428 = vmatprep.subr.bf16.mxu1 %v6709_v27 }
 0x4b5   :  { %6274 = vmatpush3.bf16.msra.mxu0 %v6589_v31 }
 0x4b6   :  { %6275 = vmatprep.subr.bf16.mxu0 %v6590_v33 }
 0x4b7   :  { %6430 = vmatpush3.bf16.msra.mxu1 %v6429_v55 }
 0x4b8   :  { %6431 = vmatprep.subr.bf16.mxu1 %v6709_v27 }
 0x4b9   :  { %6276 = vmatpush3.bf16.msra.mxu0 %v6591_v34 }
 0x4ba   :  { %6277 = vmatprep.subr.bf16.mxu0 %v6592_v36 }
 0x4bb   :  { %6433 = vmatpush3.bf16.msra.mxu1 %v6432_v57 }
 0x4bc   :  { %6434 = vmatprep.subr.bf16.mxu1 %v6709_v27 }
 0x4bd   :  { %6278 = vmatpush3.bf16.msra.mxu0 %v6593_v39 }
 0x4be   :  { %6279 = vmatprep.subr.bf16.mxu0 %v6594_v41 }
 0x4bf   :  { %6436 = vmatpush3.bf16.msra.mxu1 %v6435_v3 }
 0x4c0   :  { %6437 = vmatprep.subr.bf16.mxu1 %v6709_v27 }
 0x4c1   :  { %6280 = vmatpush3.bf16.msra.mxu0 %v6595_v42 }
 0x4c3   :  { %6439 = vmatpush3.bf16.msra.mxu1 %v6438_v4 }
 0x4c4   :  { %5579 = vmatmul.mubr.bf16.vlgmr.msra.gmra.mrb[32].mxu0 %v4233_v43 }
 0x517   :  { %v6127_v58 = vpop.f32.mrb[16].mxu0 }
 0x518   :  { %v6128_v59 = vpop.f32.mrb[17].mxu0 }
 0x519   :  { %v6129_v9 = vadd.f32 %v6128_v59, %v6127_v58  ;;  %v6130_v60 = vpop.f32.mrb[18].mxu0 }
 0x51a   :  { %v6131_v61 = vpop.f32.mrb[19].mxu0 }
 0x51b   :  { %v5301_v12 = vadd.f32 %v6129_v9, %v5959_v5 }
 0x537   :  { %v6171_v38 = vpop.f32.mrb[32].mxu1  ;;  %v6149_v63 = vpop.f32.mrb[20].mxu0 }
 0x538   :  { %v6172_v7 = vpop.f32.mrb[33].mxu1  ;;  %v6150_v1 = vpop.f32.mrb[21].mxu0 }
 0x539   :  { %v6173_v8 = vadd.f32 %v6172_v7, %v6171_v38  ;;  %v6174_v10 = vpop.f32.mrb[34].mxu1  ;;  %v6151_v13 = vadd.f32 %v6150_v1, %v6149_v63  ;;  %v6152_v14 = vpop.f32.mrb[22].mxu0 }
 0x53a   :  { %v6175_v15 = vpop.f32.mrb[35].mxu1  ;;  %v6153_v16 = vpop.f32.mrb[23].mxu0 }
 0x53b   :  { %v5341_v17 = vadd.f32 %v6151_v13, %v5301_v12 }
 0x53d   :  { %v5381_v18 = vadd.f32 %v6173_v8, %v5341_v17 }
 0x557   :  { %v6193_v6 = vpop.f32.mrb[24].mxu0 }
 0x558   :  { %v6215_v20 = vpop.f32.mrb[36].mxu1  ;;  %v6194_v21 = vpop.f32.mrb[25].mxu0 }
 0x559   :  { %v6216_v22 = vpop.f32.mrb[37].mxu1  ;;  %v6195_v27 = vadd.f32 %v6194_v21, %v6193_v6  ;;  %v6196_v24 = vpop.f32.mrb[26].mxu0 }
 0x55a   :  { %v6217_v23 = vadd.f32 %v6216_v22, %v6215_v20  ;;  %v6218_v54 = vpop.f32.mrb[38].mxu1  ;;  %v6197_v19 = vpop.f32.mrb[27].mxu0 }
 0x55b   :  { %v6219_v25 = vpop.f32.mrb[39].mxu1  ;;  %v5421_v26 = vadd.f32 %v6195_v27, %v5381_v18 }
 0x55d   :  { %v5461_v28 = vadd.f32 %v6217_v23, %v5421_v26 }
 0x577   :  { %v6237_v31 = vpop.f32.mrb[28].mxu0 }
 0x578   :  { %v6259_v30 = vpop.f32.mrb[40].mxu1  ;;  %v6238_v34 = vpop.f32.mrb[29].mxu0 }
 0x579   :  { %v6260_v33 = vpop.f32.mrb[41].mxu1  ;;  %v6239_v39 = vadd.f32 %v6238_v34, %v6237_v31  ;;  %v6240_v42 = vpop.f32.mrb[30].mxu0 }
 0x57a   :  { %v6261_v36 = vadd.f32 %v6260_v33, %v6259_v30  ;;  %v6262_v41 = vpop.f32.mrb[42].mxu1  ;;  %v6241_v44 = vpop.f32.mrb[31].mxu0 }
 0x57b   :  { %v6263_v43 = vpop.f32.mrb[43].mxu1  ;;  %v5501_v37 = vadd.f32 %v6239_v39, %v5461_v28 }
 0x57d   :  { %v5541_v45 = vadd.f32 %v6261_v36, %v5501_v37 }
 0x597   :  { %v6281_v46 = vpop.f32.mrb[32].mxu0 }
 0x598   :  { %v6282_v47 = vpop.f32.mrb[33].mxu0 }
 0x599   :  { %v6283_v48 = vadd.f32 %v6282_v47, %v6281_v46  ;;  %v6284_v32 = vpop.f32.mrb[34].mxu0 }
 0x59a   :  { %v6285_v49 = vpop.f32.mrb[35].mxu0 }
 0x59b   :  { %v5581_v50 = vadd.f32 %v6283_v48, %v5541_v45 }
 0x59d   :  { %v5586_v51 = vmax.f32 %v5581_v50, 0.0 }
 0x59f   :  { %6373 = vmatmul.mubr.f32.vlgmr.msra.gmra.mrb[44].mxu1 %v5586_v51 }
 0x672   :  { %v5676_v29 = vpop.f32.mrb[44].mxu1 }
 0x673   :  { %v5677_v53 = vadd.f32 %v6088_v52, %v5676_v29  ;;  %v6374_v40 = vpop.f32.mrb[45].mxu1 }
 0x675   :  { %5681 = vst.msk [vmem:[#allocation13] sm:$0x3] %vm5680_vm0, %v5677_v53 }
 0x676   :  { %6675 = shalt.err (!%p6672_p0)
}
 0x677   :  { %s6676_s15 = scalar_lea.hbm %s8782_s11, 32 }
 0x678   :  { %p6677_p1 = scmp.ne.s32.totalorder %s8782_s11, %s6676_s15  ;;  %p6680_p2 = scmp.lt.u32.totalorder %s6676_s15, %s8782_s11 }
 0x67a   :  { %p6682_p3 = pnand %p6680_p2, %p6677_p1 }
 0x67c   :  { %6685 = shalt.err (!%p6682_p3)
}
 0x67d   :  { %5691 = dma.vmem_to_hbm [thread:$0]  %s5689_s28, 32, %s8782_s11, [#allocation9]  }
 0x67e   :  { %6690 = dma.done.wait [#allocation9], 32  }
 0x67f   :  { %6691 = vsyncadd [#allocation9], 4294967264 }
 0x680   :  { %5695 = vsyncpa [#allocation8], 1 }
 0x681   :  { %5696 = vsyncpa [#allocation11], 1 }
 0x682   :  { %5697 = vsyncpa [#allocation9], 1 }

</bundles_post_ra>
